<compile_context>
chip_gen: v5e
topology: v5e:2x2
jax: 0.10.0
libtpu: 0.0.40
codegen_flags: <defaults>
</compile_context>

<pallas_src>
import math
import functools

import jax
import jax.numpy as jnp
from jax import lax
from jax.experimental import pallas as pl
from jax.experimental.pallas import tpu as pltpu

# ---- hyper-parameters (the undefined module-level constants, chosen small) ----
EMBEDDING_SIZE = 32          # d_model
N_HEADS = 4
HEAD_DIM = EMBEDDING_SIZE // N_HEADS
DIM_FEEDFORWARD = 64
N_TRANSFORMER_LAYERS = 2
MAX_LENGTH = 64
SRC_VOCAB_SIZE = 50
LN_EPS = 1e-5


def _layer_norm(z, g, b):
    mu = jnp.mean(z, axis=-1, keepdims=True)
    var = jnp.mean((z - mu) ** 2, axis=-1, keepdims=True)
    return (z - mu) * lax.rsqrt(var + LN_EPS) * g + b


# =====================================================================
# Single fused kernel.  grid = (B_pad // B_BLK,): one block of B_BLK
# sequences per grid step; activations stay (B_BLK*S, E) for projections.
# =====================================================================
def _encoder_kernel(b_blk, S,
                    tok_ref,                                   # VMEM (Sb, 1) int32
                    table_ref, pe_ref,                         # VMEM consts
                    wqkv_ref, bqkv_ref, wo_ref, bo_ref,
                    g1_ref, be1_ref, w1_ref, b1_ref,
                    w2_ref, b2_ref, g2_ref, be2_ref,           # stacked (L, ...) weights
                    out_ref):                                  # (Sb, E)
    E = EMBEDDING_SIZE
    V = SRC_VOCAB_SIZE
    Sb = b_blk * S

    # ---- embedding gather: one-hot @ table on the MXU (vectorized, no scalar chain) ----
    tok = tok_ref[...]                                           # (Sb, 1) int32
    vocab_iota = lax.broadcasted_iota(jnp.int32, (Sb, V), 1)     # (Sb, V)
    onehot = (tok == vocab_iota).astype(jnp.float32)             # (Sb, V)
    emb = jnp.dot(onehot, table_ref[...],
                  preferred_element_type=jnp.float32)            # (Sb, E)

    # eval mode: X = emb ; X = X + dropout(X + pe)  ->  2*emb + pe
    x = 2.0 * emb + pe_ref[...]                                  # (Sb, E)

    scale = 1.0 / math.sqrt(HEAD_DIM)

    for l in range(N_TRANSFORMER_LAYERS):                        # static unrolled (L small)
        # -------- self-attention: fused QKV projection, rows = B_BLK*S --------
        qkv = jnp.dot(x, wqkv_ref[l],
                      preferred_element_type=jnp.float32) + bqkv_ref[l]   # (Sb, 3E)
        q = qkv[:, 0:E].reshape(b_blk, S, E)                     # split leading dim (free)
        k = qkv[:, E:2 * E].reshape(b_blk, S, E)
        v = qkv[:, 2 * E:3 * E].reshape(b_blk, S, E)

        heads = []
        for h in range(N_HEADS):                                 # static unrolled head loop
            sl = slice(h * HEAD_DIM, (h + 1) * HEAD_DIM)
            qh, kh, vh = q[..., sl], k[..., sl], v[..., sl]      # (b_blk, S, hd)
            s = jnp.einsum('bqd,bkd->bqk', qh, kh,
                           preferred_element_type=jnp.float32) * scale    # (b_blk, S, S)
            s = s - jnp.max(s, axis=-1, keepdims=True)
            p = jnp.exp(s)
            p = p / jnp.sum(p, axis=-1, keepdims=True)           # exact softmax
            heads.append(jnp.einsum('bqk,bkd->bqd', p, vh,
                                    preferred_element_type=jnp.float32))  # (b_blk, S, hd)
        # one fused output projection instead of 4 tiny K=8 matmuls
        attn = jnp.concatenate(heads, axis=-1).reshape(Sb, E)    # (Sb, E)
        attn = jnp.dot(attn, wo_ref[l],
                       preferred_element_type=jnp.float32) + bo_ref[l]

        # -------- post-norm residual 1 --------
        h1 = _layer_norm(x + attn, g1_ref[l], be1_ref[l])

        # -------- feed-forward (ReLU) --------
        ff = jnp.dot(h1, w1_ref[l], preferred_element_type=jnp.float32) + b1_ref[l]
        ff = jnp.maximum(ff, 0.0)
        ff = jnp.dot(ff, w2_ref[l], preferred_element_type=jnp.float32) + b2_ref[l]

        # -------- post-norm residual 2 --------
        x = _layer_norm(h1 + ff, g2_ref[l], be2_ref[l])

    out_ref[...] = x


def encoder_forward(tokens, table, pe, params):
    B, S = tokens.shape
    V, E = table.shape
    assert S <= MAX_LENGTH

    # Sequences per grid step: fill ~128 MXU rows, but keep >=2 grid steps
    # whenever B >= 2 so both v7x TensorCores get work.
    b_blk = max(1, min(B, max(1, 128 // S)))
    if B >= 2 and pl.cdiv(B, b_blk) < 2:
        b_blk = pl.cdiv(B, 2)
    grid_b = pl.cdiv(B, b_blk)
    B_pad = grid_b * b_blk

    tok = tokens
    if B_pad != B:
        tok = jnp.concatenate(
            [tokens, jnp.zeros((B_pad - B, S), tokens.dtype)], axis=0)
    tok_flat = tok.reshape(B_pad * S, 1).astype(jnp.int32)       # flat, no SMEM padding blow-up

    Sb = b_blk * S
    pe_blk = jnp.tile(pe[:S], (b_blk, 1))                        # (Sb, E), per-block PE

    weight_names = ("wqkv", "bqkv", "wo", "bo", "g1", "be1",
                    "w1", "b1", "w2", "b2", "g2", "be2")
    weights = [params[name] for name in weight_names]

    def _const_spec(arr):
        nd = arr.ndim
        # constant block index across the grid -> DMA'd once, VMEM-resident
        return pl.BlockSpec(arr.shape, lambda i, _nd=nd: (0,) * _nd)

    out = pl.pallas_call(
        functools.partial(_encoder_kernel, b_blk, S),
        out_shape=jax.ShapeDtypeStruct((B_pad * S, E), jnp.float32),
        grid_spec=pltpu.PrefetchScalarGridSpec(
            num_scalar_prefetch=0,
            grid=(grid_b,),
            in_specs=[pl.BlockSpec((Sb, 1), lambda i: (i, 0)),
                      _const_spec(table), _const_spec(pe_blk)]
                     + [_const_spec(w) for w in weights],
            out_specs=pl.BlockSpec((Sb, E), lambda i: (i, 0)),
        ),
        compiler_params=pltpu.CompilerParams(
            dimension_semantics=("parallel",)),
    )(tok_flat, table, pe_blk, *weights)

    out = out.reshape(B_pad, S, E)[:B]
    return jnp.transpose(out, (1, 0, 2))           # (S, B, E), like PyTorch output


# =====================================================================
# Parameter construction (deterministic) and positional encoding
# =====================================================================
def make_positional_encoding():
    pos = jnp.arange(MAX_LENGTH, dtype=jnp.float32)[:, None]
    div = jnp.exp(jnp.arange(0, EMBEDDING_SIZE, 2, dtype=jnp.float32)
                  * (-math.log(10000.0) / EMBEDDING_SIZE))
    ang = pos * div
    pe = jnp.zeros((MAX_LENGTH, EMBEDDING_SIZE), jnp.float32)
    pe = pe.at[:, 0::2].set(jnp.sin(ang))
    pe = pe.at[:, 1::2].set(jnp.cos(ang))
    return pe


def init_params(key):
    E, F, V, L = EMBEDDING_SIZE, DIM_FEEDFORWARD, SRC_VOCAB_SIZE, N_TRANSFORMER_LAYERS
    keys = jax.random.split(key, 1 + 12 * L)
    table = jax.random.normal(keys[0], (V, E), jnp.float32)

    wqkv, wo, w1, w2 = [], [], [], []
    bqkv, bo, b1, b2 = [], [], [], []
    g1, be1, g2, be2 = [], [], [], []
    for l in range(L):
        k = keys[1 + 12 * l: 1 + 12 * (l + 1)]
        wq = 0.05 * jax.random.normal(k[0], (E, E), jnp.float32)
        wk = 0.05 * jax.random.normal(k[1], (E, E), jnp.float32)
        wv = 0.05 * jax.random.normal(k[2], (E, E), jnp.float32)
        wqkv.append(jnp.concatenate([wq, wk, wv], axis=1))          # (E, 3E)
        wo.append(0.05 * jax.random.normal(k[3], (E, E), jnp.float32))
        w1.append(0.05 * jax.random.normal(k[4], (E, F), jnp.float32))
        w2.append(0.05 * jax.random.normal(k[5], (F, E), jnp.float32))
        bqkv.append(0.01 * jax.random.normal(k[6], (1, 3 * E), jnp.float32))
        bo.append(0.01 * jax.random.normal(k[7], (1, E), jnp.float32))
        b1.append(0.01 * jax.random.normal(k[8], (1, F), jnp.float32))
        b2.append(0.01 * jax.random.normal(k[9], (1, E), jnp.float32))
        g1.append(1.0 + 0.01 * jax.random.normal(k[10], (1, E), jnp.float32))
        g2.append(1.0 + 0.01 * jax.random.normal(k[11], (1, E), jnp.float32))
        be1.append(jnp.zeros((1, E), jnp.float32))
        be2.append(jnp.zeros((1, E), jnp.float32))

    params = dict(
        wqkv=jnp.stack(wqkv), bqkv=jnp.stack(bqkv),
        wo=jnp.stack(wo), bo=jnp.stack(bo),
        g1=jnp.stack(g1), be1=jnp.stack(be1),
        w1=jnp.stack(w1), b1=jnp.stack(b1),
        w2=jnp.stack(w2), b2=jnp.stack(b2),
        g2=jnp.stack(g2), be2=jnp.stack(be2),
    )
    return table, params


# ---------------- pure-JAX reference (sanity check) ----------------
def _reference_forward(tokens, table, pe, params):
    B, S = tokens.shape
    E, H, hd = EMBEDDING_SIZE, N_HEADS, HEAD_DIM
    x = 2.0 * table[tokens] + pe[None, :S, :]
    for l in range(N_TRANSFORMER_LAYERS):
        qkv = x @ params["wqkv"][l] + params["bqkv"][l]
        q, k, v = qkv[..., :E], qkv[..., E:2 * E], qkv[..., 2 * E:]
        qh = q.reshape(B, S, H, hd).transpose(0, 2, 1, 3)
        kh = k.reshape(B, S, H, hd).transpose(0, 2, 1, 3)
        vh = v.reshape(B, S, H, hd).transpose(0, 2, 1, 3)
        s = jnp.einsum("bhqd,bhkd->bhqk", qh, kh) / math.sqrt(hd)
        pr = jax.nn.softmax(s, axis=-1)
        a = jnp.einsum("bhqk,bhkd->bhqd", pr, vh).transpose(0, 2, 1, 3).reshape(B, S, E)
        a = a @ params["wo"][l] + params["bo"][l]
        h1 = _layer_norm(x + a, params["g1"][l], params["be1"][l])
        ff = jnp.maximum(h1 @ params["w1"][l] + params["b1"][l], 0.0)
        ff = ff @ params["w2"][l] + params["b2"][l]
        x = _layer_norm(h1 + ff, params["g2"][l], params["be2"][l])
    return jnp.transpose(x, (1, 0, 2))


if __name__ == "__main__":
    B, S = 8, 8
    key = jax.random.PRNGKey(0)
    k_tok, k_par = jax.random.split(key)
    tokens = jax.random.randint(k_tok, (B, S), 0, SRC_VOCAB_SIZE, dtype=jnp.int32)

    table, params = init_params(k_par)
    pe = make_positional_encoding()

    out = encoder_forward(tokens, table, pe, params)
    out = jax.block_until_ready(out)

    ref = _reference_forward(tokens, table, pe, params)
    assert out.shape == (S, B, EMBEDDING_SIZE)
    assert bool(jnp.all(jnp.isfinite(out)))
    assert bool(jnp.allclose(out, ref, atol=2e-2, rtol=2e-2))

    print("KERNEL_OK")
</pallas_src>

<mosaic_0001>
module attributes {stable_mosaic.version = 11 : i64} {
  func.func @_encoder_kernel(%arg0: i32, %arg1: memref<32x1xi32, #tpu.memory_space<vmem>>, %arg2: memref<50x32xf32, #tpu.memory_space<vmem>>, %arg3: memref<32x32xf32, #tpu.memory_space<vmem>>, %arg4: memref<2x32x96xf32, #tpu.memory_space<vmem>>, %arg5: memref<2x1x96xf32, #tpu.memory_space<vmem>>, %arg6: memref<2x32x32xf32, #tpu.memory_space<vmem>>, %arg7: memref<2x1x32xf32, #tpu.memory_space<vmem>>, %arg8: memref<2x1x32xf32, #tpu.memory_space<vmem>>, %arg9: memref<2x1x32xf32, #tpu.memory_space<vmem>>, %arg10: memref<2x32x64xf32, #tpu.memory_space<vmem>>, %arg11: memref<2x1x64xf32, #tpu.memory_space<vmem>>, %arg12: memref<2x64x32xf32, #tpu.memory_space<vmem>>, %arg13: memref<2x1x32xf32, #tpu.memory_space<vmem>>, %arg14: memref<2x1x32xf32, #tpu.memory_space<vmem>>, %arg15: memref<2x1x32xf32, #tpu.memory_space<vmem>>, %arg16: memref<32x32xf32, #tpu.memory_space<vmem>>) attributes {dimension_semantics = [#tpu.dimension_semantics<parallel>], iteration_bounds = array<i64: 2>, scalar_prefetch = 0 : i64, scratch_operands = 0 : i64, tpu.core_type = #tpu.core_type<tc>, window_params = [{transform_indices = @transform_0, window_bounds = array<i64: 32, 1>}, {pipeline_mode = #tpu.pipeline_mode<synchronous>, transform_indices = @transform_1, window_bounds = array<i64: 50, 32>}, {pipeline_mode = #tpu.pipeline_mode<synchronous>, transform_indices = @transform_2, window_bounds = array<i64: 32, 32>}, {pipeline_mode = #tpu.pipeline_mode<synchronous>, transform_indices = @transform_3, window_bounds = array<i64: 2, 32, 96>}, {pipeline_mode = #tpu.pipeline_mode<synchronous>, transform_indices = @transform_4, window_bounds = array<i64: 2, 1, 96>}, {pipeline_mode = #tpu.pipeline_mode<synchronous>, transform_indices = @transform_5, window_bounds = array<i64: 2, 32, 32>}, {pipeline_mode = #tpu.pipeline_mode<synchronous>, transform_indices = @transform_6, window_bounds = array<i64: 2, 1, 32>}, {pipeline_mode = #tpu.pipeline_mode<synchronous>, transform_indices = @transform_7, window_bounds = array<i64: 2, 1, 32>}, {pipeline_mode = #tpu.pipeline_mode<synchronous>, transform_indices = @transform_8, window_bounds = array<i64: 2, 1, 32>}, {pipeline_mode = #tpu.pipeline_mode<synchronous>, transform_indices = @transform_9, window_bounds = array<i64: 2, 32, 64>}, {pipeline_mode = #tpu.pipeline_mode<synchronous>, transform_indices = @transform_10, window_bounds = array<i64: 2, 1, 64>}, {pipeline_mode = #tpu.pipeline_mode<synchronous>, transform_indices = @transform_11, window_bounds = array<i64: 2, 64, 32>}, {pipeline_mode = #tpu.pipeline_mode<synchronous>, transform_indices = @transform_12, window_bounds = array<i64: 2, 1, 32>}, {pipeline_mode = #tpu.pipeline_mode<synchronous>, transform_indices = @transform_13, window_bounds = array<i64: 2, 1, 32>}, {pipeline_mode = #tpu.pipeline_mode<synchronous>, transform_indices = @transform_14, window_bounds = array<i64: 2, 1, 32>}, {transform_indices = @transform_15, window_bounds = array<i64: 32, 32>}]} {
    %c0 = arith.constant 0 : index
    %c0_0 = arith.constant 0 : index
    %0 = vector.load %arg1[%c0, %c0_0] : memref<32x1xi32, #tpu.memory_space<vmem>>, vector<32x1xi32>
    %1 = tpu.iota {dimensions = array<i32: 1>} : vector<32x50xi32>
    %2 = vector.broadcast %0 : vector<32x1xi32> to vector<32x50xi32>
    %3 = arith.cmpi eq, %2, %1 : vector<32x50xi32>
    %4 = arith.extui %3 : vector<32x50xi1> to vector<32x50xi32>
    %5 = arith.sitofp %4 : vector<32x50xi32> to vector<32x50xf32>
    %c0_1 = arith.constant 0 : index
    %c0_2 = arith.constant 0 : index
    %6 = vector.load %arg2[%c0_1, %c0_2] : memref<50x32xf32, #tpu.memory_space<vmem>>, vector<50x32xf32>
    %cst = arith.constant dense<0.000000e+00> : vector<32x32xf32>
    %7 = tpu.matmul %5, %6, %cst {dimension_numbers = #tpu.dot_dimension_numbers<[1], [0], [0], [1], [0, 0, 1, 1], [], []>} : vector<32x50xf32>, vector<50x32xf32>, vector<32x32xf32> -> vector<32x32xf32>
    %cst_3 = arith.constant 2.000000e+00 : f32
    %8 = vector.broadcast %cst_3 : f32 to vector<32x32xf32>
    %9 = arith.mulf %8, %7 : vector<32x32xf32>
    %c0_4 = arith.constant 0 : index
    %c0_5 = arith.constant 0 : index
    %10 = vector.load %arg3[%c0_4, %c0_5] : memref<32x32xf32, #tpu.memory_space<vmem>>, vector<32x32xf32>
    %11 = arith.addf %9, %10 : vector<32x32xf32>
    %c0_6 = arith.constant 0 : index
    %c0_7 = arith.constant 0 : index
    %c0_8 = arith.constant 0 : index
    %12 = vector.load %arg4[%c0_6, %c0_7, %c0_8] : memref<2x32x96xf32, #tpu.memory_space<vmem>>, vector<1x32x96xf32>
    %13 = vector.shape_cast %12 : vector<1x32x96xf32> to vector<32x96xf32>
    %cst_9 = arith.constant dense<0.000000e+00> : vector<32x96xf32>
    %14 = tpu.matmul %11, %13, %cst_9 {dimension_numbers = #tpu.dot_dimension_numbers<[1], [0], [0], [1], [0, 0, 1, 1], [], []>} : vector<32x32xf32>, vector<32x96xf32>, vector<32x96xf32> -> vector<32x96xf32>
    %c0_10 = arith.constant 0 : index
    %c0_11 = arith.constant 0 : index
    %c0_12 = arith.constant 0 : index
    %15 = vector.load %arg5[%c0_10, %c0_11, %c0_12] : memref<2x1x96xf32, #tpu.memory_space<vmem>>, vector<1x1x96xf32>
    %16 = vector.shape_cast %15 : vector<1x1x96xf32> to vector<1x96xf32>
    %17 = vector.broadcast %16 : vector<1x96xf32> to vector<32x96xf32>
    %18 = arith.addf %14, %17 : vector<32x96xf32>
    %19 = vector.extract_strided_slice %18 {offsets = [0, 0], sizes = [32, 32], strides = [1, 1]} : vector<32x96xf32> to vector<32x32xf32>
    %20 = vector.shape_cast %19 : vector<32x32xf32> to vector<4x8x32xf32>
    %21 = vector.extract_strided_slice %18 {offsets = [0, 32], sizes = [32, 32], strides = [1, 1]} : vector<32x96xf32> to vector<32x32xf32>
    %22 = vector.shape_cast %21 : vector<32x32xf32> to vector<4x8x32xf32>
    %23 = vector.extract_strided_slice %18 {offsets = [0, 64], sizes = [32, 32], strides = [1, 1]} : vector<32x96xf32> to vector<32x32xf32>
    %24 = vector.shape_cast %23 : vector<32x32xf32> to vector<4x8x32xf32>
    %25 = vector.extract_strided_slice %20 {offsets = [0, 0, 0], sizes = [4, 8, 8], strides = [1, 1, 1]} : vector<4x8x32xf32> to vector<4x8x8xf32>
    %26 = vector.extract_strided_slice %22 {offsets = [0, 0, 0], sizes = [4, 8, 8], strides = [1, 1, 1]} : vector<4x8x32xf32> to vector<4x8x8xf32>
    %27 = vector.extract_strided_slice %24 {offsets = [0, 0, 0], sizes = [4, 8, 8], strides = [1, 1, 1]} : vector<4x8x32xf32> to vector<4x8x8xf32>
    "tpu.trace_start"() <{level = 10 : i32, message = "bqd,bkd->bqk"}> : () -> ()
    %cst_13 = arith.constant dense<0.000000e+00> : vector<4x8x8xf32>
    %28 = tpu.matmul %25, %26, %cst_13 {dimension_numbers = #tpu.dot_dimension_numbers<[2], [2], [1], [1], [0, 0, 0, 1, 1, 1], [0], [0]>} : vector<4x8x8xf32>, vector<4x8x8xf32>, vector<4x8x8xf32> -> vector<4x8x8xf32>
    "tpu.trace_stop"() : () -> ()
    %cst_14 = arith.constant 0.353553385 : f32
    %29 = vector.broadcast %cst_14 : f32 to vector<4x8x8xf32>
    %30 = arith.mulf %28, %29 : vector<4x8x8xf32>
    %cst_15 = arith.constant dense<0xFF800000> : vector<4x8xf32>
    %31 = vector.multi_reduction <maximumf>, %30, %cst_15 [2] : vector<4x8x8xf32> to vector<4x8xf32>
    %32 = vector.shape_cast %31 : vector<4x8xf32> to vector<4x8x1xf32>
    %33 = vector.broadcast %32 : vector<4x8x1xf32> to vector<4x8x8xf32>
    %34 = arith.subf %30, %33 : vector<4x8x8xf32>
    %35 = math.exp %34 : vector<4x8x8xf32>
    %cst_16 = arith.constant dense<0.000000e+00> : vector<4x8xf32>
    %36 = vector.multi_reduction <add>, %35, %cst_16 [2] : vector<4x8x8xf32> to vector<4x8xf32>
    %37 = vector.shape_cast %36 : vector<4x8xf32> to vector<4x8x1xf32>
    %38 = vector.broadcast %37 : vector<4x8x1xf32> to vector<4x8x8xf32>
    %39 = arith.divf %35, %38 : vector<4x8x8xf32>
    "tpu.trace_start"() <{level = 10 : i32, message = "bqk,bkd->bqd"}> : () -> ()
    %cst_17 = arith.constant dense<0.000000e+00> : vector<4x8x8xf32>
    %40 = tpu.matmul %39, %27, %cst_17 {dimension_numbers = #tpu.dot_dimension_numbers<[2], [1], [1], [2], [0, 0, 0, 1, 1, 2], [0], [0]>} : vector<4x8x8xf32>, vector<4x8x8xf32>, vector<4x8x8xf32> -> vector<4x8x8xf32>
    "tpu.trace_stop"() : () -> ()
    %41 = vector.extract_strided_slice %20 {offsets = [0, 0, 8], sizes = [4, 8, 8], strides = [1, 1, 1]} : vector<4x8x32xf32> to vector<4x8x8xf32>
    %42 = vector.extract_strided_slice %22 {offsets = [0, 0, 8], sizes = [4, 8, 8], strides = [1, 1, 1]} : vector<4x8x32xf32> to vector<4x8x8xf32>
    %43 = vector.extract_strided_slice %24 {offsets = [0, 0, 8], sizes = [4, 8, 8], strides = [1, 1, 1]} : vector<4x8x32xf32> to vector<4x8x8xf32>
    "tpu.trace_start"() <{level = 10 : i32, message = "bqd,bkd->bqk"}> : () -> ()
    %cst_18 = arith.constant dense<0.000000e+00> : vector<4x8x8xf32>
    %44 = tpu.matmul %41, %42, %cst_18 {dimension_numbers = #tpu.dot_dimension_numbers<[2], [2], [1], [1], [0, 0, 0, 1, 1, 1], [0], [0]>} : vector<4x8x8xf32>, vector<4x8x8xf32>, vector<4x8x8xf32> -> vector<4x8x8xf32>
    "tpu.trace_stop"() : () -> ()
    %cst_19 = arith.constant 0.353553385 : f32
    %45 = vector.broadcast %cst_19 : f32 to vector<4x8x8xf32>
    %46 = arith.mulf %44, %45 : vector<4x8x8xf32>
    %cst_20 = arith.constant dense<0xFF800000> : vector<4x8xf32>
    %47 = vector.multi_reduction <maximumf>, %46, %cst_20 [2] : vector<4x8x8xf32> to vector<4x8xf32>
    %48 = vector.shape_cast %47 : vector<4x8xf32> to vector<4x8x1xf32>
    %49 = vector.broadcast %48 : vector<4x8x1xf32> to vector<4x8x8xf32>
    %50 = arith.subf %46, %49 : vector<4x8x8xf32>
    %51 = math.exp %50 : vector<4x8x8xf32>
    %cst_21 = arith.constant dense<0.000000e+00> : vector<4x8xf32>
    %52 = vector.multi_reduction <add>, %51, %cst_21 [2] : vector<4x8x8xf32> to vector<4x8xf32>
    %53 = vector.shape_cast %52 : vector<4x8xf32> to vector<4x8x1xf32>
    %54 = vector.broadcast %53 : vector<4x8x1xf32> to vector<4x8x8xf32>
    %55 = arith.divf %51, %54 : vector<4x8x8xf32>
    "tpu.trace_start"() <{level = 10 : i32, message = "bqk,bkd->bqd"}> : () -> ()
    %cst_22 = arith.constant dense<0.000000e+00> : vector<4x8x8xf32>
    %56 = tpu.matmul %55, %43, %cst_22 {dimension_numbers = #tpu.dot_dimension_numbers<[2], [1], [1], [2], [0, 0, 0, 1, 1, 2], [0], [0]>} : vector<4x8x8xf32>, vector<4x8x8xf32>, vector<4x8x8xf32> -> vector<4x8x8xf32>
    "tpu.trace_stop"() : () -> ()
    %57 = vector.extract_strided_slice %20 {offsets = [0, 0, 16], sizes = [4, 8, 8], strides = [1, 1, 1]} : vector<4x8x32xf32> to vector<4x8x8xf32>
    %58 = vector.extract_strided_slice %22 {offsets = [0, 0, 16], sizes = [4, 8, 8], strides = [1, 1, 1]} : vector<4x8x32xf32> to vector<4x8x8xf32>
    %59 = vector.extract_strided_slice %24 {offsets = [0, 0, 16], sizes = [4, 8, 8], strides = [1, 1, 1]} : vector<4x8x32xf32> to vector<4x8x8xf32>
    "tpu.trace_start"() <{level = 10 : i32, message = "bqd,bkd->bqk"}> : () -> ()
    %cst_23 = arith.constant dense<0.000000e+00> : vector<4x8x8xf32>
    %60 = tpu.matmul %57, %58, %cst_23 {dimension_numbers = #tpu.dot_dimension_numbers<[2], [2], [1], [1], [0, 0, 0, 1, 1, 1], [0], [0]>} : vector<4x8x8xf32>, vector<4x8x8xf32>, vector<4x8x8xf32> -> vector<4x8x8xf32>
    "tpu.trace_stop"() : () -> ()
    %cst_24 = arith.constant 0.353553385 : f32
    %61 = vector.broadcast %cst_24 : f32 to vector<4x8x8xf32>
    %62 = arith.mulf %60, %61 : vector<4x8x8xf32>
    %cst_25 = arith.constant dense<0xFF800000> : vector<4x8xf32>
    %63 = vector.multi_reduction <maximumf>, %62, %cst_25 [2] : vector<4x8x8xf32> to vector<4x8xf32>
    %64 = vector.shape_cast %63 : vector<4x8xf32> to vector<4x8x1xf32>
    %65 = vector.broadcast %64 : vector<4x8x1xf32> to vector<4x8x8xf32>
    %66 = arith.subf %62, %65 : vector<4x8x8xf32>
    %67 = math.exp %66 : vector<4x8x8xf32>
    %cst_26 = arith.constant dense<0.000000e+00> : vector<4x8xf32>
    %68 = vector.multi_reduction <add>, %67, %cst_26 [2] : vector<4x8x8xf32> to vector<4x8xf32>
    %69 = vector.shape_cast %68 : vector<4x8xf32> to vector<4x8x1xf32>
    %70 = vector.broadcast %69 : vector<4x8x1xf32> to vector<4x8x8xf32>
    %71 = arith.divf %67, %70 : vector<4x8x8xf32>
    "tpu.trace_start"() <{level = 10 : i32, message = "bqk,bkd->bqd"}> : () -> ()
    %cst_27 = arith.constant dense<0.000000e+00> : vector<4x8x8xf32>
    %72 = tpu.matmul %71, %59, %cst_27 {dimension_numbers = #tpu.dot_dimension_numbers<[2], [1], [1], [2], [0, 0, 0, 1, 1, 2], [0], [0]>} : vector<4x8x8xf32>, vector<4x8x8xf32>, vector<4x8x8xf32> -> vector<4x8x8xf32>
    "tpu.trace_stop"() : () -> ()
    %73 = vector.extract_strided_slice %20 {offsets = [0, 0, 24], sizes = [4, 8, 8], strides = [1, 1, 1]} : vector<4x8x32xf32> to vector<4x8x8xf32>
    %74 = vector.extract_strided_slice %22 {offsets = [0, 0, 24], sizes = [4, 8, 8], strides = [1, 1, 1]} : vector<4x8x32xf32> to vector<4x8x8xf32>
    %75 = vector.extract_strided_slice %24 {offsets = [0, 0, 24], sizes = [4, 8, 8], strides = [1, 1, 1]} : vector<4x8x32xf32> to vector<4x8x8xf32>
    "tpu.trace_start"() <{level = 10 : i32, message = "bqd,bkd->bqk"}> : () -> ()
    %cst_28 = arith.constant dense<0.000000e+00> : vector<4x8x8xf32>
    %76 = tpu.matmul %73, %74, %cst_28 {dimension_numbers = #tpu.dot_dimension_numbers<[2], [2], [1], [1], [0, 0, 0, 1, 1, 1], [0], [0]>} : vector<4x8x8xf32>, vector<4x8x8xf32>, vector<4x8x8xf32> -> vector<4x8x8xf32>
    "tpu.trace_stop"() : () -> ()
    %cst_29 = arith.constant 0.353553385 : f32
    %77 = vector.broadcast %cst_29 : f32 to vector<4x8x8xf32>
    %78 = arith.mulf %76, %77 : vector<4x8x8xf32>
    %cst_30 = arith.constant dense<0xFF800000> : vector<4x8xf32>
    %79 = vector.multi_reduction <maximumf>, %78, %cst_30 [2] : vector<4x8x8xf32> to vector<4x8xf32>
    %80 = vector.shape_cast %79 : vector<4x8xf32> to vector<4x8x1xf32>
    %81 = vector.broadcast %80 : vector<4x8x1xf32> to vector<4x8x8xf32>
    %82 = arith.subf %78, %81 : vector<4x8x8xf32>
    %83 = math.exp %82 : vector<4x8x8xf32>
    %cst_31 = arith.constant dense<0.000000e+00> : vector<4x8xf32>
    %84 = vector.multi_reduction <add>, %83, %cst_31 [2] : vector<4x8x8xf32> to vector<4x8xf32>
    %85 = vector.shape_cast %84 : vector<4x8xf32> to vector<4x8x1xf32>
    %86 = vector.broadcast %85 : vector<4x8x1xf32> to vector<4x8x8xf32>
    %87 = arith.divf %83, %86 : vector<4x8x8xf32>
    "tpu.trace_start"() <{level = 10 : i32, message = "bqk,bkd->bqd"}> : () -> ()
    %cst_32 = arith.constant dense<0.000000e+00> : vector<4x8x8xf32>
    %88 = tpu.matmul %87, %75, %cst_32 {dimension_numbers = #tpu.dot_dimension_numbers<[2], [1], [1], [2], [0, 0, 0, 1, 1, 2], [0], [0]>} : vector<4x8x8xf32>, vector<4x8x8xf32>, vector<4x8x8xf32> -> vector<4x8x8xf32>
    "tpu.trace_stop"() : () -> ()
    %89 = tpu.concatenate %40, %56, %72, %88 in 2 : vector<4x8x8xf32>, vector<4x8x8xf32>, vector<4x8x8xf32>, vector<4x8x8xf32> -> vector<4x8x32xf32>
    %90 = vector.shape_cast %89 : vector<4x8x32xf32> to vector<32x32xf32>
    %c0_33 = arith.constant 0 : index
    %c0_34 = arith.constant 0 : index
    %c0_35 = arith.constant 0 : index
    %91 = vector.load %arg6[%c0_33, %c0_34, %c0_35] : memref<2x32x32xf32, #tpu.memory_space<vmem>>, vector<1x32x32xf32>
    %92 = vector.shape_cast %91 : vector<1x32x32xf32> to vector<32x32xf32>
    %cst_36 = arith.constant dense<0.000000e+00> : vector<32x32xf32>
    %93 = tpu.matmul %90, %92, %cst_36 {dimension_numbers = #tpu.dot_dimension_numbers<[1], [0], [0], [1], [0, 0, 1, 1], [], []>} : vector<32x32xf32>, vector<32x32xf32>, vector<32x32xf32> -> vector<32x32xf32>
    %c0_37 = arith.constant 0 : index
    %c0_38 = arith.constant 0 : index
    %c0_39 = arith.constant 0 : index
    %94 = vector.load %arg7[%c0_37, %c0_38, %c0_39] : memref<2x1x32xf32, #tpu.memory_space<vmem>>, vector<1x1x32xf32>
    %95 = vector.shape_cast %94 : vector<1x1x32xf32> to vector<1x32xf32>
    %96 = vector.broadcast %95 : vector<1x32xf32> to vector<32x32xf32>
    %97 = arith.addf %93, %96 : vector<32x32xf32>
    %98 = arith.addf %11, %97 : vector<32x32xf32>
    %c0_40 = arith.constant 0 : index
    %c0_41 = arith.constant 0 : index
    %c0_42 = arith.constant 0 : index
    %99 = vector.load %arg8[%c0_40, %c0_41, %c0_42] : memref<2x1x32xf32, #tpu.memory_space<vmem>>, vector<1x1x32xf32>
    %100 = vector.shape_cast %99 : vector<1x1x32xf32> to vector<1x32xf32>
    %c0_43 = arith.constant 0 : index
    %c0_44 = arith.constant 0 : index
    %c0_45 = arith.constant 0 : index
    %101 = vector.load %arg9[%c0_43, %c0_44, %c0_45] : memref<2x1x32xf32, #tpu.memory_space<vmem>>, vector<1x1x32xf32>
    %102 = vector.shape_cast %101 : vector<1x1x32xf32> to vector<1x32xf32>
    %cst_46 = arith.constant dense<0.000000e+00> : vector<32xf32>
    %103 = vector.multi_reduction <add>, %98, %cst_46 [1] : vector<32x32xf32> to vector<32xf32>
    %104 = vector.shape_cast %103 : vector<32xf32> to vector<32x1xf32>
    %cst_47 = arith.constant 3.200000e+01 : f32
    %105 = vector.broadcast %cst_47 : f32 to vector<32x1xf32>
    %106 = arith.divf %104, %105 : vector<32x1xf32>
    %107 = vector.broadcast %106 : vector<32x1xf32> to vector<32x32xf32>
    %108 = arith.subf %98, %107 : vector<32x32xf32>
    %109 = arith.mulf %108, %108 : vector<32x32xf32>
    %cst_48 = arith.constant dense<0.000000e+00> : vector<32xf32>
    %110 = vector.multi_reduction <add>, %109, %cst_48 [1] : vector<32x32xf32> to vector<32xf32>
    %111 = vector.shape_cast %110 : vector<32xf32> to vector<32x1xf32>
    %cst_49 = arith.constant 3.200000e+01 : f32
    %112 = vector.broadcast %cst_49 : f32 to vector<32x1xf32>
    %113 = arith.divf %111, %112 : vector<32x1xf32>
    %114 = vector.broadcast %106 : vector<32x1xf32> to vector<32x32xf32>
    %115 = arith.subf %98, %114 : vector<32x32xf32>
    %cst_50 = arith.constant 9.99999974E-6 : f32
    %116 = vector.broadcast %cst_50 : f32 to vector<32x1xf32>
    %117 = arith.addf %113, %116 : vector<32x1xf32>
    %118 = math.rsqrt %117 : vector<32x1xf32>
    %119 = vector.broadcast %118 : vector<32x1xf32> to vector<32x32xf32>
    %120 = arith.mulf %115, %119 : vector<32x32xf32>
    %121 = vector.broadcast %100 : vector<1x32xf32> to vector<32x32xf32>
    %122 = arith.mulf %120, %121 : vector<32x32xf32>
    %123 = vector.broadcast %102 : vector<1x32xf32> to vector<32x32xf32>
    %124 = arith.addf %122, %123 : vector<32x32xf32>
    %c0_51 = arith.constant 0 : index
    %c0_52 = arith.constant 0 : index
    %c0_53 = arith.constant 0 : index
    %125 = vector.load %arg10[%c0_51, %c0_52, %c0_53] : memref<2x32x64xf32, #tpu.memory_space<vmem>>, vector<1x32x64xf32>
    %126 = vector.shape_cast %125 : vector<1x32x64xf32> to vector<32x64xf32>
    %cst_54 = arith.constant dense<0.000000e+00> : vector<32x64xf32>
    %127 = tpu.matmul %124, %126, %cst_54 {dimension_numbers = #tpu.dot_dimension_numbers<[1], [0], [0], [1], [0, 0, 1, 1], [], []>} : vector<32x32xf32>, vector<32x64xf32>, vector<32x64xf32> -> vector<32x64xf32>
    %c0_55 = arith.constant 0 : index
    %c0_56 = arith.constant 0 : index
    %c0_57 = arith.constant 0 : index
    %128 = vector.load %arg11[%c0_55, %c0_56, %c0_57] : memref<2x1x64xf32, #tpu.memory_space<vmem>>, vector<1x1x64xf32>
    %129 = vector.shape_cast %128 : vector<1x1x64xf32> to vector<1x64xf32>
    %130 = vector.broadcast %129 : vector<1x64xf32> to vector<32x64xf32>
    %131 = arith.addf %127, %130 : vector<32x64xf32>
    %cst_58 = arith.constant 0.000000e+00 : f32
    %132 = vector.broadcast %cst_58 : f32 to vector<32x64xf32>
    %133 = arith.maximumf %131, %132 : vector<32x64xf32>
    %c0_59 = arith.constant 0 : index
    %c0_60 = arith.constant 0 : index
    %c0_61 = arith.constant 0 : index
    %134 = vector.load %arg12[%c0_59, %c0_60, %c0_61] : memref<2x64x32xf32, #tpu.memory_space<vmem>>, vector<1x64x32xf32>
    %135 = vector.shape_cast %134 : vector<1x64x32xf32> to vector<64x32xf32>
    %cst_62 = arith.constant dense<0.000000e+00> : vector<32x32xf32>
    %136 = tpu.matmul %133, %135, %cst_62 {dimension_numbers = #tpu.dot_dimension_numbers<[1], [0], [0], [1], [0, 0, 1, 1], [], []>} : vector<32x64xf32>, vector<64x32xf32>, vector<32x32xf32> -> vector<32x32xf32>
    %c0_63 = arith.constant 0 : index
    %c0_64 = arith.constant 0 : index
    %c0_65 = arith.constant 0 : index
    %137 = vector.load %arg13[%c0_63, %c0_64, %c0_65] : memref<2x1x32xf32, #tpu.memory_space<vmem>>, vector<1x1x32xf32>
    %138 = vector.shape_cast %137 : vector<1x1x32xf32> to vector<1x32xf32>
    %139 = vector.broadcast %138 : vector<1x32xf32> to vector<32x32xf32>
    %140 = arith.addf %136, %139 : vector<32x32xf32>
    %141 = arith.addf %124, %140 : vector<32x32xf32>
    %c0_66 = arith.constant 0 : index
    %c0_67 = arith.constant 0 : index
    %c0_68 = arith.constant 0 : index
    %142 = vector.load %arg14[%c0_66, %c0_67, %c0_68] : memref<2x1x32xf32, #tpu.memory_space<vmem>>, vector<1x1x32xf32>
    %143 = vector.shape_cast %142 : vector<1x1x32xf32> to vector<1x32xf32>
    %c0_69 = arith.constant 0 : index
    %c0_70 = arith.constant 0 : index
    %c0_71 = arith.constant 0 : index
    %144 = vector.load %arg15[%c0_69, %c0_70, %c0_71] : memref<2x1x32xf32, #tpu.memory_space<vmem>>, vector<1x1x32xf32>
    %145 = vector.shape_cast %144 : vector<1x1x32xf32> to vector<1x32xf32>
    %cst_72 = arith.constant dense<0.000000e+00> : vector<32xf32>
    %146 = vector.multi_reduction <add>, %141, %cst_72 [1] : vector<32x32xf32> to vector<32xf32>
    %147 = vector.shape_cast %146 : vector<32xf32> to vector<32x1xf32>
    %cst_73 = arith.constant 3.200000e+01 : f32
    %148 = vector.broadcast %cst_73 : f32 to vector<32x1xf32>
    %149 = arith.divf %147, %148 : vector<32x1xf32>
    %150 = vector.broadcast %149 : vector<32x1xf32> to vector<32x32xf32>
    %151 = arith.subf %141, %150 : vector<32x32xf32>
    %152 = arith.mulf %151, %151 : vector<32x32xf32>
    %cst_74 = arith.constant dense<0.000000e+00> : vector<32xf32>
    %153 = vector.multi_reduction <add>, %152, %cst_74 [1] : vector<32x32xf32> to vector<32xf32>
    %154 = vector.shape_cast %153 : vector<32xf32> to vector<32x1xf32>
    %cst_75 = arith.constant 3.200000e+01 : f32
    %155 = vector.broadcast %cst_75 : f32 to vector<32x1xf32>
    %156 = arith.divf %154, %155 : vector<32x1xf32>
    %157 = vector.broadcast %149 : vector<32x1xf32> to vector<32x32xf32>
    %158 = arith.subf %141, %157 : vector<32x32xf32>
    %cst_76 = arith.constant 9.99999974E-6 : f32
    %159 = vector.broadcast %cst_76 : f32 to vector<32x1xf32>
    %160 = arith.addf %156, %159 : vector<32x1xf32>
    %161 = math.rsqrt %160 : vector<32x1xf32>
    %162 = vector.broadcast %161 : vector<32x1xf32> to vector<32x32xf32>
    %163 = arith.mulf %158, %162 : vector<32x32xf32>
    %164 = vector.broadcast %143 : vector<1x32xf32> to vector<32x32xf32>
    %165 = arith.mulf %163, %164 : vector<32x32xf32>
    %166 = vector.broadcast %145 : vector<1x32xf32> to vector<32x32xf32>
    %167 = arith.addf %165, %166 : vector<32x32xf32>
    %c1 = arith.constant 1 : index
    %c0_77 = arith.constant 0 : index
    %c0_78 = arith.constant 0 : index
    %168 = vector.load %arg4[%c1, %c0_77, %c0_78] : memref<2x32x96xf32, #tpu.memory_space<vmem>>, vector<1x32x96xf32>
    %169 = vector.shape_cast %168 : vector<1x32x96xf32> to vector<32x96xf32>
    %cst_79 = arith.constant dense<0.000000e+00> : vector<32x96xf32>
    %170 = tpu.matmul %167, %169, %cst_79 {dimension_numbers = #tpu.dot_dimension_numbers<[1], [0], [0], [1], [0, 0, 1, 1], [], []>} : vector<32x32xf32>, vector<32x96xf32>, vector<32x96xf32> -> vector<32x96xf32>
    %c1_80 = arith.constant 1 : index
    %c0_81 = arith.constant 0 : index
    %c0_82 = arith.constant 0 : index
    %171 = vector.load %arg5[%c1_80, %c0_81, %c0_82] : memref<2x1x96xf32, #tpu.memory_space<vmem>>, vector<1x1x96xf32>
    %172 = vector.shape_cast %171 : vector<1x1x96xf32> to vector<1x96xf32>
    %173 = vector.broadcast %172 : vector<1x96xf32> to vector<32x96xf32>
    %174 = arith.addf %170, %173 : vector<32x96xf32>
    %175 = vector.extract_strided_slice %174 {offsets = [0, 0], sizes = [32, 32], strides = [1, 1]} : vector<32x96xf32> to vector<32x32xf32>
    %176 = vector.shape_cast %175 : vector<32x32xf32> to vector<4x8x32xf32>
    %177 = vector.extract_strided_slice %174 {offsets = [0, 32], sizes = [32, 32], strides = [1, 1]} : vector<32x96xf32> to vector<32x32xf32>
    %178 = vector.shape_cast %177 : vector<32x32xf32> to vector<4x8x32xf32>
    %179 = vector.extract_strided_slice %174 {offsets = [0, 64], sizes = [32, 32], strides = [1, 1]} : vector<32x96xf32> to vector<32x32xf32>
    %180 = vector.shape_cast %179 : vector<32x32xf32> to vector<4x8x32xf32>
    %181 = vector.extract_strided_slice %176 {offsets = [0, 0, 0], sizes = [4, 8, 8], strides = [1, 1, 1]} : vector<4x8x32xf32> to vector<4x8x8xf32>
    %182 = vector.extract_strided_slice %178 {offsets = [0, 0, 0], sizes = [4, 8, 8], strides = [1, 1, 1]} : vector<4x8x32xf32> to vector<4x8x8xf32>
    %183 = vector.extract_strided_slice %180 {offsets = [0, 0, 0], sizes = [4, 8, 8], strides = [1, 1, 1]} : vector<4x8x32xf32> to vector<4x8x8xf32>
    "tpu.trace_start"() <{level = 10 : i32, message = "bqd,bkd->bqk"}> : () -> ()
    %cst_83 = arith.constant dense<0.000000e+00> : vector<4x8x8xf32>
    %184 = tpu.matmul %181, %182, %cst_83 {dimension_numbers = #tpu.dot_dimension_numbers<[2], [2], [1], [1], [0, 0, 0, 1, 1, 1], [0], [0]>} : vector<4x8x8xf32>, vector<4x8x8xf32>, vector<4x8x8xf32> -> vector<4x8x8xf32>
    "tpu.trace_stop"() : () -> ()
    %cst_84 = arith.constant 0.353553385 : f32
    %185 = vector.broadcast %cst_84 : f32 to vector<4x8x8xf32>
    %186 = arith.mulf %184, %185 : vector<4x8x8xf32>
    %cst_85 = arith.constant dense<0xFF800000> : vector<4x8xf32>
    %187 = vector.multi_reduction <maximumf>, %186, %cst_85 [2] : vector<4x8x8xf32> to vector<4x8xf32>
    %188 = vector.shape_cast %187 : vector<4x8xf32> to vector<4x8x1xf32>
    %189 = vector.broadcast %188 : vector<4x8x1xf32> to vector<4x8x8xf32>
    %190 = arith.subf %186, %189 : vector<4x8x8xf32>
    %191 = math.exp %190 : vector<4x8x8xf32>
    %cst_86 = arith.constant dense<0.000000e+00> : vector<4x8xf32>
    %192 = vector.multi_reduction <add>, %191, %cst_86 [2] : vector<4x8x8xf32> to vector<4x8xf32>
    %193 = vector.shape_cast %192 : vector<4x8xf32> to vector<4x8x1xf32>
    %194 = vector.broadcast %193 : vector<4x8x1xf32> to vector<4x8x8xf32>
    %195 = arith.divf %191, %194 : vector<4x8x8xf32>
    "tpu.trace_start"() <{level = 10 : i32, message = "bqk,bkd->bqd"}> : () -> ()
    %cst_87 = arith.constant dense<0.000000e+00> : vector<4x8x8xf32>
    %196 = tpu.matmul %195, %183, %cst_87 {dimension_numbers = #tpu.dot_dimension_numbers<[2], [1], [1], [2], [0, 0, 0, 1, 1, 2], [0], [0]>} : vector<4x8x8xf32>, vector<4x8x8xf32>, vector<4x8x8xf32> -> vector<4x8x8xf32>
    "tpu.trace_stop"() : () -> ()
    %197 = vector.extract_strided_slice %176 {offsets = [0, 0, 8], sizes = [4, 8, 8], strides = [1, 1, 1]} : vector<4x8x32xf32> to vector<4x8x8xf32>
    %198 = vector.extract_strided_slice %178 {offsets = [0, 0, 8], sizes = [4, 8, 8], strides = [1, 1, 1]} : vector<4x8x32xf32> to vector<4x8x8xf32>
    %199 = vector.extract_strided_slice %180 {offsets = [0, 0, 8], sizes = [4, 8, 8], strides = [1, 1, 1]} : vector<4x8x32xf32> to vector<4x8x8xf32>
    "tpu.trace_start"() <{level = 10 : i32, message = "bqd,bkd->bqk"}> : () -> ()
    %cst_88 = arith.constant dense<0.000000e+00> : vector<4x8x8xf32>
    %200 = tpu.matmul %197, %198, %cst_88 {dimension_numbers = #tpu.dot_dimension_numbers<[2], [2], [1], [1], [0, 0, 0, 1, 1, 1], [0], [0]>} : vector<4x8x8xf32>, vector<4x8x8xf32>, vector<4x8x8xf32> -> vector<4x8x8xf32>
    "tpu.trace_stop"() : () -> ()
    %cst_89 = arith.constant 0.353553385 : f32
    %201 = vector.broadcast %cst_89 : f32 to vector<4x8x8xf32>
    %202 = arith.mulf %200, %201 : vector<4x8x8xf32>
    %cst_90 = arith.constant dense<0xFF800000> : vector<4x8xf32>
    %203 = vector.multi_reduction <maximumf>, %202, %cst_90 [2] : vector<4x8x8xf32> to vector<4x8xf32>
    %204 = vector.shape_cast %203 : vector<4x8xf32> to vector<4x8x1xf32>
    %205 = vector.broadcast %204 : vector<4x8x1xf32> to vector<4x8x8xf32>
    %206 = arith.subf %202, %205 : vector<4x8x8xf32>
    %207 = math.exp %206 : vector<4x8x8xf32>
    %cst_91 = arith.constant dense<0.000000e+00> : vector<4x8xf32>
    %208 = vector.multi_reduction <add>, %207, %cst_91 [2] : vector<4x8x8xf32> to vector<4x8xf32>
    %209 = vector.shape_cast %208 : vector<4x8xf32> to vector<4x8x1xf32>
    %210 = vector.broadcast %209 : vector<4x8x1xf32> to vector<4x8x8xf32>
    %211 = arith.divf %207, %210 : vector<4x8x8xf32>
    "tpu.trace_start"() <{level = 10 : i32, message = "bqk,bkd->bqd"}> : () -> ()
    %cst_92 = arith.constant dense<0.000000e+00> : vector<4x8x8xf32>
    %212 = tpu.matmul %211, %199, %cst_92 {dimension_numbers = #tpu.dot_dimension_numbers<[2], [1], [1], [2], [0, 0, 0, 1, 1, 2], [0], [0]>} : vector<4x8x8xf32>, vector<4x8x8xf32>, vector<4x8x8xf32> -> vector<4x8x8xf32>
    "tpu.trace_stop"() : () -> ()
    %213 = vector.extract_strided_slice %176 {offsets = [0, 0, 16], sizes = [4, 8, 8], strides = [1, 1, 1]} : vector<4x8x32xf32> to vector<4x8x8xf32>
    %214 = vector.extract_strided_slice %178 {offsets = [0, 0, 16], sizes = [4, 8, 8], strides = [1, 1, 1]} : vector<4x8x32xf32> to vector<4x8x8xf32>
    %215 = vector.extract_strided_slice %180 {offsets = [0, 0, 16], sizes = [4, 8, 8], strides = [1, 1, 1]} : vector<4x8x32xf32> to vector<4x8x8xf32>
    "tpu.trace_start"() <{level = 10 : i32, message = "bqd,bkd->bqk"}> : () -> ()
    %cst_93 = arith.constant dense<0.000000e+00> : vector<4x8x8xf32>
    %216 = tpu.matmul %213, %214, %cst_93 {dimension_numbers = #tpu.dot_dimension_numbers<[2], [2], [1], [1], [0, 0, 0, 1, 1, 1], [0], [0]>} : vector<4x8x8xf32>, vector<4x8x8xf32>, vector<4x8x8xf32> -> vector<4x8x8xf32>
    "tpu.trace_stop"() : () -> ()
    %cst_94 = arith.constant 0.353553385 : f32
    %217 = vector.broadcast %cst_94 : f32 to vector<4x8x8xf32>
    %218 = arith.mulf %216, %217 : vector<4x8x8xf32>
    %cst_95 = arith.constant dense<0xFF800000> : vector<4x8xf32>
    %219 = vector.multi_reduction <maximumf>, %218, %cst_95 [2] : vector<4x8x8xf32> to vector<4x8xf32>
    %220 = vector.shape_cast %219 : vector<4x8xf32> to vector<4x8x1xf32>
    %221 = vector.broadcast %220 : vector<4x8x1xf32> to vector<4x8x8xf32>
    %222 = arith.subf %218, %221 : vector<4x8x8xf32>
    %223 = math.exp %222 : vector<4x8x8xf32>
    %cst_96 = arith.constant dense<0.000000e+00> : vector<4x8xf32>
    %224 = vector.multi_reduction <add>, %223, %cst_96 [2] : vector<4x8x8xf32> to vector<4x8xf32>
    %225 = vector.shape_cast %224 : vector<4x8xf32> to vector<4x8x1xf32>
    %226 = vector.broadcast %225 : vector<4x8x1xf32> to vector<4x8x8xf32>
    %227 = arith.divf %223, %226 : vector<4x8x8xf32>
    "tpu.trace_start"() <{level = 10 : i32, message = "bqk,bkd->bqd"}> : () -> ()
    %cst_97 = arith.constant dense<0.000000e+00> : vector<4x8x8xf32>
    %228 = tpu.matmul %227, %215, %cst_97 {dimension_numbers = #tpu.dot_dimension_numbers<[2], [1], [1], [2], [0, 0, 0, 1, 1, 2], [0], [0]>} : vector<4x8x8xf32>, vector<4x8x8xf32>, vector<4x8x8xf32> -> vector<4x8x8xf32>
    "tpu.trace_stop"() : () -> ()
    %229 = vector.extract_strided_slice %176 {offsets = [0, 0, 24], sizes = [4, 8, 8], strides = [1, 1, 1]} : vector<4x8x32xf32> to vector<4x8x8xf32>
    %230 = vector.extract_strided_slice %178 {offsets = [0, 0, 24], sizes = [4, 8, 8], strides = [1, 1, 1]} : vector<4x8x32xf32> to vector<4x8x8xf32>
    %231 = vector.extract_strided_slice %180 {offsets = [0, 0, 24], sizes = [4, 8, 8], strides = [1, 1, 1]} : vector<4x8x32xf32> to vector<4x8x8xf32>
    "tpu.trace_start"() <{level = 10 : i32, message = "bqd,bkd->bqk"}> : () -> ()
    %cst_98 = arith.constant dense<0.000000e+00> : vector<4x8x8xf32>
    %232 = tpu.matmul %229, %230, %cst_98 {dimension_numbers = #tpu.dot_dimension_numbers<[2], [2], [1], [1], [0, 0, 0, 1, 1, 1], [0], [0]>} : vector<4x8x8xf32>, vector<4x8x8xf32>, vector<4x8x8xf32> -> vector<4x8x8xf32>
    "tpu.trace_stop"() : () -> ()
    %cst_99 = arith.constant 0.353553385 : f32
    %233 = vector.broadcast %cst_99 : f32 to vector<4x8x8xf32>
    %234 = arith.mulf %232, %233 : vector<4x8x8xf32>
    %cst_100 = arith.constant dense<0xFF800000> : vector<4x8xf32>
    %235 = vector.multi_reduction <maximumf>, %234, %cst_100 [2] : vector<4x8x8xf32> to vector<4x8xf32>
    %236 = vector.shape_cast %235 : vector<4x8xf32> to vector<4x8x1xf32>
    %237 = vector.broadcast %236 : vector<4x8x1xf32> to vector<4x8x8xf32>
    %238 = arith.subf %234, %237 : vector<4x8x8xf32>
    %239 = math.exp %238 : vector<4x8x8xf32>
    %cst_101 = arith.constant dense<0.000000e+00> : vector<4x8xf32>
    %240 = vector.multi_reduction <add>, %239, %cst_101 [2] : vector<4x8x8xf32> to vector<4x8xf32>
    %241 = vector.shape_cast %240 : vector<4x8xf32> to vector<4x8x1xf32>
    %242 = vector.broadcast %241 : vector<4x8x1xf32> to vector<4x8x8xf32>
    %243 = arith.divf %239, %242 : vector<4x8x8xf32>
    "tpu.trace_start"() <{level = 10 : i32, message = "bqk,bkd->bqd"}> : () -> ()
    %cst_102 = arith.constant dense<0.000000e+00> : vector<4x8x8xf32>
    %244 = tpu.matmul %243, %231, %cst_102 {dimension_numbers = #tpu.dot_dimension_numbers<[2], [1], [1], [2], [0, 0, 0, 1, 1, 2], [0], [0]>} : vector<4x8x8xf32>, vector<4x8x8xf32>, vector<4x8x8xf32> -> vector<4x8x8xf32>
    "tpu.trace_stop"() : () -> ()
    %245 = tpu.concatenate %196, %212, %228, %244 in 2 : vector<4x8x8xf32>, vector<4x8x8xf32>, vector<4x8x8xf32>, vector<4x8x8xf32> -> vector<4x8x32xf32>
    %246 = vector.shape_cast %245 : vector<4x8x32xf32> to vector<32x32xf32>
    %c1_103 = arith.constant 1 : index
    %c0_104 = arith.constant 0 : index
    %c0_105 = arith.constant 0 : index
    %247 = vector.load %arg6[%c1_103, %c0_104, %c0_105] : memref<2x32x32xf32, #tpu.memory_space<vmem>>, vector<1x32x32xf32>
    %248 = vector.shape_cast %247 : vector<1x32x32xf32> to vector<32x32xf32>
    %cst_106 = arith.constant dense<0.000000e+00> : vector<32x32xf32>
    %249 = tpu.matmul %246, %248, %cst_106 {dimension_numbers = #tpu.dot_dimension_numbers<[1], [0], [0], [1], [0, 0, 1, 1], [], []>} : vector<32x32xf32>, vector<32x32xf32>, vector<32x32xf32> -> vector<32x32xf32>
    %c1_107 = arith.constant 1 : index
    %c0_108 = arith.constant 0 : index
    %c0_109 = arith.constant 0 : index
    %250 = vector.load %arg7[%c1_107, %c0_108, %c0_109] : memref<2x1x32xf32, #tpu.memory_space<vmem>>, vector<1x1x32xf32>
    %251 = vector.shape_cast %250 : vector<1x1x32xf32> to vector<1x32xf32>
    %252 = vector.broadcast %251 : vector<1x32xf32> to vector<32x32xf32>
    %253 = arith.addf %249, %252 : vector<32x32xf32>
    %254 = arith.addf %167, %253 : vector<32x32xf32>
    %c1_110 = arith.constant 1 : index
    %c0_111 = arith.constant 0 : index
    %c0_112 = arith.constant 0 : index
    %255 = vector.load %arg8[%c1_110, %c0_111, %c0_112] : memref<2x1x32xf32, #tpu.memory_space<vmem>>, vector<1x1x32xf32>
    %256 = vector.shape_cast %255 : vector<1x1x32xf32> to vector<1x32xf32>
    %c1_113 = arith.constant 1 : index
    %c0_114 = arith.constant 0 : index
    %c0_115 = arith.constant 0 : index
    %257 = vector.load %arg9[%c1_113, %c0_114, %c0_115] : memref<2x1x32xf32, #tpu.memory_space<vmem>>, vector<1x1x32xf32>
    %258 = vector.shape_cast %257 : vector<1x1x32xf32> to vector<1x32xf32>
    %cst_116 = arith.constant dense<0.000000e+00> : vector<32xf32>
    %259 = vector.multi_reduction <add>, %254, %cst_116 [1] : vector<32x32xf32> to vector<32xf32>
    %260 = vector.shape_cast %259 : vector<32xf32> to vector<32x1xf32>
    %cst_117 = arith.constant 3.200000e+01 : f32
    %261 = vector.broadcast %cst_117 : f32 to vector<32x1xf32>
    %262 = arith.divf %260, %261 : vector<32x1xf32>
    %263 = vector.broadcast %262 : vector<32x1xf32> to vector<32x32xf32>
    %264 = arith.subf %254, %263 : vector<32x32xf32>
    %265 = arith.mulf %264, %264 : vector<32x32xf32>
    %cst_118 = arith.constant dense<0.000000e+00> : vector<32xf32>
    %266 = vector.multi_reduction <add>, %265, %cst_118 [1] : vector<32x32xf32> to vector<32xf32>
    %267 = vector.shape_cast %266 : vector<32xf32> to vector<32x1xf32>
    %cst_119 = arith.constant 3.200000e+01 : f32
    %268 = vector.broadcast %cst_119 : f32 to vector<32x1xf32>
    %269 = arith.divf %267, %268 : vector<32x1xf32>
    %270 = vector.broadcast %262 : vector<32x1xf32> to vector<32x32xf32>
    %271 = arith.subf %254, %270 : vector<32x32xf32>
    %cst_120 = arith.constant 9.99999974E-6 : f32
    %272 = vector.broadcast %cst_120 : f32 to vector<32x1xf32>
    %273 = arith.addf %269, %272 : vector<32x1xf32>
    %274 = math.rsqrt %273 : vector<32x1xf32>
    %275 = vector.broadcast %274 : vector<32x1xf32> to vector<32x32xf32>
    %276 = arith.mulf %271, %275 : vector<32x32xf32>
    %277 = vector.broadcast %256 : vector<1x32xf32> to vector<32x32xf32>
    %278 = arith.mulf %276, %277 : vector<32x32xf32>
    %279 = vector.broadcast %258 : vector<1x32xf32> to vector<32x32xf32>
    %280 = arith.addf %278, %279 : vector<32x32xf32>
    %c1_121 = arith.constant 1 : index
    %c0_122 = arith.constant 0 : index
    %c0_123 = arith.constant 0 : index
    %281 = vector.load %arg10[%c1_121, %c0_122, %c0_123] : memref<2x32x64xf32, #tpu.memory_space<vmem>>, vector<1x32x64xf32>
    %282 = vector.shape_cast %281 : vector<1x32x64xf32> to vector<32x64xf32>
    %cst_124 = arith.constant dense<0.000000e+00> : vector<32x64xf32>
    %283 = tpu.matmul %280, %282, %cst_124 {dimension_numbers = #tpu.dot_dimension_numbers<[1], [0], [0], [1], [0, 0, 1, 1], [], []>} : vector<32x32xf32>, vector<32x64xf32>, vector<32x64xf32> -> vector<32x64xf32>
    %c1_125 = arith.constant 1 : index
    %c0_126 = arith.constant 0 : index
    %c0_127 = arith.constant 0 : index
    %284 = vector.load %arg11[%c1_125, %c0_126, %c0_127] : memref<2x1x64xf32, #tpu.memory_space<vmem>>, vector<1x1x64xf32>
    %285 = vector.shape_cast %284 : vector<1x1x64xf32> to vector<1x64xf32>
    %286 = vector.broadcast %285 : vector<1x64xf32> to vector<32x64xf32>
    %287 = arith.addf %283, %286 : vector<32x64xf32>
    %cst_128 = arith.constant 0.000000e+00 : f32
    %288 = vector.broadcast %cst_128 : f32 to vector<32x64xf32>
    %289 = arith.maximumf %287, %288 : vector<32x64xf32>
    %c1_129 = arith.constant 1 : index
    %c0_130 = arith.constant 0 : index
    %c0_131 = arith.constant 0 : index
    %290 = vector.load %arg12[%c1_129, %c0_130, %c0_131] : memref<2x64x32xf32, #tpu.memory_space<vmem>>, vector<1x64x32xf32>
    %291 = vector.shape_cast %290 : vector<1x64x32xf32> to vector<64x32xf32>
    %cst_132 = arith.constant dense<0.000000e+00> : vector<32x32xf32>
    %292 = tpu.matmul %289, %291, %cst_132 {dimension_numbers = #tpu.dot_dimension_numbers<[1], [0], [0], [1], [0, 0, 1, 1], [], []>} : vector<32x64xf32>, vector<64x32xf32>, vector<32x32xf32> -> vector<32x32xf32>
    %c1_133 = arith.constant 1 : index
    %c0_134 = arith.constant 0 : index
    %c0_135 = arith.constant 0 : index
    %293 = vector.load %arg13[%c1_133, %c0_134, %c0_135] : memref<2x1x32xf32, #tpu.memory_space<vmem>>, vector<1x1x32xf32>
    %294 = vector.shape_cast %293 : vector<1x1x32xf32> to vector<1x32xf32>
    %295 = vector.broadcast %294 : vector<1x32xf32> to vector<32x32xf32>
    %296 = arith.addf %292, %295 : vector<32x32xf32>
    %297 = arith.addf %280, %296 : vector<32x32xf32>
    %c1_136 = arith.constant 1 : index
    %c0_137 = arith.constant 0 : index
    %c0_138 = arith.constant 0 : index
    %298 = vector.load %arg14[%c1_136, %c0_137, %c0_138] : memref<2x1x32xf32, #tpu.memory_space<vmem>>, vector<1x1x32xf32>
    %299 = vector.shape_cast %298 : vector<1x1x32xf32> to vector<1x32xf32>
    %c1_139 = arith.constant 1 : index
    %c0_140 = arith.constant 0 : index
    %c0_141 = arith.constant 0 : index
    %300 = vector.load %arg15[%c1_139, %c0_140, %c0_141] : memref<2x1x32xf32, #tpu.memory_space<vmem>>, vector<1x1x32xf32>
    %301 = vector.shape_cast %300 : vector<1x1x32xf32> to vector<1x32xf32>
    %cst_142 = arith.constant dense<0.000000e+00> : vector<32xf32>
    %302 = vector.multi_reduction <add>, %297, %cst_142 [1] : vector<32x32xf32> to vector<32xf32>
    %303 = vector.shape_cast %302 : vector<32xf32> to vector<32x1xf32>
    %cst_143 = arith.constant 3.200000e+01 : f32
    %304 = vector.broadcast %cst_143 : f32 to vector<32x1xf32>
    %305 = arith.divf %303, %304 : vector<32x1xf32>
    %306 = vector.broadcast %305 : vector<32x1xf32> to vector<32x32xf32>
    %307 = arith.subf %297, %306 : vector<32x32xf32>
    %308 = arith.mulf %307, %307 : vector<32x32xf32>
    %cst_144 = arith.constant dense<0.000000e+00> : vector<32xf32>
    %309 = vector.multi_reduction <add>, %308, %cst_144 [1] : vector<32x32xf32> to vector<32xf32>
    %310 = vector.shape_cast %309 : vector<32xf32> to vector<32x1xf32>
    %cst_145 = arith.constant 3.200000e+01 : f32
    %311 = vector.broadcast %cst_145 : f32 to vector<32x1xf32>
    %312 = arith.divf %310, %311 : vector<32x1xf32>
    %313 = vector.broadcast %305 : vector<32x1xf32> to vector<32x32xf32>
    %314 = arith.subf %297, %313 : vector<32x32xf32>
    %cst_146 = arith.constant 9.99999974E-6 : f32
    %315 = vector.broadcast %cst_146 : f32 to vector<32x1xf32>
    %316 = arith.addf %312, %315 : vector<32x1xf32>
    %317 = math.rsqrt %316 : vector<32x1xf32>
    %318 = vector.broadcast %317 : vector<32x1xf32> to vector<32x32xf32>
    %319 = arith.mulf %314, %318 : vector<32x32xf32>
    %320 = vector.broadcast %299 : vector<1x32xf32> to vector<32x32xf32>
    %321 = arith.mulf %319, %320 : vector<32x32xf32>
    %322 = vector.broadcast %301 : vector<1x32xf32> to vector<32x32xf32>
    %323 = arith.addf %321, %322 : vector<32x32xf32>
    %c0_147 = arith.constant 0 : index
    %c0_148 = arith.constant 0 : index
    %324 = vector.load %arg16[%c0_147, %c0_148] : memref<32x32xf32, #tpu.memory_space<vmem>>, vector<32x32xf32>
    tpu.vector_store %arg16[%c0_147, %c0_148], %323 {strides = array<i32>} : memref<32x32xf32, #tpu.memory_space<vmem>>, vector<32x32xf32>,
    return
  }
  func.func @transform_0(%arg0: i32) -> (i32, i32) {
    %c0_i32 = arith.constant 0 : i32
    %c0_i32_0 = arith.constant 0 : i32
    return %arg0, %c0_i32 : i32, i32
  }
  func.func @transform_1(%arg0: i32) -> (i32, i32) {
    %c0_i32 = arith.constant 0 : i32
    %c0_i32_0 = arith.constant 0 : i32
    %c0_i32_1 = arith.constant 0 : i32
    return %c0_i32, %c0_i32_0 : i32, i32
  }
  func.func @transform_2(%arg0: i32) -> (i32, i32) {
    %c0_i32 = arith.constant 0 : i32
    %c0_i32_0 = arith.constant 0 : i32
    %c0_i32_1 = arith.constant 0 : i32
    return %c0_i32, %c0_i32_0 : i32, i32
  }
  func.func @transform_3(%arg0: i32) -> (i32, i32, i32) {
    %c0_i32 = arith.constant 0 : i32
    %c0_i32_0 = arith.constant 0 : i32
    %c0_i32_1 = arith.constant 0 : i32
    %c0_i32_2 = arith.constant 0 : i32
    return %c0_i32, %c0_i32_0, %c0_i32_1 : i32, i32, i32
  }
  func.func @transform_4(%arg0: i32) -> (i32, i32, i32) {
    %c0_i32 = arith.constant 0 : i32
    %c0_i32_0 = arith.constant 0 : i32
    %c0_i32_1 = arith.constant 0 : i32
    %c0_i32_2 = arith.constant 0 : i32
    return %c0_i32, %c0_i32_0, %c0_i32_1 : i32, i32, i32
  }
  func.func @transform_5(%arg0: i32) -> (i32, i32, i32) {
    %c0_i32 = arith.constant 0 : i32
    %c0_i32_0 = arith.constant 0 : i32
    %c0_i32_1 = arith.constant 0 : i32
    %c0_i32_2 = arith.constant 0 : i32
    return %c0_i32, %c0_i32_0, %c0_i32_1 : i32, i32, i32
  }
  func.func @transform_6(%arg0: i32) -> (i32, i32, i32) {
    %c0_i32 = arith.constant 0 : i32
    %c0_i32_0 = arith.constant 0 : i32
    %c0_i32_1 = arith.constant 0 : i32
    %c0_i32_2 = arith.constant 0 : i32
    return %c0_i32, %c0_i32_0, %c0_i32_1 : i32, i32, i32
  }
  func.func @transform_7(%arg0: i32) -> (i32, i32, i32) {
    %c0_i32 = arith.constant 0 : i32
    %c0_i32_0 = arith.constant 0 : i32
    %c0_i32_1 = arith.constant 0 : i32
    %c0_i32_2 = arith.constant 0 : i32
    return %c0_i32, %c0_i32_0, %c0_i32_1 : i32, i32, i32
  }
  func.func @transform_8(%arg0: i32) -> (i32, i32, i32) {
    %c0_i32 = arith.constant 0 : i32
    %c0_i32_0 = arith.constant 0 : i32
    %c0_i32_1 = arith.constant 0 : i32
    %c0_i32_2 = arith.constant 0 : i32
    return %c0_i32, %c0_i32_0, %c0_i32_1 : i32, i32, i32
  }
  func.func @transform_9(%arg0: i32) -> (i32, i32, i32) {
    %c0_i32 = arith.constant 0 : i32
    %c0_i32_0 = arith.constant 0 : i32
    %c0_i32_1 = arith.constant 0 : i32
    %c0_i32_2 = arith.constant 0 : i32
    return %c0_i32, %c0_i32_0, %c0_i32_1 : i32, i32, i32
  }
  func.func @transform_10(%arg0: i32) -> (i32, i32, i32) {
    %c0_i32 = arith.constant 0 : i32
    %c0_i32_0 = arith.constant 0 : i32
    %c0_i32_1 = arith.constant 0 : i32
    %c0_i32_2 = arith.constant 0 : i32
    return %c0_i32, %c0_i32_0, %c0_i32_1 : i32, i32, i32
  }
  func.func @transform_11(%arg0: i32) -> (i32, i32, i32) {
    %c0_i32 = arith.constant 0 : i32
    %c0_i32_0 = arith.constant 0 : i32
    %c0_i32_1 = arith.constant 0 : i32
    %c0_i32_2 = arith.constant 0 : i32
    return %c0_i32, %c0_i32_0, %c0_i32_1 : i32, i32, i32
  }
  func.func @transform_12(%arg0: i32) -> (i32, i32, i32) {
    %c0_i32 = arith.constant 0 : i32
    %c0_i32_0 = arith.constant 0 : i32
    %c0_i32_1 = arith.constant 0 : i32
    %c0_i32_2 = arith.constant 0 : i32
    return %c0_i32, %c0_i32_0, %c0_i32_1 : i32, i32, i32
  }
  func.func @transform_13(%arg0: i32) -> (i32, i32, i32) {
    %c0_i32 = arith.constant 0 : i32
    %c0_i32_0 = arith.constant 0 : i32
    %c0_i32_1 = arith.constant 0 : i32
    %c0_i32_2 = arith.constant 0 : i32
    return %c0_i32, %c0_i32_0, %c0_i32_1 : i32, i32, i32
  }
  func.func @transform_14(%arg0: i32) -> (i32, i32, i32) {
    %c0_i32 = arith.constant 0 : i32
    %c0_i32_0 = arith.constant 0 : i32
    %c0_i32_1 = arith.constant 0 : i32
    %c0_i32_2 = arith.constant 0 : i32
    return %c0_i32, %c0_i32_0, %c0_i32_1 : i32, i32, i32
  }
  func.func @transform_15(%arg0: i32) -> (i32, i32) {
    %c0_i32 = arith.constant 0 : i32
    %c0_i32_0 = arith.constant 0 : i32
    return %arg0, %c0_i32 : i32, i32
  }
}

</mosaic_0001>

<bundles_post_ra>
// kernel: tpu_custom_call.1
= control target key start
LH: loop header
LB: loop body
LE: loop exit
PB: predicated region body
PF: predicated region fallthrough
CT: control target
= control target key end

     0   :  { %s4697_s18 = smov 0   ;;  %s5726_s0 = inlined_call_operand.vmem [shape: s32[64,1], index: 0, kind: input, shape index: {}]   ;;  %s5727_s1 = inlined_call_operand.vmem [shape: f32[50,32], index: 1, kind: input, shape index: {}]   ;;  %s5728_s2 = inlined_call_operand.vmem [shape: f32[32,32], index: 2, kind: input, shape index: {}]   ;;  %s5729_s3 = inlined_call_operand.vmem [shape: f32[2,32,96], index: 3, kind: input, shape index: {}]   ;;  %s5730_s4 = inlined_call_operand.vmem [shape: f32[2,1,96], index: 4, kind: input, shape index: {}]   ;;  %s5731_s5 = inlined_call_operand.vmem [shape: f32[2,32,32], index: 5, kind: input, shape index: {}]   ;;  %s5732_s6 = inlined_call_operand.vmem [shape: f32[2,1,32], index: 6, kind: input, shape index: {}]   ;;  %s5733_s7 = inlined_call_operand.vmem [shape: f32[2,1,32], index: 7, kind: input, shape index: {}]   ;;  %s5734_s8 = inlined_call_operand.vmem [shape: f32[2,1,32], index: 8, kind: input, shape index: {}]   ;;  %s5735_s9 = inlined_call_operand.vmem [shape: f32[2,32,64], index: 9, kind: input, shape index: {}]   ;;  %s5736_s10 = inlined_call_operand.vmem [shape: f32[2,1,64], index: 10, kind: input, shape index: {}]   ;;  %s5737_s11 = inlined_call_operand.vmem [shape: f32[2,64,32], index: 11, kind: input, shape index: {}]   ;;  %s5738_s12 = inlined_call_operand.vmem [shape: f32[2,1,32], index: 12, kind: input, shape index: {}]   ;;  %s5739_s13 = inlined_call_operand.vmem [shape: f32[2,1,32], index: 13, kind: input, shape index: {}]   ;;  %s5740_s14 = inlined_call_operand.vmem [shape: f32[2,1,32], index: 14, kind: input, shape index: {}]   ;;  %s5741_s15 = inlined_call_operand.vmem [shape: f32[64,32], index: 15, kind: output, shape index: {}]  }
   0x1 LB: > { %s4157_s19 = sadd.s32 4294967295, %s4598_s18   ;;  %p4161_p0 = scmp.ge.s32.totalorder %s4598_s18, 1  ;;  %s4598_s18 = sphi %s4697_s18, %s25_s18  }
   0x2   : > { %p438_p1 = scmp.lt.s32.totalorder %s4598_s18, 3 }
   0x4   : > { %p439_p2 = pnand %p4161_p0, %p438_p1 }
   0x5   : > { %s4162_s20 = sshll.u32 (!%p439_p2), %s4157_s19, 2  ;;  %s4602_s19 = smov (!%p439_p2), 96  }
   0x6   : > { %442 = sbr.rel (%p439_p2) target bundleno = 6471 (0x1947), region = 80  ;;  %p487_p3 = scmp.lt.s32.totalorder (!%p439_p2), %s4162_s20, 7 }
   0x7   : > { %s4603_s21 = smov (!%p439_p2), 88   ;;  %s4604_s22 = smov (!%p439_p2), 64  }
   0x8   : > { %s4605_s23 = smov (!%p439_p2), 120   ;;  %s5755_s24 = smov (!%p439_p2), 112  }
   0x9   : > { %s5757_s25 = smov (!%p439_p2), 80   ;;  %s5759_s26 = smov (!%p439_p2), 56  }
   0xa   : > { %s5749_s28 = smov (!%p439_p2), 72   ;;  %s5753_s29 = smov (!%p439_p2), 48  }
   0xb   : > { %v534_v0 = vld [vmem:[%s5727_s1 + $0x30] sm:$0x3]  ;;  %vm548_vm0 = vcmask 1041408   ;;  %v4600_v1 = vmov 0   ;;  %v533_v2 = vld [vmem:[%s5727_s1 + $0x28] sm:$0xff]  ;;  %s5774_s20 = smov (!%p487_p3, %s4162_s20), 7  ;;  %v502_v12 = vlaneseq }
   0xc   : > { %4362 = vset.pattern.permute.xlu0 %v4600_v1  ;;  %4363 = vset.pattern.permute.xlu1 %v4600_v1  ;;  %v532_v3 = vld [vmem:[%s5727_s1 + $0x20] sm:$0xff]  ;;  %s5742_s27 = sshll.u32 %s5774_s20, 3  ;;  %v531_v4 = vld [vmem:[%s5727_s1 + $0x18] sm:$0xff]  ;;  %v530_v7 = vld [vmem:[%s5727_s1 + $0x10] sm:$0xff]  ;;  %vm535_vm1 = vcmask 408576   ;;  %v4601_v16 = vmov 0.0  }
   0xd   : > { %4170 = vmatpush.msk.msra.mxu0 %vm548_vm0, %v534_v0  ;;  %s490_s17 = scalar_lea.vmem %s5726_s0, %s5742_s27  ;;  %v529_v8 = vld [vmem:[%s5727_s1 + $0x8] sm:$0xff]  ;;  %v528_v11 = vld [vmem:[%s5727_s1] sm:$0xff]  ;;  %v596_v13 = vld [vmem:[%s5729_s3 + $0x18] sm:$0xff]  ;;  %v503_v14 = vand.u32 127, %v502_v12  ;;  %vm601_vm6 = vcmask 261120   ;;  %vm646_vm7 = vcmask 64512  }
   0xe   : > { %v498_v5 = vld [vmem:[%s490_s17] sm:$0xff]  ;;  %v500_v6 = vld [vmem:[%s490_s17 + $0x10] sm:$0xff]  ;;  %v499_v9 = vld [vmem:[%s490_s17 + $0x8] sm:$0xff]  ;;  %626 = vmatpush.msra.mxu1 %v596_v13  ;;  %s5751_s30 = smov 104   ;;  %s5747_s16 = smov 40  }
   0xf   : > { %562 = vmatpush.msra.mxu0 %v533_v2  ;;  %505 = vperm.xlu0 %4362, %v498_v5   ;;  %v501_v10 = vld [vmem:[%s490_s17 + $0x18] sm:$0xff]  ;;  %v595_v24 = vld [vmem:[%s5729_s3 + $0x10] sm:$0xff]  ;;  %v594_v25 = vld [vmem:[%s5729_s3 + $0x8] sm:$0xff]  ;;  %s5743_s17 = smov 8   ;;  %s5745_s27 = smov 16  }
  0x10   : > { %511 = vperm.xlu1 %4363, %v500_v6   ;;  %627 = vmatpush.msra.mxu1 %v595_v24  ;;  %v593_v26 = vld [vmem:[%s5729_s3] sm:$0xff]  ;;  %v586_v32 = vld [vmem:[%s5728_s2 + $0x8] sm:$0xff]  ;;  %v587_v36 = vld [vmem:[%s5728_s2 + $0x10] sm:$0xff] }
  0x11   : > { %563 = vmatpush.msra.mxu0 %v532_v3  ;;  %v585_v28 = vld [vmem:[%s5728_s2] sm:$0xff]  ;;  %v588_v40 = vld [vmem:[%s5728_s2 + $0x18] sm:$0xff] }
  0x12   : > { %628 = vmatpush.msra.mxu1 %v594_v25  ;;  %v4414_v43 = vld [vmem:[%s5730_s4] ss:$0 sm:$0xff] }
  0x13   : > { %564 = vmatpush.msra.mxu0 %v531_v4 }
  0x14   : > { %629 = vmatpush.msra.mxu1 %v593_v26 }
  0x15   : > { %565 = vmatpush.msra.mxu0 %v530_v7 }
  0x17   : > { %566 = vmatpush.msra.mxu0 %v529_v8  ;;  %508 = vperm.xlu0 %4362, %v499_v9  }
  0x18   : > { %514 = vperm.xlu1 %4363, %v501_v10  }
  0x19   : > { %567 = vmatpush.msra.mxu0 %v528_v11 }
  0x81   : > { %v506_v15 = vpop.permute.xlu0 %505 }
  0x82   : > { %vm516_vm2 = vcmp.eq.s32.totalorder %v506_v15, %v503_v14  ;;  %v512_v19 = vpop.permute.xlu1 %511 }
  0x83   : > { %v4166_v17 = vsel %vm516_vm2, 1.0, %v4601_v16  ;;  %vm518_vm4 = vcmp.eq.s32.totalorder %v512_v19, %v503_v14 }
  0x84   : > { %4171 = vmatmul.msk.f32.vlgmr.msra.gmra.mxu0 %vm535_vm1, %v4166_v17  ;;  %v4168_v21 = vsel %vm518_vm4, 1.0, %v4601_v16 }
  0x89   : > { %v509_v18 = vpop.permute.xlu0 %508 }
  0x8a   : > { %vm517_vm3 = vcmp.eq.s32.totalorder %v509_v18, %v503_v14  ;;  %v515_v22 = vpop.permute.xlu1 %514 }
  0x8b   : > { %v4167_v20 = vsel %vm517_vm3, 1.0, %v4601_v16  ;;  %vm519_vm5 = vcmp.eq.s32.totalorder %v515_v22, %v503_v14 }
  0x8c   : > { %4172 = vmatmul.msk.f32.gmra.mxu0 %vm535_vm1, %v4167_v20  ;;  %v4169_v23 = vsel %vm519_vm5, 1.0, %v4601_v16 }
  0x94   : > { %4173 = vmatmul.msk.f32.gmra.mxu0 %vm535_vm1, %v4168_v21 }
  0x9c   : > { %4174 = vmatmul.msk.f32.gmra.mxu0 %vm535_vm1, %v4169_v23 }
 0x101   : > { %v569_v27 = vpop.f32.mrf.mxu0 }
 0x102   : > { %v581_v29 = vmul.f32 2.0, %v569_v27 }
 0x104   : > { %v4753_v30 = vadd.f32 %v585_v28, %v581_v29 }
 0x106   : > { %4175 = vmatmul.msk.f32.vlgmr.msra.gmra.mxu1 %vm601_vm6, %v4753_v30 }
 0x109   : > { %v572_v31 = vpop.f32.mrf.mxu0 }
 0x10a   : > { %v582_v33 = vmul.f32 2.0, %v572_v31 }
 0x10c   : > { %v4760_v34 = vadd.f32 %v586_v32, %v582_v33 }
 0x10e   : > { %4176 = vmatmul.msk.f32.gmra.mxu1 %vm601_vm6, %v4760_v34 }
 0x111   : > { %v575_v35 = vpop.f32.mrf.mxu0 }
 0x112   : > { %v583_v37 = vmul.f32 2.0, %v575_v35 }
 0x114   : > { %v4767_v38 = vadd.f32 %v587_v36, %v583_v37 }
 0x116   : > { %4177 = vmatmul.msk.f32.gmra.mxu1 %vm601_vm6, %v4767_v38 }
 0x119   : > { %v578_v39 = vpop.f32.mrf.mxu0 }
 0x11a   : > { %v584_v41 = vmul.f32 2.0, %v578_v39 }
 0x11c   : > { %v4774_v42 = vadd.f32 %v588_v40, %v584_v41 }
 0x11e   : > { %4178 = vmatmul.msk.f32.gmra.mxu1 %vm601_vm6, %v4774_v42 }
 0x183   : > { %v631_v44 = vpop.f32.mrf.mxu1 }
 0x184   : > { %v4781_v45 = vadd.f32 %v4414_v43, %v631_v44 }
 0x186   : > { %644 = vrot.lane.b32.xlu2 %v4781_v45, %s4602_s19 }
 0x18b   : > { %v634_v46 = vpop.f32.mrf.mxu1 }
 0x18c   : > { %v4785_v47 = vadd.f32 %v4414_v43, %v634_v46 }
 0x18e   : > { %672 = vrot.lane.b32.xlu0 %v4785_v47, %s4602_s19 }
 0x193   : > { %v637_v48 = vpop.f32.mrf.mxu1 }
 0x194   : > { %v4789_v49 = vadd.f32 %v4414_v43, %v637_v48 }
 0x196   : > { %699 = vrot.lane.b32.xlu2 %v4789_v49, %s4602_s19  ;;  %v4364_v4 = vpack.i.bf16 %v4789_v49, %v4781_v45 }
 0x19b   : > { %v640_v50 = vpop.f32.mrf.mxu1 }
 0x19c   : > { %v4793_v51 = vadd.f32 %v4414_v43, %v640_v50 }
 0x19e   : > { %726 = vrot.lane.b32.xlu1 %v4793_v51, %s4602_s19 }
 0x1e0   : > { %v645_v52 = vpop.permute.xlu2 %644 }
 0x1e1   : > { %4179 = vmatpush.xpose.msk.msra.mxu2 %vm646_vm7, %v645_v52 }
 0x1e4   : > { %4180 = vmatmul.msk.f32.vlgmr.msra.gmra.mxu2 %vm646_vm7, %v4781_v45 }
 0x1f0   : > { %v700_v53 = vpop.permute.xlu2 %699 }
 0x1f1   : > { %4183 = vmatpush.xpose.msk.msrb.mxu2 %vm646_vm7, %v700_v53 }
 0x1f4   : > { %4184 = vmatmul.msk.f32.vlgmr.msrb.gmra.mxu2 %vm646_vm7, %v4789_v49 }
 0x200   : > { %v673_v54 = vpop.permute.xlu0 %672 }
 0x201   : > { %4181 = vmatpush.xpose.msk.msra.mxu3 %vm646_vm7, %v673_v54 }
 0x204   : > { %4182 = vmatmul.msk.f32.vlgmr.msra.gmra.mxu3 %vm646_vm7, %v4785_v47 }
 0x210   : > { %v727_v55 = vpop.permute.xlu1 %726 }
 0x211   : > { %4185 = vmatpush.xpose.msk.msrb.mxu3 %vm646_vm7, %v727_v55 }
 0x214   : > { %4186 = vmatmul.msk.f32.vlgmr.msrb.gmra.mxu3 %vm646_vm7, %v4793_v51 }
 0x267   : > { %v668_v56 = vpop.f32.mrf.mxu2 }
 0x268   : > { %v752_v57 = vmul.f32 0.35355338, %v668_v56 }
 0x26a   : > { %v756_v58 = vsel %vm646_vm7, %v752_v57, -inf }
 0x26b   : > { %757 = vmax.xlane.f32.xlu2 %v756_v58 }
 0x277   : > { %v722_v59 = vpop.f32.mrf.mxu2 }
 0x278   : > { %v754_v60 = vmul.f32 0.35355338, %v722_v59 }
 0x27a   : > { %v762_v61 = vsel %vm646_vm7, %v754_v60, -inf }
 0x27b   : > { %763 = vmax.xlane.f32.xlu0 %v762_v61 }
 0x287   : > { %v695_v62 = vpop.f32.mrf.mxu3 }
 0x288   : > { %v753_v63 = vmul.f32 0.35355338, %v695_v62 }
 0x28a   : > { %v759_v0 = vsel %vm646_vm7, %v753_v63, -inf }
 0x28b   : > { %760 = vmax.xlane.f32.xlu1 %v759_v0 }
 0x28f   : > { %958 = vrot.lane.b32.xlu0 %v4781_v45, %s4603_s21 }
 0x297   : > { %v749_v1 = vpop.f32.mrf.mxu3 }
 0x298   : > { %v755_v2 = vmul.f32 0.35355338, %v749_v1 }
 0x29a   : > { %v765_v3 = vsel %vm646_vm7, %v755_v2, -inf }
 0x29b   : > { %766 = vmax.xlane.f32.xlu2 %v765_v3 }
 0x2a4   : > { %4365 = vrot.lane.b32.xlu1 %v4364_v4, %s4604_s22 }
 0x2ac   : > { %878 = vrot.lane.b32.xlu1 %v4785_v47, %s4604_s22 }
 0x2b4   : > { %1012 = vrot.lane.b32.xlu1 %v4789_v49, %s4605_s23 }
 0x2bc   : > { %1042 = vrot.lane.b32.xlu1 %v4793_v51, %s4603_s21 }
 0x2c4   : > { %984 = vrot.lane.b32.xlu1 %v4785_v47, %s4605_s23 }
 0x2de   : > { %v758_v5 = vpop.xlane.xlu2 %757 }
 0x2df   : > { %v768_v6 = vsub.f32 %v752_v57, %v758_v5 }
 0x2e1   : > { %v772_v7 = vmul.f32 1.442695, %v768_v6 }
 0x2e3   : > { %4430 = vpow2.f32 %v772_v7 }
 0x2e9   : > { %v4431_v8 = vpop.eup %4430 }
 0x2ea   : > { %v780_v9 = vsel %vm646_vm7, %v4431_v8, 0.0 }
 0x2eb   : > { %781 = vadd.xlane.f32.xlu2 %v780_v9 }
 0x2ee   : > { %v764_v10 = vpop.xlane.xlu0 %763 }
 0x2ef   : > { %v770_v11 = vsub.f32 %v754_v60, %v764_v10 }
 0x2f1   : > { %v776_v12 = vmul.f32 1.442695, %v770_v11 }
 0x2f3   : > { %4432 = vpow2.f32 %v776_v12 }
 0x2f9   : > { %v4827_v13 = vpop.eup %4432 }
 0x2fa   : > { %v786_v14 = vsel %vm646_vm7, %v4827_v13, 0.0 }
 0x2fb   : > { %787 = vadd.xlane.f32.xlu0 %v786_v14 }
 0x2fe   : > { %v761_v15 = vpop.xlane.xlu1 %760 }
 0x2ff   : > { %v769_v19 = vsub.f32 %v753_v63, %v761_v15 }
 0x301   : > { %v774_v20 = vmul.f32 1.442695, %v769_v19  ;;  %v959_v32 = vpop.permute.xlu0 %958 }
 0x303   : > { %956 = vrot.lane.b32.xlu2 %v4781_v45, %s4605_s23  ;;  %4434 = vpow2.f32 %v774_v20 }
 0x309   : > { %v4839_v25 = vpop.eup %4434 }
 0x30a   : > { %v783_v26 = vsel %vm646_vm7, %v4839_v25, 0.0 }
 0x30e   : > { %v767_v22 = vpop.xlane.xlu2 %766 }
 0x30f   : > { %1014 = vrot.lane.b32.xlu0 %v4789_v49, %s4603_s21  ;;  %v771_v23 = vsub.f32 %v755_v2, %v767_v22 }
 0x311   : > { %v778_v24 = vmul.f32 1.442695, %v771_v23 }
 0x313   : > { %4436 = vpow2.f32 %v778_v24 }
 0x316   : > { %v4366_v16 = vpop.permute.xlu1 %4365 }
 0x317   : > { %v4368_v17 = vunpack.i.h.bf16 %v4366_v16  ;;  %v4367_v18 = vunpack.i.l.bf16 %v4366_v16  ;;  %930 = vrot.lane.b32.xlu0 %v4793_v51, %s4604_s22 }
 0x319   : > { %873 = vmatpush.msra.mxu2 %v4367_v18  ;;  %v4843_v27 = vpop.eup %4436 }
 0x31a   : > { %v789_v28 = vsel %vm646_vm7, %v4843_v27, 0.0 }
 0x31b   : > { %925 = vmatpush.msrb.mxu2 %v4368_v17 }
 0x31e   : > { %v879_v21 = vpop.permute.xlu1 %878 }
 0x31f   : > { %986 = vrot.lane.b32.xlu0 %v4785_v47, %s4603_s21  ;;  %899 = vmatpush.msra.mxu3 %v879_v21 }
 0x326   : > { %v1013_v61 = vpop.permute.xlu1 %1012 }
 0x32c   : > { %784 = vadd.xlane.f32.xlu2 %v783_v26 }
 0x32e   : > { %v1043_v2 = vpop.permute.xlu1 %1042 }
 0x334   : > { %790 = vadd.xlane.f32.xlu2 %v789_v28 }
 0x34c   : > { %1040 = vrot.lane.b32.xlu2 %v4793_v51, %s4605_s23 }
 0x35e   : > { %v782_v29 = vpop.xlane.xlu2 %781 }
 0x35f   : > { %4438 = vrcp.f32 %v782_v29  ;;  %v803_v37 = vand.u32 2147483648, %v782_v29  ;;  %v801_v39 = vand.u32 2147483647, %v782_v29  ;;  %vm797_vm9 = vweird.f32 %v782_v29 }
 0x361   : > { %v804_v43 = vor.u32 1.1754944e-38, %v803_v37  ;;  %vm802_vm11 = vcmp.eq.f32.partialorder %v801_v39, 8.507059e+37 }
 0x365   : > { %v4439_v31 = vpop.eup %4438 }
 0x366   : > { %v793_v33 = vmul.f32 %v4439_v31, %v782_v29  ;;  %vm798_vm8 = vweird.f32 %v4439_v31  ;;  %v957_v0 = vpop.permute.xlu2 %956 }
 0x367   : > { %vm799_vm10 = vmor %vm797_vm9, %vm798_vm8 }
 0x368   : > { %v794_v35 = vsub.f32 1.0, %v793_v33 }
 0x36a   : > { %v795_v36 = vmul.f32 %v4439_v31, %v794_v35 }
 0x36c   : > { %v796_v40 = vadd.f32 %v4439_v31, %v795_v36 }
 0x36e   : > { %v800_v41 = vsel %vm799_vm10, %v4439_v31, %v796_v40  ;;  %v788_v44 = vpop.xlane.xlu0 %787 }
 0x36f   : > { %4440 = vrcp.f32 %v788_v44  ;;  %v805_v46 = vsel %vm802_vm11, %v804_v43, %v800_v41  ;;  %v833_v54 = vand.u32 2147483648, %v788_v44  ;;  %v831_v56 = vand.u32 2147483647, %v788_v44 }
 0x370   : > { %v806_v48 = vmul.f32 %v4431_v8, %v805_v46  ;;  %vm827_vm13 = vweird.f32 %v788_v44 }
 0x371   : > { %v834_v58 = vor.u32 1.1754944e-38, %v833_v54  ;;  %vm832_vm15 = vcmp.eq.f32.partialorder %v831_v56, 8.507059e+37 }
 0x372   : > { %4187 = vmatmul.msk.f32.vlgmr.msra.gmra.mxu2 %vm646_vm7, %v806_v48 }
 0x373   : > { %4191 = vmatpush.xpose.msk.msra.mxu2 %vm646_vm7, %v959_v32 }
 0x375   : > { %v4441_v50 = vpop.eup %4440 }
 0x376   : > { %v823_v52 = vmul.f32 %v4441_v50, %v788_v44  ;;  %vm828_vm12 = vweird.f32 %v4441_v50 }
 0x377   : > { %vm829_vm14 = vmor %vm827_vm13, %vm828_vm12 }
 0x378   : > { %v824_v53 = vsub.f32 1.0, %v823_v52 }
 0x37a   : > { %v825_v55 = vmul.f32 %v4441_v50, %v824_v53 }
 0x37c   : > { %v826_v57 = vadd.f32 %v4441_v50, %v825_v55 }
 0x37e   : > { %v830_v59 = vsel %vm829_vm14, %v4441_v50, %v826_v57 }
 0x37f   : > { %v835_v60 = vsel %vm832_vm15, %v834_v58, %v830_v59 }
 0x380   : > { %v836_v62 = vmul.f32 %v4827_v13, %v835_v60 }
 0x381   : > { %v1015_v63 = vpop.permute.xlu0 %1014 }
 0x382   : > { %4189 = vmatmul.msk.f32.vlgmr.msrb.gmra.mxu2 %vm646_vm7, %v836_v62 }
 0x383   : > { %4195 = vmatpush.xpose.msk.msrb.mxu2 %vm646_vm7, %v1015_v63 }
 0x389   : > { %v931_v1 = vpop.permute.xlu0 %930 }
 0x38a   : > { %951 = vmatpush.msrb.mxu3 %v931_v1  ;;  %4192 = vmatmul.msk.f32.vlgmr.msra.gmra.mxu2 %vm646_vm7, %v957_v0  ;;  %v4369_v0 = vpack.i.bf16 %v4785_v47, %v4793_v51 }
 0x38b   : > { %4197 = vmatpush.xpose.msk.msra.mxu2 %vm646_vm7, %v1043_v2 }
 0x391   : > { %v987_v21 = vpop.permute.xlu0 %986 }
 0x392   : > { %4196 = vmatmul.msk.f32.vlgmr.msrb.gmra.mxu2 %vm646_vm7, %v1013_v61 }
 0x39f   : > { %v785_v3 = vpop.xlane.xlu2 %784 }
 0x3a0   : > { %4442 = vrcp.f32 %v785_v3  ;;  %v818_v8 = vand.u32 2147483648, %v785_v3  ;;  %v816_v10 = vand.u32 2147483647, %v785_v3  ;;  %vm812_vm1 = vweird.f32 %v785_v3 }
 0x3a2   : > { %v819_v13 = vor.u32 1.1754944e-38, %v818_v8  ;;  %vm817_vm3 = vcmp.eq.f32.partialorder %v816_v10, 8.507059e+37 }
 0x3a6   : > { %v4443_v4 = vpop.eup %4442 }
 0x3a7   : > { %v808_v5 = vmul.f32 %v4443_v4, %v785_v3  ;;  %v791_v6 = vpop.xlane.xlu2 %790  ;;  %vm813_vm0 = vweird.f32 %v4443_v4 }
 0x3a8   : > { %4444 = vrcp.f32 %v791_v6  ;;  %vm814_vm2 = vmor %vm812_vm1, %vm813_vm0  ;;  %v848_v20 = vand.u32 2147483648, %v791_v6  ;;  %v846_v23 = vand.u32 2147483647, %v791_v6  ;;  %vm842_vm5 = vweird.f32 %v791_v6 }
 0x3a9   : > { %v809_v7 = vsub.f32 1.0, %v808_v5 }
 0x3aa   : > { %v849_v26 = vor.u32 1.1754944e-38, %v848_v20  ;;  %vm847_vm9 = vcmp.eq.f32.partialorder %v846_v23, 8.507059e+37 }
 0x3ab   : > { %v810_v9 = vmul.f32 %v4443_v4, %v809_v7 }
 0x3ad   : > { %v811_v11 = vadd.f32 %v4443_v4, %v810_v9 }
 0x3ae   : > { %v4445_v12 = vpop.eup %4444 }
 0x3af   : > { %v815_v14 = vsel %vm814_vm2, %v4443_v4, %v811_v11  ;;  %v838_v15 = vmul.f32 %v4445_v12, %v791_v6  ;;  %v1041_v16 = vpop.permute.xlu2 %1040  ;;  %vm843_vm4 = vweird.f32 %v4445_v12 }
 0x3b0   : > { %4198 = vmatmul.msk.f32.vlgmr.msra.gmra.mxu2 %vm646_vm7, %v1041_v16  ;;  %v820_v17 = vsel %vm817_vm3, %v819_v13, %v815_v14  ;;  %vm844_vm8 = vmor %vm842_vm5, %vm843_vm4 }
 0x3b1   : > { %v839_v18 = vsub.f32 1.0, %v838_v15  ;;  %v821_v19 = vmul.f32 %v4839_v25, %v820_v17  ;;  %v985_v25 = vpop.permute.xlu1 %984 }
 0x3b3   : > { %v840_v22 = vmul.f32 %v4445_v12, %v839_v18  ;;  %4188 = vmatmul.msk.f32.vlgmr.msra.gmra.mxu3 %vm646_vm7, %v821_v19 }
 0x3b4   : > { %4193 = vmatpush.xpose.msk.msra.mxu3 %vm646_vm7, %v987_v21 }
 0x3b5   : > { %v841_v24 = vadd.f32 %v4445_v12, %v840_v22 }
 0x3b7   : > { %v845_v28 = vsel %vm844_vm8, %v4445_v12, %v841_v24 }
 0x3b8   : > { %v850_v29 = vsel %vm847_vm9, %v849_v26, %v845_v28 }
 0x3b9   : > { %v851_v31 = vmul.f32 %v4843_v27, %v850_v29 }
 0x3bb   : > { %4190 = vmatmul.msk.f32.vlgmr.msrb.gmra.mxu3 %vm646_vm7, %v851_v31 }
 0x3c3   : > { %4194 = vmatmul.msk.f32.vlgmr.msra.gmra.mxu3 %vm646_vm7, %v985_v25 }
 0x3f5   : > { %v4864_v32 = vpop.f32.mrf.mxu2 }
 0x405   : > { %v4866_v33 = vpop.f32.mrf.mxu2 }
 0x40d   : > { %v981_v35 = vpop.f32.mrf.mxu2 }
 0x40e   : > { %v1068_v36 = vmul.f32 0.35355338, %v981_v35 }
 0x410   : > { %v1072_v37 = vsel %vm646_vm7, %v1068_v36, -inf }
 0x411   : > { %1073 = vmax.xlane.f32.xlu0 %v1072_v37 }
 0x415   : > { %v1037_v39 = vpop.f32.mrf.mxu2 }
 0x416   : > { %v1070_v40 = vmul.f32 0.35355338, %v1037_v39 }
 0x418   : > { %v1078_v41 = vsel %vm646_vm7, %v1070_v40, -inf }
 0x419   : > { %1079 = vmax.xlane.f32.xlu0 %v1078_v41 }
 0x42d   : > { %1272 = vrot.lane.b32.xlu0 %v4781_v45, %s5755_s24 }
 0x433   : > { %v1065_v27 = vpop.f32.mrf.mxu2 }
 0x434   : > { %v1071_v43 = vmul.f32 0.35355338, %v1065_v27 }
 0x436   : > { %v4872_v44 = vpop.f32.mrf.mxu3  ;;  %v1081_v46 = vsel %vm646_vm7, %v1071_v43, -inf }
 0x437   : > { %1082 = vmax.xlane.f32.xlu2 %v1081_v46 }
 0x43e   : > { %v4875_v48 = vpop.f32.mrf.mxu3 }
 0x446   : > { %v1009_v50 = vpop.f32.mrf.mxu3 }
 0x447   : > { %v1069_v52 = vmul.f32 0.35355338, %v1009_v50 }
 0x449   : > { %v1075_v53 = vsel %vm646_vm7, %v1069_v52, -inf }
 0x44a   : > { %1076 = vmax.xlane.f32.xlu1 %v1075_v53 }
 0x44f   : > { %1274 = vrot.lane.b32.xlu2 %v4781_v45, %s5757_s25 }
 0x463   : > { %1168 = vrot.lane.b32.xlu1 %v4781_v45, %s5759_s26 }
 0x484   : > { %v1074_v54 = vpop.xlane.xlu0 %1073 }
 0x485   : > { %v1084_v55 = vsub.f32 %v1068_v36, %v1074_v54 }
 0x487   : > { %v1088_v56 = vmul.f32 1.442695, %v1084_v55 }
 0x489   : > { %4446 = vpow2.f32 %v1088_v56 }
 0x48c   : > { %v1080_v57 = vpop.xlane.xlu0 %1079 }
 0x48d   : > { %v1086_v58 = vsub.f32 %v1070_v40, %v1080_v57 }
 0x48f   : > { %v4447_v59 = vpop.eup %4446  ;;  %v1092_v60 = vmul.f32 1.442695, %v1086_v58 }
 0x490   : > { %v1096_v61 = vsel %vm646_vm7, %v4447_v59, 0.0 }
 0x491   : > { %4448 = vpow2.f32 %v1092_v60  ;;  %1097 = vadd.xlane.f32.xlu2 %v1096_v61 }
 0x497   : > { %v4883_v62 = vpop.eup %4448 }
 0x498   : > { %v1102_v63 = vsel %vm646_vm7, %v4883_v62, 0.0 }
 0x499   : > { %1103 = vadd.xlane.f32.xlu1 %v1102_v63 }
 0x49f   : > { %v1273_v25 = vpop.permute.xlu0 %1272 }
 0x4a9   : > { %4370 = vrot.lane.b32.xlu2 %v4369_v0, %s5759_s26 }
 0x4aa   : > { %v1083_v6 = vpop.xlane.xlu2 %1082 }
 0x4ab   : > { %v1087_v9 = vsub.f32 %v1071_v43, %v1083_v6 }
 0x4ad   : > { %v1094_v10 = vmul.f32 1.442695, %v1087_v9 }
 0x4b1   : > { %1358 = vrot.lane.b32.xlu2 %v4793_v51, %s5757_s25 }
 0x4b2   : > { %v1275_v8 = vpop.permute.xlu2 %1274 }
 0x4b9   : > { %1356 = vrot.lane.b32.xlu2 %v4793_v51, %s5755_s24 }
 0x4bd   : > { %v1077_v1 = vpop.xlane.xlu1 %1076 }
 0x4be   : > { %v1085_v2 = vsub.f32 %v1069_v52, %v1077_v1 }
 0x4c0   : > { %v1090_v3 = vmul.f32 1.442695, %v1085_v2 }
 0x4c1   : > { %1300 = vrot.lane.b32.xlu2 %v4785_v47, %s5755_s24 }
 0x4c2   : > { %4450 = vpow2.f32 %v1090_v3 }
 0x4c8   : > { %v4896_v4 = vpop.eup %4450 }
 0x4c9   : > { %1328 = vrot.lane.b32.xlu2 %v4789_v49, %s5755_s24  ;;  %v1099_v5 = vsel %vm646_vm7, %v4896_v4, 0.0  ;;  %s5766_s24 = smov 72  }
 0x4ca   : > { %1100 = vadd.xlane.f32.xlu0 %v1099_v5 }
 0x4d5   : > { %v1169_v7 = vpop.permute.xlu1 %1168 }
 0x4d6   : > { %1189 = vmatpush.msrb.mxu3 %v1169_v7 }
 0x4d8   : > { %4203 = vmatpush.xpose.msk.msra.mxu3 %vm646_vm7, %v1275_v8 }
 0x4de   : > { %1302 = vrot.lane.b32.xlu0 %v4785_v47, %s5757_s25 }
 0x4e6   : > { %1220 = vrot.lane.b32.xlu0 %v4789_v49, %s5759_s26  ;;  %s5768_s26 = smov 16  }
 0x504   : > { %v1098_v11 = vpop.xlane.xlu2 %1097 }
 0x505   : > { %4452 = vrcp.f32 %v1098_v11  ;;  %v1119_v19 = vand.u32 2147483648, %v1098_v11  ;;  %v1117_v21 = vand.u32 2147483647, %v1098_v11  ;;  %vm1113_vm11 = vweird.f32 %v1098_v11 }
 0x506   : > { %4454 = vpow2.f32 %v1094_v10 }
 0x507   : > { %v1120_v24 = vor.u32 1.1754944e-38, %v1119_v19  ;;  %vm1118_vm13 = vcmp.eq.f32.partialorder %v1117_v21, 8.507059e+37 }
 0x50b   : > { %v4453_v12 = vpop.eup %4452 }
 0x50c   : > { %v1109_v13 = vmul.f32 %v4453_v12, %v1098_v11  ;;  %v4371_v14 = vpop.permute.xlu2 %4370  ;;  %v4907_v15 = vpop.eup %4454  ;;  %vm1114_vm10 = vweird.f32 %v4453_v12 }
 0x50d   : > { %v4372_v17 = vunpack.i.l.bf16 %v4371_v14  ;;  %v4373_v18 = vunpack.i.h.bf16 %v4371_v14  ;;  %v1105_v22 = vsel %vm646_vm7, %v4907_v15, 0.0  ;;  %vm1115_vm12 = vmor %vm1113_vm11, %vm1114_vm10  ;;  %v1104_v35 = vpop.xlane.xlu1 %1103 }
 0x50e   : > { %v1110_v16 = vsub.f32 1.0, %v1109_v13  ;;  %4456 = vrcp.f32 %v1104_v35  ;;  %v1149_v60 = vand.u32 2147483648, %v1104_v35  ;;  %vm1143_vm3 = vweird.f32 %v1104_v35 }
 0x50f   : > { %1215 = vmatpush.msrb.mxu0 %v4373_v18  ;;  %1267 = vmatpush.msrb.mxu2 %v4372_v17  ;;  %v1147_v63 = vand.u32 2147483647, %v1104_v35 }
 0x510   : > { %v1111_v20 = vmul.f32 %v4453_v12, %v1110_v16  ;;  %1106 = vadd.xlane.f32.xlu0 %v1105_v22  ;;  %v1150_v2 = vor.u32 1.1754944e-38, %v1149_v60 }
 0x511   : > { %vm1148_vm5 = vcmp.eq.f32.partialorder %v1147_v63, 8.507059e+37 }
 0x512   : > { %v1112_v23 = vadd.f32 %v4453_v12, %v1111_v20 }
 0x514   : > { %v1116_v26 = vsel %vm1115_vm12, %v4453_v12, %v1112_v23  ;;  %v1359_v28 = vpop.permute.xlu2 %1358  ;;  %v4457_v37 = vpop.eup %4456 }
 0x515   : > { %4209 = vmatpush.xpose.msk.msra.mxu2 %vm646_vm7, %v1359_v28  ;;  %v1121_v29 = vsel %vm1118_vm13, %v1120_v24, %v1116_v26  ;;  %v1139_v39 = vmul.f32 %v4457_v37, %v1104_v35  ;;  %vm1144_vm2 = vweird.f32 %v4457_v37 }
 0x516   : > { %v1122_v31 = vmul.f32 %v4447_v59, %v1121_v29  ;;  %vm1145_vm4 = vmor %vm1143_vm3, %vm1144_vm2 }
 0x517   : > { %v1140_v27 = vsub.f32 1.0, %v1139_v39 }
 0x518   : > { %4199 = vmatmul.msk.f32.vlgmr.msrb.gmra.mxu3 %vm646_vm7, %v1122_v31 }
 0x519   : > { %v1141_v53 = vmul.f32 %v4457_v37, %v1140_v27 }
 0x51b   : > { %v1142_v57 = vadd.f32 %v4457_v37, %v1141_v53 }
 0x51c   : > { %v1357_v58 = vpop.permute.xlu2 %1356 }
 0x51d   : > { %v1146_v1 = vsel %vm1145_vm4, %v4457_v37, %v1142_v57 }
 0x51e   : > { %v1151_v3 = vsel %vm1148_vm5, %v1150_v2, %v1146_v1 }
 0x51f   : > { %v1152_v7 = vmul.f32 %v4883_v62, %v1151_v3 }
 0x520   : > { %4204 = vmatmul.msk.f32.vlgmr.msra.gmra.mxu3 %vm646_vm7, %v1273_v25 }
 0x524   : > { %1330 = vrot.lane.b32.xlu0 %v4789_v49, %s5757_s25  ;;  %v1301_v5 = vpop.permute.xlu2 %1300  ;;  %s5767_s25 = smov 40  }
 0x52c   : > { %v1329_v20 = vpop.permute.xlu2 %1328 }
 0x53d   : > { %v1101_v36 = vpop.xlane.xlu0 %1100 }
 0x53e   : > { %4458 = vrcp.f32 %v1101_v36  ;;  %v1134_v46 = vand.u32 2147483648, %v1101_v36  ;;  %v1132_v52 = vand.u32 2147483647, %v1101_v36  ;;  %vm1128_vm15 = vweird.f32 %v1101_v36 }
 0x540   : > { %v1135_v55 = vor.u32 1.1754944e-38, %v1134_v46  ;;  %vm1133_vm1 = vcmp.eq.f32.partialorder %v1132_v52, 8.507059e+37 }
 0x544   : > { %v4459_v40 = vpop.eup %4458 }
 0x545   : > { %v1124_v41 = vmul.f32 %v4459_v40, %v1101_v36  ;;  %vm1129_vm14 = vweird.f32 %v4459_v40 }
 0x546   : > { %vm1130_vm0 = vmor %vm1128_vm15, %vm1129_vm14 }
 0x547   : > { %v1125_v43 = vsub.f32 1.0, %v1124_v41 }
 0x549   : > { %v1126_v50 = vmul.f32 %v4459_v40, %v1125_v43 }
 0x54b   : > { %v1127_v54 = vadd.f32 %v4459_v40, %v1126_v50 }
 0x54d   : > { %v1131_v56 = vsel %vm1130_vm0, %v4459_v40, %v1127_v54 }
 0x54e   : > { %v1136_v59 = vsel %vm1133_vm1, %v1135_v55, %v1131_v56 }
 0x54f   : > { %v1137_v61 = vmul.f32 %v4896_v4, %v1136_v59 }
 0x550   : > { %v1303_v0 = vpop.permute.xlu0 %1302 }
 0x551   : > { %4200 = vmatmul.msk.f32.vlgmr.msrb.gmra.mxu0 %vm646_vm7, %v1137_v61 }
 0x552   : > { %4205 = vmatpush.xpose.msk.msra.mxu0 %vm646_vm7, %v1303_v0 }
 0x558   : > { %v1221_v6 = vpop.permute.xlu0 %1220 }
 0x559   : > { %1241 = vmatpush.msrb.mxu1 %v1221_v6  ;;  %4206 = vmatmul.msk.f32.vlgmr.msra.gmra.mxu0 %vm646_vm7, %v1301_v5 }
 0x55a   : > { %4201 = vmatmul.msk.f32.vlgmr.msrb.gmra.mxu1 %vm646_vm7, %v1152_v7 }
 0x583   : > { %v1107_v4 = vpop.xlane.xlu0 %1106 }
 0x584   : > { %4460 = vrcp.f32 %v1107_v4  ;;  %v1164_v11 = vand.u32 2147483648, %v1107_v4  ;;  %v1162_v13 = vand.u32 2147483647, %v1107_v4  ;;  %vm1158_vm9 = vweird.f32 %v1107_v4 }
 0x586   : > { %v1165_v16 = vor.u32 1.1754944e-38, %v1164_v11  ;;  %vm1163_vm11 = vcmp.eq.f32.partialorder %v1162_v13, 8.507059e+37 }
 0x58a   : > { %v4461_v8 = vpop.eup %4460 }
 0x58b   : > { %v1154_v9 = vmul.f32 %v4461_v8, %v1107_v4  ;;  %vm1159_vm8 = vweird.f32 %v4461_v8 }
 0x58c   : > { %vm1160_vm10 = vmor %vm1158_vm9, %vm1159_vm8 }
 0x58d   : > { %v1155_v10 = vsub.f32 1.0, %v1154_v9 }
 0x58f   : > { %v1156_v12 = vmul.f32 %v4461_v8, %v1155_v10 }
 0x591   : > { %v1157_v14 = vadd.f32 %v4461_v8, %v1156_v12 }
 0x593   : > { %v1161_v17 = vsel %vm1160_vm10, %v4461_v8, %v1157_v14 }
 0x594   : > { %v1166_v62 = vsel %vm1163_vm11, %v1165_v16, %v1161_v17 }
 0x595   : > { %v1167_v18 = vmul.f32 %v4907_v15, %v1166_v62  ;;  %v4374_v15 = vpack.i.bf16 %v4793_v51, %v4785_v47 }
 0x596   : > { %v1331_v19 = vpop.permute.xlu0 %1330 }
 0x597   : > { %4202 = vmatmul.msk.f32.vlgmr.msrb.gmra.mxu2 %vm646_vm7, %v1167_v18  ;;  %4207 = vmatpush.xpose.msk.msra.mxu1 %vm646_vm7, %v1331_v19 }
 0x59a   : > { %4208 = vmatmul.msk.f32.vlgmr.msra.gmra.mxu1 %vm646_vm7, %v1329_v20 }
 0x59b   : > { %v4926_v21 = vpop.f32.mrf.mxu3 }
 0x59f   : > { %4210 = vmatmul.msk.f32.vlgmr.msra.gmra.mxu2 %vm646_vm7, %v1357_v58 }
 0x5a3   : > { %v1297_v22 = vpop.f32.mrf.mxu3 }
 0x5a4   : > { %v1384_v23 = vmul.f32 0.35355338, %v1297_v22 }
 0x5a6   : > { %v1388_v24 = vsel %vm646_vm7, %v1384_v23, -inf }
 0x5a7   : > { %1389 = vmax.xlane.f32.xlu0 %v1388_v24 }
 0x5bb   : > { %1590 = vrot.lane.b32.xlu0 %v4781_v45, %s5749_s28 }
 0x5c3   : > { %4375 = vrot.lane.b32.xlu0 %v4374_v15, %s5753_s29 }
 0x5cb   : > { %1618 = vrot.lane.b32.xlu0 %v4785_v47, %s5749_s28 }
 0x5ce   : > { %v4937_v26 = vpop.f32.mrf.mxu0 }
 0x5d3   : > { %1616 = vrot.lane.b32.xlu0 %v4785_v47, %s5751_s30 }
 0x5d6   : > { %v1325_v28 = vpop.f32.mrf.mxu0 }
 0x5d7   : > { %v1385_v29 = vmul.f32 0.35355338, %v1325_v28  ;;  %v4942_v25 = vpop.f32.mrf.mxu1 }
 0x5d9   : > { %v1391_v31 = vsel %vm646_vm7, %v1385_v29, -inf }
 0x5da   : > { %1392 = vmax.xlane.f32.xlu1 %v1391_v31 }
 0x617   : > { %v1353_v35 = vpop.f32.mrf.mxu1 }
 0x618   : > { %v1386_v36 = vmul.f32 0.35355338, %v1353_v35 }
 0x61a   : > { %v1390_v37 = vpop.xlane.xlu0 %1389  ;;  %v4944_v40 = vpop.f32.mrf.mxu2  ;;  %v1394_v41 = vsel %vm646_vm7, %v1386_v36, -inf }
 0x61b   : > { %v1400_v39 = vsub.f32 %v1384_v23, %v1390_v37  ;;  %1395 = vmax.xlane.f32.xlu1 %v1394_v41 }
 0x61d   : > { %v1404_v27 = vmul.f32 1.442695, %v1400_v39 }
 0x61f   : > { %4462 = vpow2.f32 %v1404_v27 }
 0x622   : > { %v1381_v43 = vpop.f32.mrf.mxu2 }
 0x623   : > { %v1387_v46 = vmul.f32 0.35355338, %v1381_v43 }
 0x625   : > { %v4463_v50 = vpop.eup %4462  ;;  %v1397_v52 = vsel %vm646_vm7, %v1387_v46, -inf }
 0x626   : > { %v1412_v53 = vsel %vm646_vm7, %v4463_v50, 0.0  ;;  %1398 = vmax.xlane.f32.xlu2 %v1397_v52 }
 0x627   : > { %1413 = vadd.xlane.f32.xlu1 %v1412_v53 }
 0x62d   : > { %v1591_v54 = vpop.permute.xlu0 %1590 }
 0x635   : > { %v4376_v55 = vpop.permute.xlu0 %4375 }
 0x636   : > { %v4378_v56 = vunpack.i.h.bf16 %v4376_v55  ;;  %v4377_v57 = vunpack.i.l.bf16 %v4376_v55 }
 0x638   : > { %1531 = vmatpush.msrb.mxu0 %v4377_v57  ;;  %1583 = vmatpush.msrb.mxu2 %v4378_v56 }
 0x63d   : > { %v1619_v58 = vpop.permute.xlu0 %1618 }
 0x63e   : > { %4217 = vmatpush.xpose.msk.msra.mxu0 %vm646_vm7, %v1619_v58  ;;  %1588 = vrot.lane.b32.xlu2 %v4781_v45, %s5751_s30 }
 0x640   : > { %1484 = vrot.lane.b32.xlu1 %v4781_v45, %s5753_s29 }
 0x645   : > { %v1617_v31 = vpop.permute.xlu0 %1616 }
 0x646   : > { %1536 = vrot.lane.b32.xlu2 %v4789_v49, %s5753_s29 }
 0x64d   : > { %v1393_v59 = vpop.xlane.xlu1 %1392 }
 0x64e   : > { %v1401_v60 = vsub.f32 %v1385_v29, %v1393_v59  ;;  %1674 = vrot.lane.b32.xlu2 %v4793_v51, %s5749_s28 }
 0x650   : > { %v1406_v61 = vmul.f32 1.442695, %v1401_v60 }
 0x652   : > { %4464 = vpow2.f32 %v1406_v61 }
 0x658   : > { %v4958_v63 = vpop.eup %4464 }
 0x659   : > { %v1415_v0 = vsel %vm646_vm7, %v4958_v63, 0.0 }
 0x65a   : > { %1416 = vadd.xlane.f32.xlu0 %v1415_v0 }
 0x66e   : > { %1672 = vrot.lane.b32.xlu0 %v4793_v51, %s5751_s30 }
 0x68e   : > { %v1396_v1 = vpop.xlane.xlu1 %1395 }
 0x68f   : > { %v1402_v2 = vsub.f32 %v1386_v36, %v1396_v1 }
 0x691   : > { %v1408_v3 = vmul.f32 1.442695, %v1402_v2 }
 0x693   : > { %4466 = vpow2.f32 %v1408_v3 }
 0x699   : > { %v4964_v5 = vpop.eup %4466  ;;  %v1399_v6 = vpop.xlane.xlu2 %1398 }
 0x69a   : > { %v1414_v7 = vpop.xlane.xlu1 %1413  ;;  %v1403_v4 = vsub.f32 %v1387_v46, %v1399_v6  ;;  %v1418_v8 = vsel %vm646_vm7, %v4964_v5, 0.0 }
 0x69b   : > { %4468 = vrcp.f32 %v1414_v7  ;;  %1419 = vadd.xlane.f32.xlu1 %v1418_v8  ;;  %v1435_v18 = vand.u32 2147483648, %v1414_v7  ;;  %vm1429_vm13 = vweird.f32 %v1414_v7  ;;  %v1433_v19 = vand.u32 2147483647, %v1414_v7 }
 0x69c   : > { %v1410_v9 = vmul.f32 1.442695, %v1403_v4 }
 0x69d   : > { %v1436_v23 = vor.u32 1.1754944e-38, %v1435_v18  ;;  %vm1434_vm15 = vcmp.eq.f32.partialorder %v1433_v19, 8.507059e+37 }
 0x69e   : > { %4470 = vpow2.f32 %v1410_v9 }
 0x6a1   : > { %v4469_v10 = vpop.eup %4468  ;;  %v1589_v12 = vpop.permute.xlu2 %1588 }
 0x6a2   : > { %v1425_v11 = vmul.f32 %v4469_v10, %v1414_v7  ;;  %vm1430_vm12 = vweird.f32 %v4469_v10 }
 0x6a3   : > { %vm1431_vm14 = vmor %vm1429_vm13, %vm1430_vm12 }
 0x6a4   : > { %v1426_v13 = vsub.f32 1.0, %v1425_v11  ;;  %v4968_v14 = vpop.eup %4470 }
 0x6a5   : > { %v1421_v17 = vsel %vm646_vm7, %v4968_v14, 0.0 }
 0x6a6   : > { %v1427_v16 = vmul.f32 %v4469_v10, %v1426_v13  ;;  %1422 = vadd.xlane.f32.xlu2 %v1421_v17 }
 0x6a8   : > { %v1428_v62 = vadd.f32 %v4469_v10, %v1427_v16 }
 0x6a9   : > { %v1537_v20 = vpop.permute.xlu2 %1536 }
 0x6aa   : > { %1557 = vmatpush.msrb.mxu1 %v1537_v20  ;;  %v1432_v22 = vsel %vm1431_vm14, %v4469_v10, %v1428_v62 }
 0x6ab   : > { %v1437_v24 = vsel %vm1434_vm15, %v1436_v23, %v1432_v22 }
 0x6ac   : > { %v1438_v29 = vmul.f32 %v4463_v50, %v1437_v24 }
 0x6b1   : > { %v1675_v15 = vpop.permute.xlu2 %1674 }
 0x6b2   : > { %v1485_v28 = vpop.permute.xlu1 %1484  ;;  %4221 = vmatpush.xpose.msk.msra.mxu2 %vm646_vm7, %v1675_v15 }
 0x6b3   : > { %1505 = vmatpush.msrb.mxu3 %v1485_v28 }
 0x6b4   : > { %4211 = vmatmul.msk.f32.vlgmr.msrb.gmra.mxu3 %vm646_vm7, %v1438_v29  ;;  %1646 = vrot.lane.b32.xlu1 %v4789_v49, %s5749_s28  ;;  %s5769_s28 = smov 8  }
 0x6b5   : > { %4215 = vmatpush.xpose.msk.msra.mxu3 %vm646_vm7, %v1591_v54 }
 0x6bc   : > { %4216 = vmatmul.msk.f32.vlgmr.msra.gmra.mxu3 %vm646_vm7, %v1589_v12 }
 0x6be   : > { %1644 = vrot.lane.b32.xlu2 %v4789_v49, %s5751_s30 }
 0x6cd   : > { %v1417_v35 = vpop.xlane.xlu0 %1416 }
 0x6ce   : > { %4472 = vrcp.f32 %v1417_v35  ;;  %v1450_v41 = vand.u32 2147483648, %v1417_v35  ;;  %v1448_v43 = vand.u32 2147483647, %v1417_v35  ;;  %vm1444_vm1 = vweird.f32 %v1417_v35 }
 0x6d0   : > { %v1451_v50 = vor.u32 1.1754944e-38, %v1450_v41  ;;  %vm1449_vm3 = vcmp.eq.f32.partialorder %v1448_v43, 8.507059e+37 }
 0x6d4   : > { %v4473_v36 = vpop.eup %4472 }
 0x6d5   : > { %v1440_v37 = vmul.f32 %v4473_v36, %v1417_v35  ;;  %vm1445_vm0 = vweird.f32 %v4473_v36 }
 0x6d6   : > { %vm1446_vm2 = vmor %vm1444_vm1, %vm1445_vm0 }
 0x6d7   : > { %v1441_v39 = vsub.f32 1.0, %v1440_v37 }
 0x6d9   : > { %v1442_v27 = vmul.f32 %v4473_v36, %v1441_v39 }
 0x6db   : > { %v1443_v46 = vadd.f32 %v4473_v36, %v1442_v27 }
 0x6dd   : > { %v1447_v52 = vsel %vm1446_vm2, %v4473_v36, %v1443_v46 }
 0x6de   : > { %v1452_v53 = vsel %vm1449_vm3, %v1451_v50, %v1447_v52 }
 0x6df   : > { %v1453_v54 = vmul.f32 %v4958_v63, %v1452_v53 }
 0x6e0   : > { %v1673_v19 = vpop.permute.xlu0 %1672 }
 0x6e1   : > { %4212 = vmatmul.msk.f32.vlgmr.msrb.gmra.mxu0 %vm646_vm7, %v1453_v54 }
 0x6e9   : > { %4218 = vmatmul.msk.f32.vlgmr.msra.gmra.mxu0 %vm646_vm7, %v1617_v31 }
 0x70e   : > { %v1420_v55 = vpop.xlane.xlu1 %1419 }
 0x70f   : > { %4474 = vrcp.f32 %v1420_v55  ;;  %v1465_v60 = vand.u32 2147483648, %v1420_v55  ;;  %v1463_v0 = vand.u32 2147483647, %v1420_v55  ;;  %vm1459_vm5 = vweird.f32 %v1420_v55 }
 0x711   : > { %v1466_v2 = vor.u32 1.1754944e-38, %v1465_v60  ;;  %vm1464_vm9 = vcmp.eq.f32.partialorder %v1463_v0, 8.507059e+37 }
 0x715   : > { %v4475_v56 = vpop.eup %4474 }
 0x716   : > { %v1455_v57 = vmul.f32 %v4475_v56, %v1420_v55  ;;  %vm1460_vm4 = vweird.f32 %v4475_v56 }
 0x717   : > { %vm1461_vm8 = vmor %vm1459_vm5, %vm1460_vm4 }
 0x718   : > { %v1456_v58 = vsub.f32 1.0, %v1455_v57 }
 0x719   : > { %v1423_v59 = vpop.xlane.xlu2 %1422 }
 0x71a   : > { %4476 = vrcp.f32 %v1423_v59  ;;  %v1457_v61 = vmul.f32 %v4475_v56, %v1456_v58  ;;  %v1480_v9 = vand.u32 2147483648, %v1423_v59  ;;  %v1478_v11 = vand.u32 2147483647, %v1423_v59 }
 0x71b   : > { %vm1474_vm11 = vweird.f32 %v1423_v59 }
 0x71c   : > { %v1458_v1 = vadd.f32 %v4475_v56, %v1457_v61  ;;  %v1481_v16 = vor.u32 1.1754944e-38, %v1480_v9  ;;  %vm1479_vm13 = vcmp.eq.f32.partialorder %v1478_v11, 8.507059e+37 }
 0x71e   : > { %v1462_v63 = vsel %vm1461_vm8, %v4475_v56, %v1458_v1 }
 0x71f   : > { %v1467_v6 = vsel %vm1464_vm9, %v1466_v2, %v1462_v63 }
 0x720   : > { %v4477_v3 = vpop.eup %4476  ;;  %v1468_v4 = vmul.f32 %v4964_v5, %v1467_v6 }
 0x721   : > { %v1470_v7 = vmul.f32 %v4477_v3, %v1423_v59  ;;  %vm1475_vm10 = vweird.f32 %v4477_v3  ;;  %v1645_v18 = vpop.permute.xlu2 %1644 }
 0x722   : > { %4213 = vmatmul.msk.f32.vlgmr.msrb.gmra.mxu1 %vm646_vm7, %v1468_v4  ;;  %vm1476_vm12 = vmor %vm1474_vm11, %vm1475_vm10 }
 0x723   : > { %v1471_v8 = vsub.f32 1.0, %v1470_v7 }
 0x725   : > { %v1472_v10 = vmul.f32 %v4477_v3, %v1471_v8 }
 0x726   : > { %v1647_v13 = vpop.permute.xlu1 %1646 }
 0x727   : > { %v1473_v12 = vadd.f32 %v4477_v3, %v1472_v10  ;;  %4219 = vmatpush.xpose.msk.msra.mxu1 %vm646_vm7, %v1647_v13 }
 0x729   : > { %v1477_v17 = vsel %vm1476_vm12, %v4477_v3, %v1473_v12 }
 0x72a   : > { %v1482_v62 = vsel %vm1479_vm13, %v1481_v16, %v1477_v17  ;;  %4220 = vmatmul.msk.f32.vlgmr.msra.gmra.mxu1 %vm646_vm7, %v1645_v18 }
 0x72b   : > { %v1483_v5 = vmul.f32 %v4968_v14, %v1482_v62  ;;  %v4379_v62 = vpack.i.bf16 %v4793_v51, %v4789_v49 }
 0x72d   : > { %4214 = vmatmul.msk.f32.vlgmr.msrb.gmra.mxu2 %vm646_vm7, %v1483_v5 }
 0x735   : > { %4222 = vmatmul.msk.f32.vlgmr.msra.gmra.mxu2 %vm646_vm7, %v1673_v19 }
 0x737   : > { %v1507_v20 = vpop.f32.mrf.mxu3 }
 0x73f   : > { %v1613_v22 = vpop.f32.mrf.mxu3 }
 0x740   : > { %v1700_v23 = vmul.f32 0.35355338, %v1613_v22 }
 0x742   : > { %v1704_v24 = vsel %vm646_vm7, %v1700_v23, -inf }
 0x743   : > { %1705 = vmax.xlane.f32.xlu0 %v1704_v24 }
 0x75e   : > { %v4991_v15 = vpop.f32.mrf.mxu0 }
 0x766   : > { %v1641_v28 = vpop.f32.mrf.mxu0 }
 0x767   : > { %v1701_v29 = vmul.f32 0.35355338, %v1641_v28 }
 0x769   : > { %v1707_v31 = vsel %vm646_vm7, %v1701_v29, -inf }
 0x76a   : > { %1708 = vmax.xlane.f32.xlu2 %v1707_v31 }
 0x79f   : > { %v4994_v35 = vpop.f32.mrf.mxu1 }
 0x7a7   : > { %v1669_v14 = vpop.f32.mrf.mxu1 }
 0x7a8   : > { %v1702_v36 = vmul.f32 0.35355338, %v1669_v14 }
 0x7aa   : > { %v1710_v37 = vsel %vm646_vm7, %v1702_v36, -inf }
 0x7ab   : > { %1711 = vmax.xlane.f32.xlu1 %v1710_v37 }
 0x7b0   : > { %v4997_v39 = vpop.f32.mrf.mxu2 }
 0x7b6   : > { %v1706_v41 = vpop.xlane.xlu0 %1705 }
 0x7b7   : > { %v1716_v27 = vsub.f32 %v1700_v23, %v1706_v41 }
 0x7b8   : > { %v1697_v46 = vpop.f32.mrf.mxu2 }
 0x7b9   : > { %v1720_v43 = vmul.f32 1.442695, %v1716_v27  ;;  %v1703_v50 = vmul.f32 0.35355338, %v1697_v46 }
 0x7bb   : > { %4478 = vpow2.f32 %v1720_v43  ;;  %v1713_v52 = vsel %vm646_vm7, %v1703_v50, -inf }
 0x7bc   : > { %1714 = vmax.xlane.f32.xlu0 %v1713_v52 }
 0x7c1   : > { %v4479_v53 = vpop.eup %4478 }
 0x7c2   : > { %v1728_v54 = vsel %vm646_vm7, %v4479_v53, 0.0 }
 0x7c3   : > { %1729 = vadd.xlane.f32.xlu2 %v1728_v54 }
 0x7db   : > { %1800 = vrot.lane.b32.xlu2 %v4781_v45, %s5747_s16 }
 0x7dd   : > { %v1709_v55 = vpop.xlane.xlu2 %1708 }
 0x7de   : > { %v1717_v56 = vsub.f32 %v1701_v29, %v1709_v55 }
 0x7e0   : > { %v1722_v57 = vmul.f32 1.442695, %v1717_v56 }
 0x7e2   : > { %4480 = vpow2.f32 %v1722_v57 }
 0x7e3   : > { %1908 = vrot.lane.b32.xlu2 %v4926_v21, %s5743_s17 }
 0x7e8   : > { %v5005_v58 = vpop.eup %4480 }
 0x7e9   : > { %v1731_v59 = vsel %vm646_vm7, %v5005_v58, 0.0 }
 0x7ea   : > { %1732 = vadd.xlane.f32.xlu0 %v1731_v59 }
 0x7eb   : > { %1924 = vrot.lane.b32.xlu2 %v1507_v20, %s5745_s27 }
 0x7f3   : > { %1910 = vrot.lane.b32.xlu2 %v4937_v26, %s5743_s17 }
 0x7fb   : > { %1912 = vrot.lane.b32.xlu2 %v4942_v25, %s5743_s17 }
 0x803   : > { %1914 = vrot.lane.b32.xlu2 %v4944_v40, %s5743_s17  ;;  %s4615_s17 = smov 24  }
 0x81e   : > { %v1712_v45 = vpop.xlane.xlu1 %1711 }
 0x81f   : > { %v1718_v21 = vsub.f32 %v1702_v36, %v1712_v45 }
 0x821   : > { %v1724_v60 = vmul.f32 1.442695, %v1718_v21 }
 0x823   : > { %4482 = vpow2.f32 %v1724_v60 }
 0x829   : > { %v5016_v61 = vpop.eup %4482 }
 0x82a   : > { %v1734_v0 = vsel %vm646_vm7, %v5016_v61, 0.0 }
 0x82b   : > { %1735 = vadd.xlane.f32.xlu0 %v1734_v0 }
 0x82f   : > { %v1715_v1 = vpop.xlane.xlu0 %1714 }
 0x830   : > { %v1719_v2 = vsub.f32 %v1703_v50, %v1715_v1 }
 0x832   : > { %v1726_v63 = vmul.f32 1.442695, %v1719_v2 }
 0x834   : > { %4484 = vpow2.f32 %v1726_v63 }
 0x836   : > { %v1730_v26 = vpop.xlane.xlu2 %1729 }
 0x837   : > { %4486 = vrcp.f32 %v1730_v26  ;;  %v1751_v8 = vand.u32 2147483648, %v1730_v26  ;;  %v1749_v10 = vand.u32 2147483647, %v1730_v26  ;;  %vm1745_vm15 = vweird.f32 %v1730_v26 }
 0x839   : > { %v1752_v12 = vor.u32 1.1754944e-38, %v1751_v8  ;;  %vm1750_vm1 = vcmp.eq.f32.partialorder %v1749_v10, 8.507059e+37 }
 0x83a   : > { %v5020_v25 = vpop.eup %4484 }
 0x83b   : > { %v1737_v40 = vsel %vm646_vm7, %v5020_v25, 0.0 }
 0x83c   : > { %1738 = vadd.xlane.f32.xlu1 %v1737_v40 }
 0x83d   : > { %v4487_v3 = vpop.eup %4486 }
 0x83e   : > { %v1741_v6 = vmul.f32 %v4487_v3, %v1730_v26  ;;  %v1801_v7 = vpop.permute.xlu2 %1800  ;;  %vm1746_vm14 = vweird.f32 %v4487_v3 }
 0x83f   : > { %1821 = vmatpush.msrb.mxu3 %v1801_v7  ;;  %1826 = vrot.lane.b32.xlu0 %v4785_v47, %s5747_s16  ;;  %vm1747_vm0 = vmor %vm1745_vm15, %vm1746_vm14 }
 0x840   : > { %v1742_v4 = vsub.f32 1.0, %v1741_v6  ;;  %v1966_v6 = vld [vmem:[%s5731_s5] sm:$0xff] }
 0x842   : > { %v1743_v9 = vmul.f32 %v4487_v3, %v1742_v4 }
 0x844   : > { %v1744_v11 = vadd.f32 %v4487_v3, %v1743_v9 }
 0x846   : > { %v1748_v13 = vsel %vm1747_vm0, %v4487_v3, %v1744_v11  ;;  %v1969_v3 = vld [vmem:[%s5731_s5 + $0x18] sm:$0xff]  ;;  %v1909_v4 = vpop.permute.xlu2 %1908  ;;  %vm1956_vm0 = vcmask 130048  }
 0x847   : > { %v1753_v16 = vsel %vm1750_vm1, %v1752_v12, %v1748_v13  ;;  %1998 = vmatpush.msra.mxu3 %v1969_v3  ;;  %vm1961_vm1 = vcmask 195584   ;;  %v1952_v9 = vsel %vm646_vm7, %v4864_v32, %v1909_v4 }
 0x848   : > { %v1754_v17 = vmul.f32 %v4479_v53, %v1753_v16 }
 0x84a   : > { %4223 = vmatmul.msk.f32.vlgmr.msrb.gmra.mxu3 %vm646_vm7, %v1754_v17 }
 0x84e   : > { %v1925_v8 = vpop.permute.xlu2 %1924 }
 0x84f   : > { %v1957_v10 = vsel %vm1956_vm0, %v1952_v9, %v1925_v8 }
 0x855   : > { %4380 = vrot.lane.b32.xlu1 %v4379_v62, %s5747_s16 }
 0x856   : > { %v1911_v17 = vpop.permute.xlu2 %1910 }
 0x85d   : > { %1926 = vrot.lane.b32.xlu1 %v4991_v15, %s5745_s27  ;;  %v1733_v47 = vpop.xlane.xlu0 %1732 }
 0x85e   : > { %4488 = vrcp.f32 %v1733_v47  ;;  %v1766_v49 = vand.u32 2147483648, %v1733_v47  ;;  %vm1760_vm3 = vweird.f32 %v1733_v47  ;;  %v1764_v51 = vand.u32 2147483647, %v1733_v47 }
 0x860   : > { %v1767_v15 = vor.u32 1.1754944e-38, %v1766_v49  ;;  %vm1765_vm5 = vcmp.eq.f32.partialorder %v1764_v51, 8.507059e+37 }
 0x864   : > { %v4489_v18 = vpop.eup %4488 }
 0x865   : > { %1928 = vrot.lane.b32.xlu1 %v4994_v35, %s5745_s27  ;;  %v1756_v5 = vmul.f32 %v4489_v18, %v1733_v47  ;;  %vm1761_vm2 = vweird.f32 %v4489_v18  ;;  %v1953_v47 = vsel %vm646_vm7, %v4872_v44, %v1911_v17 }
 0x866   : > { %vm1762_vm4 = vmor %vm1760_vm3, %vm1761_vm2 }
 0x867   : > { %v1757_v19 = vsub.f32 1.0, %v1756_v5 }
 0x869   : > { %v1758_v20 = vmul.f32 %v4489_v18, %v1757_v19  ;;  %v1913_v19 = vpop.permute.xlu2 %1912 }
 0x86b   : > { %v1759_v23 = vadd.f32 %v4489_v18, %v1758_v20 }
 0x86d   : > { %1930 = vrot.lane.b32.xlu1 %v4997_v39, %s5745_s27  ;;  %v1763_v24 = vsel %vm1762_vm4, %v4489_v18, %v1759_v23  ;;  %s5765_s27 = smov 104  }
 0x86e   : > { %v1768_v28 = vsel %vm1765_vm5, %v1767_v15, %v1763_v24  ;;  %v4415_v15 = vld [vmem:[%s5732_s6] ss:$0 sm:$0xff] }
 0x86f   : > { %v1769_v14 = vmul.f32 %v5005_v58, %v1768_v28 }
 0x871   : > { %v1915_v44 = vpop.permute.xlu2 %1914 }
 0x872   : > { %v1955_v28 = vsel %vm646_vm7, %v4875_v48, %v1915_v44 }
 0x89e   : > { %v1736_v22 = vpop.xlane.xlu0 %1735 }
 0x89f   : > { %4490 = vrcp.f32 %v1736_v22  ;;  %vm1775_vm10 = vweird.f32 %v1736_v22  ;;  %v1781_v53 = vand.u32 2147483648, %v1736_v22  ;;  %v1779_v55 = vand.u32 2147483647, %v1736_v22 }
 0x8a1   : > { %v1782_v59 = vor.u32 1.1754944e-38, %v1781_v53  ;;  %vm1780_vm14 = vcmp.eq.f32.partialorder %v1779_v55, 8.507059e+37 }
 0x8a5   : > { %v4491_v31 = vpop.eup %4490 }
 0x8a6   : > { %v1771_v36 = vmul.f32 %v4491_v31, %v1736_v22  ;;  %vm1776_vm8 = vweird.f32 %v4491_v31  ;;  %v1954_v22 = vsel %vm646_vm7, %v4866_v33, %v1913_v19 }
 0x8a7   : > { %vm1777_vm11 = vmor %vm1775_vm10, %vm1776_vm8 }
 0x8a8   : > { %v1772_v39 = vsub.f32 1.0, %v1771_v36 }
 0x8aa   : > { %v1773_v43 = vmul.f32 %v4491_v31, %v1772_v39  ;;  %v4616_v39 = vmov 32.0  }
 0x8ac   : > { %v1774_v50 = vadd.f32 %v4491_v31, %v1773_v43 }
 0x8ae   : > { %v1778_v57 = vsel %vm1777_vm11, %v4491_v31, %v1774_v50 }
 0x8af   : > { %v1739_v29 = vpop.xlane.xlu1 %1738  ;;  %v1783_v21 = vsel %vm1780_vm14, %v1782_v59, %v1778_v57 }
 0x8b0   : > { %4492 = vrcp.f32 %v1739_v29  ;;  %v1796_v54 = vand.u32 2147483648, %v1739_v29  ;;  %vm1790_vm12 = vweird.f32 %v1739_v29  ;;  %v1794_v56 = vand.u32 2147483647, %v1739_v29 }
 0x8b1   : > { %v1827_v35 = vpop.permute.xlu0 %1826  ;;  %v1784_v63 = vmul.f32 %v5016_v61, %v1783_v21  ;;  %v1968_v61 = vld [vmem:[%s5731_s5 + $0x10] sm:$0xff]  ;;  %4494 = vrcp.f32 %v4616_v39 }
 0x8b2   : > { %1847 = vmatpush.msrb.mxu0 %v1827_v35  ;;  %v1797_v45 = vor.u32 1.1754944e-38, %v1796_v54  ;;  %vm1795_vm15 = vcmp.eq.f32.partialorder %v1794_v56, 8.507059e+37  ;;  %1999 = vmatpush.msra.mxu3 %v1968_v61 }
 0x8b3   : > { %4224 = vmatmul.msk.f32.vlgmr.msrb.gmra.mxu0 %vm646_vm7, %v1769_v14 }
 0x8b6   : > { %v4493_v37 = vpop.eup %4492 }
 0x8b7   : > { %v1786_v41 = vmul.f32 %v4493_v37, %v1739_v29  ;;  %vm1791_vm9 = vweird.f32 %v4493_v37 }
 0x8b8   : > { %vm1792_vm13 = vmor %vm1790_vm12, %vm1791_vm9 }
 0x8b9   : > { %v1787_v27 = vsub.f32 1.0, %v1786_v41  ;;  %v4495_v41 = vpop.eup %4494 }
 0x8ba   : > { %v2034_v48 = vmul.f32 32.0, %v4495_v41  ;;  %vm2038_vm2 = vweird.f32 %v4495_v41 }
 0x8bb   : > { %v1788_v46 = vmul.f32 %v4493_v37, %v1787_v27 }
 0x8bd   : > { %v1789_v52 = vadd.f32 %v4493_v37, %v1788_v46 }
 0x8bf   : > { %v1793_v58 = vsel %vm1792_vm13, %v4493_v37, %v1789_v52  ;;  %v2035_v52 = vsub.f32 1.0, %v2034_v48 }
 0x8c0   : > { %v1798_v60 = vsel %vm1795_vm15, %v1797_v45, %v1793_v58 }
 0x8c1   : > { %v1799_v26 = vmul.f32 %v5020_v25, %v1798_v60  ;;  %v1967_v25 = vld [vmem:[%s5731_s5 + $0x8] sm:$0xff]  ;;  %v2036_v53 = vmul.f32 %v4495_v41, %v2035_v52  ;;  %v2186_v52 = vld [vmem:[%s5737_s11 + $0x18] sm:$0xff] }
 0x8c2   : > { %2000 = vmatpush.msra.mxu3 %v1967_v25  ;;  %v2133_v25 = vld [vmem:[%s5735_s9 + $0x18] sm:$0xff] }
 0x8c3   : > { %v2037_v54 = vadd.f32 %v4495_v41, %v2036_v53  ;;  %2162 = vmatpush.msra.mxu0 %v2133_v25 }
 0x8c4   : > { %2001 = vmatpush.msra.mxu3 %v1966_v6  ;;  %v2131_v6 = vld [vmem:[%s5735_s9 + $0x8] sm:$0xff] }
 0x8c5   : > { %v5085_v55 = vsel %vm2038_vm2, %v4495_v41, %v2037_v54  ;;  %v2189_v41 = vld [vmem:[%s5737_s11 + $0x30] sm:$0xff] }
 0x8c6   : > { %v2185_v54 = vld [vmem:[%s5737_s11 + $0x10] sm:$0xff] }
 0x8c7   : > { %v4381_v0 = vpop.permute.xlu1 %4380 }
 0x8c8   : > { %v4383_v1 = vunpack.i.h.bf16 %v4381_v0  ;;  %v4382_v2 = vunpack.i.l.bf16 %v4381_v0 }
 0x8ca   : > { %1873 = vmatpush.msrb.mxu1 %v4382_v2  ;;  %1899 = vmatpush.msrb.mxu2 %v4383_v1 }
 0x8cb   : > { %4225 = vmatmul.msk.f32.vlgmr.msrb.gmra.mxu1 %vm646_vm7, %v1784_v63  ;;  %4226 = vmatmul.msk.f32.vlgmr.msrb.gmra.mxu2 %vm646_vm7, %v1799_v26 }
 0x8cd   : > { %v1823_v40 = vpop.f32.mrf.mxu3 }
 0x8ce   : > { %1940 = vrot.lane.b32.xlu0 %v1823_v40, %s4615_s17 }
 0x8cf   : > { %v1927_v62 = vpop.permute.xlu1 %1926 }
 0x8d0   : > { %v1958_v32 = vsel %vm1956_vm0, %v1953_v47, %v1927_v62 }
 0x8d7   : > { %v1929_v20 = vpop.permute.xlu1 %1928 }
 0x8d8   : > { %v1959_v23 = vsel %vm1956_vm0, %v1954_v22, %v1929_v20 }
 0x8df   : > { %v1931_v24 = vpop.permute.xlu1 %1930 }
 0x8e0   : > { %v1960_v29 = vsel %vm1956_vm0, %v1955_v28, %v1931_v24 }
 0x930   : > { %v1849_v7 = vpop.f32.mrf.mxu0 }
 0x931   : > { %1942 = vrot.lane.b32.xlu0 %v1849_v7, %s4615_s17  ;;  %v2130_v7 = vld [vmem:[%s5735_s9] sm:$0xff] }
 0x940   : > { %v1941_v11 = vpop.permute.xlu0 %1940 }
 0x941   : > { %v1962_v12 = vsel %vm1961_vm1, %v1957_v10, %v1941_v11 }
 0x942   : > { %4227 = vmatmul.msk.f32.vlgmr.msra.gmra.mxu3 %vm601_vm6, %v1962_v12 }
 0x948   : > { %v1875_v13 = vpop.f32.mrf.mxu1 }
 0x949   : > { %1944 = vrot.lane.b32.xlu0 %v1875_v13, %s4615_s17 }
 0x94e   : > { %v1901_v16 = vpop.f32.mrf.mxu2 }
 0x951   : > { %1946 = vrot.lane.b32.xlu0 %v1901_v16, %s4615_s17 }
 0x9a3   : > { %v1943_v18 = vpop.permute.xlu0 %1942 }
 0x9a4   : > { %v1963_v5 = vsel %vm1961_vm1, %v1958_v32, %v1943_v18 }
 0x9a5   : > { %4228 = vmatmul.msk.f32.gmra.mxu3 %vm601_vm6, %v1963_v5 }
 0x9bb   : > { %v1945_v49 = vpop.permute.xlu0 %1944 }
 0x9bc   : > { %v1964_v51 = vsel %vm1961_vm1, %v1959_v23, %v1945_v49 }
 0x9bd   : > { %4229 = vmatmul.msk.f32.gmra.mxu3 %vm601_vm6, %v1964_v51  ;;  %v5127_v51 = vld [vmem:[%s5733_s7] ss:$0 sm:$0xff] }
 0x9c3   : > { %v1947_v31 = vpop.permute.xlu0 %1946 }
 0x9c4   : > { %v1965_v35 = vsel %vm1961_vm1, %v1960_v29, %v1947_v31 }
 0x9c5   : > { %v2003_v33 = vpop.f32.mrf.mxu3  ;;  %4230 = vmatmul.msk.f32.gmra.mxu3 %vm601_vm6, %v1965_v35 }
 0x9c6   : > { %v2004_v14 = vadd.f32 %v4415_v15, %v2003_v33 }
 0x9c8   : > { %v2015_v36 = vadd.f32 %v2004_v14, %v4753_v30 }
 0x9ca   : > { %v2021_v37 = vsel %vm601_vm6, %v2015_v36, 0.0 }
 0x9cb   : > { %2022 = vadd.xlane.f32.xlu2 %v2021_v37  ;;  %v2190_v37 = vld [vmem:[%s5737_s11 + $0x38] sm:$0xff] }
 0x9cc   : > { %2216 = vmatpush.msra.mxu1 %v2190_v37 }
 0x9ce   : > { %2217 = vmatpush.msra.mxu1 %v2189_v41 }
 0xa28   : > { %v2006_v27 = vpop.f32.mrf.mxu3 }
 0xa29   : > { %v2007_v43 = vadd.f32 %v4415_v15, %v2006_v27 }
 0xa2b   : > { %v2016_v46 = vadd.f32 %v2007_v43, %v4760_v34  ;;  %v2188_v43 = vld [vmem:[%s5737_s11 + $0x28] sm:$0xff] }
 0xa2c   : > { %2218 = vmatpush.msra.mxu1 %v2188_v43 }
 0xa2d   : > { %v2024_v50 = vsel %vm601_vm6, %v2016_v46, 0.0 }
 0xa2e   : > { %2025 = vadd.xlane.f32.xlu1 %v2024_v50 }
 0xa3e   : > { %v2023_v30 = vpop.xlane.xlu2 %2022 }
 0xa3f   : > { %v2040_v56 = vmul.f32 %v5085_v55, %v2023_v30 }
 0xa40   : > { %v2009_v58 = vpop.f32.mrf.mxu3 }
 0xa41   : > { %v2044_v57 = vsub.f32 %v2015_v36, %v2040_v56  ;;  %v2010_v59 = vadd.f32 %v4415_v15, %v2009_v58  ;;  %v2184_v58 = vld [vmem:[%s5737_s11 + $0x8] sm:$0xff] }
 0xa43   : > { %v2048_v45 = vmul.f32 %v2044_v57, %v2044_v57  ;;  %v2017_v21 = vadd.f32 %v2010_v59, %v4767_v38  ;;  %v2183_v59 = vld [vmem:[%s5737_s11] sm:$0xff] }
 0xa45   : > { %v2052_v34 = vsel %vm601_vm6, %v2048_v45, 0.0  ;;  %v2027_v60 = vsel %vm601_vm6, %v2017_v21, 0.0 }
 0xa46   : > { %2053 = vadd.xlane.f32.xlu1 %v2052_v34  ;;  %2028 = vadd.xlane.f32.xlu0 %v2027_v60 }
 0xa48   : > { %v2012_v0 = vpop.f32.mrf.mxu3 }
 0xa49   : > { %v2013_v1 = vadd.f32 %v4415_v15, %v2012_v0  ;;  %v5132_v15 = vld [vmem:[%s5734_s8] ss:$0 sm:$0xff] }
 0xa4b   : > { %v2018_v2 = vadd.f32 %v2013_v1, %v4774_v42  ;;  %v2132_v42 = vld [vmem:[%s5735_s9 + $0x10] sm:$0xff] }
 0xa4c   : > { %2163 = vmatpush.msra.mxu0 %v2132_v42 }
 0xa4d   : > { %v2030_v63 = vsel %vm601_vm6, %v2018_v2, 0.0 }
 0xa4e   : > { %2031 = vadd.xlane.f32.xlu2 %v2030_v63  ;;  %2164 = vmatpush.msra.mxu0 %v2131_v6 }
 0xa50   : > { %2165 = vmatpush.msra.mxu0 %v2130_v7 }
 0xaa1   : > { %v2026_v26 = vpop.xlane.xlu1 %2025 }
 0xaa2   : > { %v2041_v40 = vmul.f32 %v5085_v55, %v2026_v26 }
 0xaa4   : > { %v5094_v3 = vsub.f32 %v2016_v46, %v2041_v40  ;;  %v2187_v46 = vld [vmem:[%s5737_s11 + $0x20] sm:$0xff] }
 0xaa5   : > { %2219 = vmatpush.msra.mxu1 %v2187_v46 }
 0xaa6   : > { %v2049_v38 = vmul.f32 %v5094_v3, %v5094_v3 }
 0xaa7   : > { %2220 = vmatpush.msra.mxu1 %v2186_v52 }
 0xaa8   : > { %v2055_v61 = vsel %vm601_vm6, %v2049_v38, 0.0 }
 0xaa9   : > { %2056 = vadd.xlane.f32.xlu0 %v2055_v61  ;;  %2221 = vmatpush.msra.mxu1 %v2185_v54 }
 0xaab   : > { %2222 = vmatpush.msra.mxu1 %v2184_v58 }
 0xaad   : > { %2223 = vmatpush.msra.mxu1 %v2183_v59 }
 0xab9   : > { %v2054_v4 = vpop.xlane.xlu1 %2053  ;;  %v2029_v8 = vpop.xlane.xlu0 %2028 }
 0xaba   : > { %v2064_v9 = vmul.f32 %v2054_v4, %v5085_v55  ;;  %v2042_v10 = vmul.f32 %v5085_v55, %v2029_v8 }
 0xabc   : > { %v2068_v11 = vadd.f32 1e-05, %v2064_v9  ;;  %v5113_v12 = vsub.f32 %v2017_v21, %v2042_v10 }
 0xabe   : > { %4496 = vrsqrt.f32 %v2068_v11  ;;  %v2050_v13 = vmul.f32 %v5113_v12, %v5113_v12  ;;  %vm2078_vm4 = vweird.f32 %v2068_v11 }
 0xac0   : > { %v2058_v16 = vsel %vm601_vm6, %v2050_v13, 0.0 }
 0xac1   : > { %2059 = vadd.xlane.f32.xlu2 %v2058_v16  ;;  %v2032_v17 = vpop.xlane.xlu2 %2031 }
 0xac2   : > { %v2043_v62 = vmul.f32 %v5085_v55, %v2032_v17 }
 0xac4   : > { %v4497_v47 = vpop.eup %4496  ;;  %v5119_v18 = vsub.f32 %v2018_v2, %v2043_v62 }
 0xac5   : > { %v2073_v32 = vmul.f32 %v4497_v47, %v2068_v11  ;;  %vm2079_vm3 = vweird.f32 %v4497_v47  ;;  %v4418_v11 = vld [vmem:[%s5736_s10] ss:$0 sm:$0xff] }
 0xac6   : > { %v2051_v19 = vmul.f32 %v5119_v18, %v5119_v18  ;;  %vm2080_vm5 = vmor %vm2078_vm4, %vm2079_vm3  ;;  %vm2195_vm3 = vcmask 523264  }
 0xac7   : > { %v2074_v5 = vmul.f32 %v4497_v47, %v2073_v32 }
 0xac8   : > { %v2061_v22 = vsel %vm601_vm6, %v2051_v19, 0.0 }
 0xac9   : > { %v2075_v20 = vmul.f32 0.5, %v2074_v5  ;;  %2062 = vadd.xlane.f32.xlu1 %v2061_v22 }
 0xacb   : > { %v2076_v23 = vsub.f32 1.5, %v2075_v20 }
 0xacd   : > { %v2077_v49 = vmul.f32 %v4497_v47, %v2076_v23 }
 0xacf   : > { %v2081_v44 = vsel %vm2080_vm5, %v4497_v47, %v2077_v49 }
 0xad0   : > { %v2112_v24 = vmul.f32 %v2081_v44, %v2044_v57 }
 0xad2   : > { %v2119_v28 = vmul.f32 %v5127_v51, %v2112_v24 }
 0xad4   : > { %v5136_v29 = vadd.f32 %v5132_v15, %v2119_v28 }
 0xad6   : > { %4231 = vmatmul.msk.f32.vlgmr.msra.gmra.mxu0 %vm601_vm6, %v5136_v29 }
 0xb1c   : > { %v2057_v31 = vpop.xlane.xlu0 %2056 }
 0xb1d   : > { %v2065_v33 = vmul.f32 %v2057_v31, %v5085_v55 }
 0xb1f   : > { %v2069_v35 = vadd.f32 1e-05, %v2065_v33 }
 0xb21   : > { %4498 = vrsqrt.f32 %v2069_v35  ;;  %vm2088_vm9 = vweird.f32 %v2069_v35 }
 0xb27   : > { %v4499_v14 = vpop.eup %4498 }
 0xb28   : > { %v2083_v36 = vmul.f32 %v4499_v14, %v2069_v35  ;;  %vm2089_vm8 = vweird.f32 %v4499_v14 }
 0xb29   : > { %vm2090_vm10 = vmor %vm2088_vm9, %vm2089_vm8 }
 0xb2a   : > { %v2084_v39 = vmul.f32 %v4499_v14, %v2083_v36 }
 0xb2c   : > { %v2085_v27 = vmul.f32 0.5, %v2084_v39 }
 0xb2e   : > { %v2086_v48 = vsub.f32 1.5, %v2085_v27 }
 0xb30   : > { %v2087_v50 = vmul.f32 %v4499_v14, %v2086_v48 }
 0xb32   : > { %v2091_v53 = vsel %vm2090_vm10, %v4499_v14, %v2087_v50 }
 0xb33   : > { %v2113_v56 = vmul.f32 %v2091_v53, %v5094_v3 }
 0xb34   : > { %v2060_v30 = vpop.xlane.xlu2 %2059 }
 0xb35   : > { %v2066_v57 = vmul.f32 %v2060_v30, %v5085_v55  ;;  %v2120_v45 = vmul.f32 %v5127_v51, %v2113_v56 }
 0xb37   : > { %v2070_v21 = vadd.f32 1e-05, %v2066_v57  ;;  %v2127_v34 = vadd.f32 %v5132_v15, %v2120_v45 }
 0xb39   : > { %4500 = vrsqrt.f32 %v2070_v21  ;;  %4232 = vmatmul.msk.f32.gmra.mxu0 %vm601_vm6, %v2127_v34  ;;  %vm2098_vm12 = vweird.f32 %v2070_v21 }
 0xb3c   : > { %v2063_v60 = vpop.xlane.xlu1 %2062 }
 0xb3d   : > { %v2067_v0 = vmul.f32 %v2063_v60, %v5085_v55  ;;  %v4242_v60 = vld [vmem:[%s5729_s3 + $0x38] sm:$0xff] }
 0xb3e   : > { %2379 = vmatpush.msra.mxu2 %v4242_v60  ;;  %4333 = vmatpush.msrb.mxu3 %v4242_v60 }
 0xb3f   : > { %v4501_v1 = vpop.eup %4500  ;;  %v2071_v2 = vadd.f32 1e-05, %v2067_v0 }
 0xb40   : > { %v2093_v63 = vmul.f32 %v4501_v1, %v2070_v21  ;;  %vm2099_vm11 = vweird.f32 %v4501_v1 }
 0xb41   : > { %4502 = vrsqrt.f32 %v2071_v2  ;;  %vm2100_vm13 = vmor %vm2098_vm12, %vm2099_vm11  ;;  %vm2108_vm15 = vweird.f32 %v2071_v2 }
 0xb42   : > { %v2094_v26 = vmul.f32 %v4501_v1, %v2093_v63  ;;  %v4240_v63 = vld [vmem:[%s5729_s3 + $0x28] sm:$0xff] }
 0xb44   : > { %v2095_v40 = vmul.f32 0.5, %v2094_v26  ;;  %v4239_v26 = vld [vmem:[%s5729_s3 + $0x20] sm:$0xff] }
 0xb46   : > { %v2096_v3 = vsub.f32 1.5, %v2095_v40 }
 0xb47   : > { %v4503_v38 = vpop.eup %4502 }
 0xb48   : > { %v2097_v61 = vmul.f32 %v4501_v1, %v2096_v3  ;;  %v2103_v25 = vmul.f32 %v4503_v38, %v2071_v2  ;;  %vm2109_vm14 = vweird.f32 %v4503_v38 }
 0xb49   : > { %vm2110_vm2 = vmor %vm2108_vm15, %vm2109_vm14 }
 0xb4a   : > { %v2101_v42 = vsel %vm2100_vm13, %v4501_v1, %v2097_v61  ;;  %v2104_v6 = vmul.f32 %v4503_v38, %v2103_v25  ;;  %v4241_v1 = vld [vmem:[%s5729_s3 + $0x30] sm:$0xff] }
 0xb4b   : > { %v2114_v7 = vmul.f32 %v2101_v42, %v5113_v12  ;;  %2380 = vmatpush.msra.mxu2 %v4241_v1  ;;  %4334 = vmatpush.msrb.mxu3 %v4241_v1 }
 0xb4c   : > { %v2105_v4 = vmul.f32 0.5, %v2104_v6 }
 0xb4d   : > { %v2121_v8 = vmul.f32 %v5127_v51, %v2114_v7  ;;  %2381 = vmatpush.msra.mxu2 %v4240_v63  ;;  %4335 = vmatpush.msrb.mxu3 %v4240_v63 }
 0xb4e   : > { %v2106_v9 = vsub.f32 1.5, %v2105_v4 }
 0xb4f   : > { %v2128_v10 = vadd.f32 %v5132_v15, %v2121_v8  ;;  %2382 = vmatpush.msra.mxu2 %v4239_v26  ;;  %4336 = vmatpush.msrb.mxu3 %v4239_v26  ;;  %v4422_v26 = vld [vmem:[%s5730_s4 + $0x1] ss:$0 sm:$0xff] }
 0xb50   : > { %v2107_v13 = vmul.f32 %v4503_v38, %v2106_v9 }
 0xb51   : > { %4233 = vmatmul.msk.f32.gmra.mxu0 %vm601_vm6, %v2128_v10 }
 0xb52   : > { %v2111_v16 = vsel %vm2110_vm2, %v4503_v38, %v2107_v13 }
 0xb53   : > { %v2167_v17 = vpop.f32.mrf.mxu0  ;;  %v2115_v12 = vmul.f32 %v2111_v16, %v5119_v18  ;;  %v4419_v18 = vld [vmem:[%s5738_s12] ss:$0 sm:$0xff] }
 0xb54   : > { %v2168_v62 = vadd.f32 %v4418_v11, %v2167_v17 }
 0xb55   : > { %v2122_v32 = vmul.f32 %v5127_v51, %v2115_v12  ;;  %v4420_v12 = vld [vmem:[%s5739_s13] ss:$0 sm:$0xff] }
 0xb56   : > { %v2179_v47 = vmax.f32 %v2168_v62, 0.0 }
 0xb57   : > { %v2129_v5 = vadd.f32 %v5132_v15, %v2122_v32 }
 0xb58   : > { %4235 = vmatmul.msk.f32.vlgmr.msra.gmra.mxu1 %vm2195_vm3, %v2179_v47 }
 0xb59   : > { %4234 = vmatmul.msk.f32.gmra.mxu0 %vm601_vm6, %v2129_v5 }
 0xbb6   : > { %v2170_v19 = vpop.f32.mrf.mxu0 }
 0xbb7   : > { %v2171_v20 = vadd.f32 %v4418_v11, %v2170_v19 }
 0xbb9   : > { %v2180_v22 = vmax.f32 %v2171_v20, 0.0 }
 0xbbb   : > { %4236 = vmatmul.msk.f32.gmra.mxu1 %vm2195_vm3, %v2180_v22 }
 0xbce   : > { %v2173_v23 = vpop.f32.mrf.mxu0 }
 0xbcf   : > { %v2174_v49 = vadd.f32 %v4418_v11, %v2173_v23 }
 0xbd1   : > { %v2181_v44 = vmax.f32 %v2174_v49, 0.0 }
 0xbd3   : > { %4237 = vmatmul.msk.f32.gmra.mxu1 %vm2195_vm3, %v2181_v44 }
 0xbd5   : > { %v2225_v51 = vpop.f32.mrf.mxu1 }
 0xbd6   : > { %v2226_v24 = vadd.f32 %v4419_v18, %v2225_v51  ;;  %v2176_v28 = vpop.f32.mrf.mxu0 }
 0xbd7   : > { %v2177_v15 = vadd.f32 %v4418_v11, %v2176_v28 }
 0xbd8   : > { %v2237_v31 = vadd.f32 %v2226_v24, %v5136_v29 }
 0xbd9   : > { %v2182_v33 = vmax.f32 %v2177_v15, 0.0 }
 0xbda   : > { %v2243_v35 = vsel %vm601_vm6, %v2237_v31, 0.0 }
 0xbdb   : > { %2244 = vadd.xlane.f32.xlu2 %v2243_v35  ;;  %4238 = vmatmul.msk.f32.gmra.mxu1 %vm2195_vm3, %v2182_v33 }
 0xc38   : > { %v2228_v14 = vpop.f32.mrf.mxu1 }
 0xc39   : > { %v2229_v36 = vadd.f32 %v4419_v18, %v2228_v14 }
 0xc3b   : > { %v2238_v37 = vadd.f32 %v2229_v36, %v2127_v34 }
 0xc3d   : > { %v2246_v39 = vsel %vm601_vm6, %v2238_v37, 0.0 }
 0xc3e   : > { %2247 = vadd.xlane.f32.xlu0 %v2246_v39 }
 0xc4e   : > { %v2245_v41 = vpop.xlane.xlu2 %2244 }
 0xc4f   : > { %v2255_v43 = vmul.f32 %v2245_v41, %v5085_v55 }
 0xc50   : > { %v2231_v27 = vpop.f32.mrf.mxu1 }
 0xc51   : > { %v2232_v48 = vadd.f32 %v4419_v18, %v2231_v27  ;;  %v2259_v50 = vsub.f32 %v2237_v31, %v2255_v43 }
 0xc53   : > { %v2239_v46 = vadd.f32 %v2232_v48, %v2128_v10  ;;  %v2263_v54 = vmul.f32 %v2259_v50, %v2259_v50 }
 0xc55   : > { %v2249_v29 = vsel %vm601_vm6, %v2239_v46, 0.0  ;;  %v2267_v57 = vsel %vm601_vm6, %v2263_v54, 0.0 }
 0xc56   : > { %2250 = vadd.xlane.f32.xlu1 %v2249_v29 }
 0xc58   : > { %v2234_v52 = vpop.f32.mrf.mxu1 }
 0xc59   : > { %v2235_v53 = vadd.f32 %v4419_v18, %v2234_v52 }
 0xc5b   : > { %v2240_v30 = vadd.f32 %v2235_v53, %v2129_v5  ;;  %v4421_v5 = vld [vmem:[%s5740_s14] ss:$0 sm:$0xff] }
 0xc5d   : > { %v2252_v56 = vsel %vm601_vm6, %v2240_v30, 0.0 }
 0xc5e   : > { %2253 = vadd.xlane.f32.xlu0 %v2252_v56  ;;  %2268 = vadd.xlane.f32.xlu1 %v2267_v57 }
 0xcb1   : > { %v2248_v58 = vpop.xlane.xlu0 %2247 }
 0xcb2   : > { %v2256_v59 = vmul.f32 %v2248_v58, %v5085_v55 }
 0xcb4   : > { %v5197_v45 = vsub.f32 %v2238_v37, %v2256_v59 }
 0xcb6   : > { %v2264_v21 = vmul.f32 %v5197_v45, %v5197_v45 }
 0xcb8   : > { %v2270_v34 = vsel %vm601_vm6, %v2264_v21, 0.0 }
 0xcb9   : > { %2271 = vadd.xlane.f32.xlu2 %v2270_v34 }
 0xcc9   : > { %v2251_v0 = vpop.xlane.xlu1 %2250 }
 0xcca   : > { %v2257_v2 = vmul.f32 %v2251_v0, %v5085_v55 }
 0xccc   : > { %v5215_v40 = vsub.f32 %v2239_v46, %v2257_v2 }
 0xcce   : > { %v2265_v3 = vmul.f32 %v5215_v40, %v5215_v40 }
 0xcd0   : > { %v2273_v38 = vsel %vm601_vm6, %v2265_v3, 0.0 }
 0xcd1   : > { %v2254_v61 = vpop.xlane.xlu0 %2253  ;;  %2274 = vadd.xlane.f32.xlu0 %v2273_v38  ;;  %v2269_v25 = vpop.xlane.xlu1 %2268 }
 0xcd2   : > { %v2258_v42 = vmul.f32 %v2254_v61, %v5085_v55  ;;  %v2279_v6 = vmul.f32 %v2269_v25, %v5085_v55 }
 0xcd4   : > { %v5222_v7 = vsub.f32 %v2240_v30, %v2258_v42  ;;  %v2283_v4 = vadd.f32 1e-05, %v2279_v6 }
 0xcd6   : > { %4504 = vrsqrt.f32 %v2283_v4  ;;  %v2266_v8 = vmul.f32 %v5222_v7, %v5222_v7  ;;  %vm2293_vm5 = vweird.f32 %v2283_v4 }
 0xcd8   : > { %v2276_v9 = vsel %vm601_vm6, %v2266_v8, 0.0 }
 0xcd9   : > { %2277 = vadd.xlane.f32.xlu2 %v2276_v9 }
 0xcdc   : > { %v4505_v10 = vpop.eup %4504 }
 0xcdd   : > { %v2288_v11 = vmul.f32 %v4505_v10, %v2283_v4  ;;  %vm2294_vm4 = vweird.f32 %v4505_v10 }
 0xcde   : > { %vm2295_vm8 = vmor %vm2293_vm5, %vm2294_vm4 }
 0xcdf   : > { %v2289_v13 = vmul.f32 %v4505_v10, %v2288_v11 }
 0xce1   : > { %v2290_v16 = vmul.f32 0.5, %v2289_v13 }
 0xce3   : > { %v2291_v17 = vsub.f32 1.5, %v2290_v16 }
 0xce5   : > { %v2292_v62 = vmul.f32 %v4505_v10, %v2291_v17 }
 0xce7   : > { %v2296_v47 = vsel %vm2295_vm8, %v4505_v10, %v2292_v62 }
 0xce8   : > { %v2327_v32 = vmul.f32 %v2296_v47, %v2259_v50 }
 0xcea   : > { %v2334_v19 = vmul.f32 %v4420_v12, %v2327_v32 }
 0xcec   : > { %v5233_v20 = vadd.f32 %v4421_v5, %v2334_v19 }
 0xcee   : > { %4244 = vmatmul.msk.f32.vlgmr.msra.gmra.mxu2 %vm601_vm6, %v5233_v20 }
 0xd2c   : > { %v2272_v22 = vpop.xlane.xlu2 %2271 }
 0xd2d   : > { %v2280_v23 = vmul.f32 %v2272_v22, %v5085_v55 }
 0xd2f   : > { %v2284_v49 = vadd.f32 1e-05, %v2280_v23 }
 0xd31   : > { %4506 = vrsqrt.f32 %v2284_v49  ;;  %vm2303_vm10 = vweird.f32 %v2284_v49 }
 0xd37   : > { %v4507_v44 = vpop.eup %4506 }
 0xd38   : > { %v2298_v18 = vmul.f32 %v4507_v44, %v2284_v49  ;;  %vm2304_vm9 = vweird.f32 %v4507_v44 }
 0xd39   : > { %vm2305_vm11 = vmor %vm2303_vm10, %vm2304_vm9 }
 0xd3a   : > { %v2299_v51 = vmul.f32 %v4507_v44, %v2298_v18 }
 0xd3c   : > { %v2300_v24 = vmul.f32 0.5, %v2299_v51 }
 0xd3e   : > { %v2301_v28 = vsub.f32 1.5, %v2300_v24 }
 0xd40   : > { %v2302_v15 = vmul.f32 %v4507_v44, %v2301_v28 }
 0xd42   : > { %v2306_v31 = vsel %vm2305_vm11, %v4507_v44, %v2302_v15 }
 0xd43   : > { %v2328_v33 = vmul.f32 %v2306_v31, %v5197_v45 }
 0xd44   : > { %v2275_v35 = vpop.xlane.xlu0 %2274 }
 0xd45   : > { %v2281_v14 = vmul.f32 %v2275_v35, %v5085_v55  ;;  %v2335_v36 = vmul.f32 %v4420_v12, %v2328_v33 }
 0xd47   : > { %v2285_v37 = vadd.f32 1e-05, %v2281_v14  ;;  %v5240_v39 = vadd.f32 %v4421_v5, %v2335_v36 }
 0xd49   : > { %4508 = vrsqrt.f32 %v2285_v37  ;;  %4245 = vmatmul.msk.f32.vlgmr.msrb.gmra.mxu3 %vm601_vm6, %v5240_v39  ;;  %vm2313_vm13 = vweird.f32 %v2285_v37 }
 0xd4c   : > { %v2278_v41 = vpop.xlane.xlu2 %2277 }
 0xd4d   : > { %v2282_v27 = vmul.f32 %v2278_v41, %v5085_v55 }
 0xd4f   : > { %v4509_v43 = vpop.eup %4508  ;;  %v2286_v48 = vadd.f32 1e-05, %v2282_v27 }
 0xd50   : > { %v2308_v46 = vmul.f32 %v4509_v43, %v2285_v37  ;;  %vm2314_vm12 = vweird.f32 %v4509_v43 }
 0xd51   : > { %4510 = vrsqrt.f32 %v2286_v48  ;;  %vm2315_vm14 = vmor %vm2313_vm13, %vm2314_vm12  ;;  %vm2323_vm2 = vweird.f32 %v2286_v48 }
 0xd52   : > { %v2309_v50 = vmul.f32 %v4509_v43, %v2308_v46 }
 0xd54   : > { %v2310_v29 = vmul.f32 0.5, %v2309_v50 }
 0xd56   : > { %v2311_v52 = vsub.f32 1.5, %v2310_v29 }
 0xd57   : > { %v4511_v53 = vpop.eup %4510 }
 0xd58   : > { %v2312_v54 = vmul.f32 %v4509_v43, %v2311_v52  ;;  %v2318_v30 = vmul.f32 %v4511_v53, %v2286_v48  ;;  %vm2324_vm15 = vweird.f32 %v4511_v53 }
 0xd59   : > { %vm2325_vm4 = vmor %vm2323_vm2, %vm2324_vm15 }
 0xd5a   : > { %v2316_v56 = vsel %vm2315_vm14, %v4509_v43, %v2312_v54  ;;  %v2319_v57 = vmul.f32 %v4511_v53, %v2318_v30 }
 0xd5b   : > { %v2329_v58 = vmul.f32 %v2316_v56, %v5215_v40 }
 0xd5c   : > { %v2320_v59 = vmul.f32 0.5, %v2319_v57 }
 0xd5d   : > { %v2336_v45 = vmul.f32 %v4420_v12, %v2329_v58 }
 0xd5e   : > { %v2321_v21 = vsub.f32 1.5, %v2320_v59 }
 0xd5f   : > { %v5246_v34 = vadd.f32 %v4421_v5, %v2336_v45 }
 0xd60   : > { %v2322_v60 = vmul.f32 %v4511_v53, %v2321_v21 }
 0xd61   : > { %4246 = vmatmul.msk.f32.gmra.mxu3 %vm601_vm6, %v5246_v34 }
 0xd62   : > { %v2326_v0 = vsel %vm2325_vm4, %v4511_v53, %v2322_v60 }
 0xd63   : > { %v2330_v1 = vmul.f32 %v2326_v0, %v5222_v7 }
 0xd65   : > { %v2337_v2 = vmul.f32 %v4420_v12, %v2330_v1 }
 0xd67   : > { %v5251_v63 = vadd.f32 %v4421_v5, %v2337_v2 }
 0xd69   : > { %4247 = vmatmul.msk.f32.gmra.mxu3 %vm601_vm6, %v5251_v63 }
 0xd71   : > { %v2384_v40 = vpop.f32.mrf.mxu2 }
 0xd72   : > { %v5258_v3 = vadd.f32 %v4422_v26, %v2384_v40 }
 0xd74   : > { %2397 = vrot.lane.b32.xlu1 %v5258_v3, %s4602_s19 }
 0xdcc   : > { %v2387_v38 = vpop.f32.mrf.mxu3 }
 0xdcd   : > { %v5273_v4 = vadd.f32 %v4422_v26, %v2387_v38 }
 0xde4   : > { %v2390_v61 = vpop.f32.mrf.mxu3 }
 0xde5   : > { %v5262_v25 = vadd.f32 %v4422_v26, %v2390_v61 }
 0xde6   : > { %v2398_v42 = vpop.permute.xlu1 %2397 }
 0xde7   : > { %4248 = vmatpush.xpose.msk.msra.mxu3 %vm646_vm7, %v2398_v42  ;;  %2766 = vrot.lane.b32.xlu1 %v5262_v25, %s4603_s21  ;;  %v4384_v8 = vpack.i.bf16 %v5258_v3, %v5262_v25 }
 0xde8   : > { %2451 = vrot.lane.b32.xlu0 %v5262_v25, %s4602_s19 }
 0xdea   : > { %4249 = vmatmul.msk.f32.vlgmr.msra.gmra.mxu3 %vm646_vm7, %v5258_v3 }
 0xdec   : > { %v2393_v6 = vpop.f32.mrf.mxu3 }
 0xded   : > { %v5271_v7 = vadd.f32 %v4422_v26, %v2393_v6 }
 0xdef   : > { %2478 = vrot.lane.b32.xlu2 %v5271_v7, %s4602_s19  ;;  %v4394_v26 = vpack.i.bf16 %v5273_v4, %v5271_v7 }
 0xdf0   : > { %2424 = vrot.lane.b32.xlu0 %v5273_v4, %s4602_s19  ;;  %s5761_s19 = smov 56  }
 0xdf7   : > { %2682 = vrot.lane.b32.xlu2 %v5271_v7, %s4604_s22 }
 0xdf8   : > { %4385 = vrot.lane.b32.xlu0 %v4384_v8, %s4604_s22 }
 0xe00   : > { %2764 = vrot.lane.b32.xlu0 %v5262_v25, %s4605_s23 }
 0xe08   : > { %2710 = vrot.lane.b32.xlu0 %v5258_v3, %s4603_s21 }
 0xe49   : > { %v2479_v9 = vpop.permute.xlu2 %2478 }
 0xe4a   : > { %4254 = vmatpush.xpose.msk.msrb.mxu3 %vm646_vm7, %v2479_v9 }
 0xe4d   : > { %4255 = vmatmul.msk.f32.vlgmr.msrb.gmra.mxu3 %vm646_vm7, %v5271_v7 }
 0xe51   : > { %v2683_v10 = vpop.permute.xlu2 %2682 }
 0xe52   : > { %2703 = vmatpush.msra.mxu3 %v2683_v10 }
 0xe59   : > { %v2767_v12 = vpop.permute.xlu1 %2766 }
 0xe5a   : > { %v2452_v11 = vpop.permute.xlu0 %2451 }
 0xe5b   : > { %4252 = vmatpush.xpose.msk.msrb.mxu2 %vm646_vm7, %v2452_v11 }
 0xe5e   : > { %4253 = vmatmul.msk.f32.vlgmr.msrb.gmra.mxu2 %vm646_vm7, %v5262_v25 }
 0xe62   : > { %v2425_v13 = vpop.permute.xlu0 %2424 }
 0xe63   : > { %4250 = vmatpush.xpose.msk.msrb.mxu0 %vm646_vm7, %v2425_v13 }
 0xe66   : > { %4251 = vmatmul.msk.f32.vlgmr.msrb.gmra.mxu0 %vm646_vm7, %v5273_v4 }
 0xe6a   : > { %v4386_v16 = vpop.permute.xlu0 %4385 }
 0xe6b   : > { %v4388_v17 = vunpack.i.h.bf16 %v4386_v16  ;;  %v4387_v62 = vunpack.i.l.bf16 %v4386_v16 }
 0xe6d   : > { %2625 = vmatpush.msra.mxu0 %v4388_v17  ;;  %2677 = vmatpush.msra.mxu2 %v4387_v62  ;;  %v2420_v47 = vpop.f32.mrf.mxu3 }
 0xe6e   : > { %v2504_v32 = vmul.f32 0.35355338, %v2420_v47 }
 0xe6f   : > { %4264 = vmatpush.xpose.msk.msrb.mxu2 %vm646_vm7, %v2767_v12 }
 0xe70   : > { %v2508_v5 = vsel %vm646_vm7, %v2504_v32, -inf }
 0xe71   : > { %2509 = vmax.xlane.f32.xlu2 %v2508_v5 }
 0xe72   : > { %v5299_v19 = vpop.permute.xlu0 %2764 }
 0xe7a   : > { %v2711_v22 = vpop.permute.xlu0 %2710 }
 0xe7b   : > { %4260 = vmatpush.xpose.msk.msrb.mxu0 %vm646_vm7, %v2711_v22 }
 0xe89   : > { %2630 = vrot.lane.b32.xlu2 %v5273_v4, %s4604_s22  ;;  %s5762_s22 = smov 80  }
 0xed0   : > { %v2501_v23 = vpop.f32.mrf.mxu3 }
 0xed1   : > { %v2507_v49 = vmul.f32 0.35355338, %v2501_v23 }
 0xed3   : > { %v2517_v44 = vsel %vm646_vm7, %v2507_v49, -inf }
 0xed4   : > { %2518 = vmax.xlane.f32.xlu0 %v2517_v44 }
 0xee1   : > { %v2474_v15 = vpop.f32.mrf.mxu2 }
 0xee2   : > { %v2506_v31 = vmul.f32 0.35355338, %v2474_v15 }
 0xee3   : > { %v2447_v18 = vpop.f32.mrf.mxu0 }
 0xee4   : > { %v2505_v51 = vmul.f32 0.35355338, %v2447_v18  ;;  %v2510_v24 = vpop.xlane.xlu2 %2509  ;;  %v2514_v35 = vsel %vm646_vm7, %v2506_v31, -inf }
 0xee5   : > { %v2520_v14 = vsub.f32 %v2504_v32, %v2510_v24 }
 0xee6   : > { %v2511_v28 = vsel %vm646_vm7, %v2505_v51, -inf }
 0xee7   : > { %2512 = vmax.xlane.f32.xlu1 %v2511_v28  ;;  %v2524_v36 = vmul.f32 1.442695, %v2520_v14 }
 0xee8   : > { %2708 = vrot.lane.b32.xlu0 %v5258_v3, %s4605_s23 }
 0xee9   : > { %4512 = vpow2.f32 %v2524_v36 }
 0xeec   : > { %v2631_v33 = vpop.permute.xlu2 %2630 }
 0xeed   : > { %2651 = vmatpush.msrb.mxu1 %v2631_v33 }
 0xeef   : > { %2515 = vmax.xlane.f32.xlu1 %v2514_v35  ;;  %v4513_v37 = vpop.eup %4512 }
 0xef0   : > { %v2532_v41 = vsel %vm646_vm7, %v4513_v37, 0.0 }
 0xf08   : > { %2794 = vrot.lane.b32.xlu1 %v5271_v7, %s4603_s21 }
 0xf12   : > { %2533 = vadd.xlane.f32.xlu0 %v2532_v41 }
 0xf26   : > { %2736 = vrot.lane.b32.xlu0 %v5273_v4, %s4605_s23 }
 0xf2e   : > { %4390 = vrot.lane.b32.xlu0 %v4384_v8, %s5761_s19 }
 0xf36   : > { %3026 = vrot.lane.b32.xlu0 %v5258_v3, %s5762_s22 }
 0xf47   : > { %v2519_v27 = vpop.xlane.xlu0 %2518 }
 0xf48   : > { %v2523_v43 = vsub.f32 %v2507_v49, %v2519_v27 }
 0xf4a   : > { %v2530_v48 = vmul.f32 1.442695, %v2523_v43 }
 0xf4c   : > { %4514 = vpow2.f32 %v2530_v48 }
 0xf52   : > { %v5317_v46 = vpop.eup %4514 }
 0xf53   : > { %v2541_v50 = vsel %vm646_vm7, %v5317_v46, 0.0 }
 0xf54   : > { %2542 = vadd.xlane.f32.xlu1 %v2541_v50 }
 0xf5a   : > { %v2513_v29 = vpop.xlane.xlu1 %2512  ;;  %v2709_v60 = vpop.permute.xlu0 %2708 }
 0xf5b   : > { %v2521_v52 = vsub.f32 %v2505_v51, %v2513_v29 }
 0xf5d   : > { %v2526_v53 = vmul.f32 1.442695, %v2521_v52 }
 0xf5f   : > { %4516 = vpow2.f32 %v2526_v53 }
 0xf62   : > { %v2516_v54 = vpop.xlane.xlu1 %2515 }
 0xf63   : > { %v2522_v30 = vsub.f32 %v2506_v31, %v2516_v54 }
 0xf65   : > { %v5321_v56 = vpop.eup %4516  ;;  %v2528_v57 = vmul.f32 1.442695, %v2522_v30 }
 0xf66   : > { %v2535_v58 = vsel %vm646_vm7, %v5321_v56, 0.0 }
 0xf67   : > { %4518 = vpow2.f32 %v2528_v57  ;;  %2536 = vadd.xlane.f32.xlu2 %v2535_v58 }
 0xf6d   : > { %v5325_v59 = vpop.eup %4518  ;;  %2792 = vrot.lane.b32.xlu1 %v5271_v7, %s4605_s23  ;;  %s5764_s23 = smov 48  }
 0xf6e   : > { %v2538_v45 = vsel %vm646_vm7, %v5325_v59, 0.0 }
 0xf6f   : > { %2539 = vadd.xlane.f32.xlu2 %v2538_v45 }
 0xf75   : > { %3082 = vrot.lane.b32.xlu1 %v5262_v25, %s5762_s22 }
 0xf7a   : > { %v2795_v21 = vpop.permute.xlu1 %2794 }
 0xf7b   : > { %4266 = vmatpush.xpose.msk.msrb.mxu3 %vm646_vm7, %v2795_v21 }
 0xf85   : > { %v2534_v0 = vpop.xlane.xlu0 %2533 }
 0xf86   : > { %4520 = vrcp.f32 %v2534_v0  ;;  %v2555_v38 = vand.u32 2147483648, %v2534_v0  ;;  %v2553_v42 = vand.u32 2147483647, %v2534_v0  ;;  %vm2549_vm8 = vweird.f32 %v2534_v0 }
 0xf87   : > { %2738 = vrot.lane.b32.xlu2 %v5273_v4, %s4603_s21  ;;  %s5763_s21 = smov 112  }
 0xf88   : > { %v2556_v8 = vor.u32 1.1754944e-38, %v2555_v38  ;;  %vm2554_vm10 = vcmp.eq.f32.partialorder %v2553_v42, 8.507059e+37 }
 0xf8c   : > { %v4521_v1 = vpop.eup %4520 }
 0xf8d   : > { %v2545_v2 = vmul.f32 %v4521_v1, %v2534_v0  ;;  %vm2550_vm5 = vweird.f32 %v4521_v1 }
 0xf8e   : > { %vm2551_vm9 = vmor %vm2549_vm8, %vm2550_vm5 }
 0xf8f   : > { %v2546_v40 = vsub.f32 1.0, %v2545_v2  ;;  %4395 = vrot.lane.b32.xlu2 %v4394_v26, %s5761_s19 }
 0xf91   : > { %v2547_v61 = vmul.f32 %v4521_v1, %v2546_v40 }
 0xf93   : > { %v2548_v6 = vadd.f32 %v4521_v1, %v2547_v61 }
 0xf95   : > { %v2552_v9 = vsel %vm2551_vm9, %v4521_v1, %v2548_v6 }
 0xf96   : > { %v2557_v10 = vsel %vm2554_vm10, %v2556_v8, %v2552_v9 }
 0xf97   : > { %v2558_v11 = vmul.f32 %v4513_v37, %v2557_v10 }
 0xf98   : > { %v5339_v13 = vpop.permute.xlu0 %2736 }
 0xf99   : > { %4256 = vmatmul.msk.f32.vlgmr.msra.gmra.mxu0 %vm646_vm7, %v2558_v11 }
 0xfa0   : > { %v5342_v16 = vpop.permute.xlu0 %4390 }
 0xfa1   : > { %v4393_v17 = vunpack.i.h.bf16 %v5342_v16  ;;  %4261 = vmatmul.msk.f32.vlgmr.msrb.gmra.mxu0 %vm646_vm7, %v2709_v60 }
 0xfa3   : > { %2941 = vmatpush.msra.mxu0 %v4393_v17 }
 0xfa8   : > { %v3027_v62 = vpop.permute.xlu0 %3026 }
 0xfa9   : > { %4272 = vmatpush.xpose.msk.msrb.mxu0 %vm646_vm7, %v3027_v62 }
 0xfc7   : > { %v2543_v12 = vpop.xlane.xlu1 %2542 }
 0xfc8   : > { %4522 = vrcp.f32 %v2543_v12  ;;  %v2600_v22 = vand.u32 2147483648, %v2543_v12  ;;  %v2598_v49 = vand.u32 2147483647, %v2543_v12  ;;  %vm2594_vm12 = vweird.f32 %v2543_v12 }
 0xfca   : > { %v2601_v18 = vor.u32 1.1754944e-38, %v2600_v22  ;;  %vm2599_vm14 = vcmp.eq.f32.partialorder %v2598_v49, 8.507059e+37 }
 0xfce   : > { %v4523_v47 = vpop.eup %4522 }
 0xfcf   : > { %v2590_v32 = vmul.f32 %v4523_v47, %v2543_v12  ;;  %vm2595_vm11 = vweird.f32 %v4523_v47 }
 0xfd0   : > { %vm2596_vm13 = vmor %vm2594_vm12, %vm2595_vm11 }
 0xfd1   : > { %v2591_v5 = vsub.f32 1.0, %v2590_v32 }
 0xfd3   : > { %v2592_v23 = vmul.f32 %v4523_v47, %v2591_v5 }
 0xfd5   : > { %v2593_v44 = vadd.f32 %v4523_v47, %v2592_v23 }
 0xfd7   : > { %v2597_v51 = vsel %vm2596_vm13, %v4523_v47, %v2593_v44 }
 0xfd8   : > { %v2602_v24 = vsel %vm2599_vm14, %v2601_v18, %v2597_v51  ;;  %v4399_v51 = vpack.i.bf16 %v5262_v25, %v5258_v3 }
 0xfd9   : > { %v2603_v28 = vmul.f32 %v5317_v46, %v2602_v24 }
 0xfda   : > { %v2537_v15 = vpop.xlane.xlu2 %2536 }
 0xfdb   : > { %4524 = vrcp.f32 %v2537_v15  ;;  %4259 = vmatmul.msk.f32.vlgmr.msra.gmra.mxu3 %vm646_vm7, %v2603_v28  ;;  %v2570_v37 = vand.u32 2147483648, %v2537_v15  ;;  %v2568_v27 = vand.u32 2147483647, %v2537_v15  ;;  %vm2564_vm2 = vweird.f32 %v2537_v15 }
 0xfdd   : > { %v2571_v46 = vor.u32 1.1754944e-38, %v2570_v37  ;;  %vm2569_vm5 = vcmp.eq.f32.partialorder %v2568_v27, 8.507059e+37 }
 0xfdf   : > { %v2793_v35 = vpop.permute.xlu1 %2792 }
 0xfe1   : > { %v4525_v31 = vpop.eup %4524 }
 0xfe2   : > { %v2560_v33 = vmul.f32 %v4525_v31, %v2537_v15  ;;  %v2540_v14 = vpop.xlane.xlu2 %2539  ;;  %vm2565_vm15 = vweird.f32 %v4525_v31 }
 0xfe3   : > { %4526 = vrcp.f32 %v2540_v14  ;;  %4267 = vmatmul.msk.f32.vlgmr.msrb.gmra.mxu3 %vm646_vm7, %v2793_v35  ;;  %vm2566_vm4 = vmor %vm2564_vm2, %vm2565_vm15  ;;  %v2585_v57 = vand.u32 2147483648, %v2540_v14  ;;  %v2583_v45 = vand.u32 2147483647, %v2540_v14  ;;  %vm2579_vm9 = vweird.f32 %v2540_v14 }
 0xfe4   : > { %v2561_v36 = vsub.f32 1.0, %v2560_v33 }
 0xfe5   : > { %v2586_v60 = vor.u32 1.1754944e-38, %v2585_v57  ;;  %vm2584_vm11 = vcmp.eq.f32.partialorder %v2583_v45, 8.507059e+37 }
 0xfe6   : > { %v2562_v41 = vmul.f32 %v4525_v31, %v2561_v36 }
 0xfe7   : > { %v3083_v61 = vpop.permute.xlu1 %3082 }
 0xfe8   : > { %v2563_v43 = vadd.f32 %v4525_v31, %v2562_v41 }
 0xfe9   : > { %v4527_v48 = vpop.eup %4526 }
 0xfea   : > { %v2567_v50 = vsel %vm2566_vm4, %v4525_v31, %v2563_v43  ;;  %v2575_v29 = vmul.f32 %v4527_v48, %v2540_v14  ;;  %v2739_v52 = vpop.permute.xlu2 %2738  ;;  %vm2580_vm8 = vweird.f32 %v4527_v48 }
 0xfeb   : > { %v2572_v53 = vsel %vm2569_vm5, %v2571_v46, %v2567_v50  ;;  %4262 = vmatpush.xpose.msk.msra.mxu1 %vm646_vm7, %v2739_v52  ;;  %vm2581_vm10 = vmor %vm2579_vm9, %vm2580_vm8  ;;  %v4404_v52 = vpack.i.bf16 %v5271_v7, %v5273_v4 }
 0xfec   : > { %v2576_v54 = vsub.f32 1.0, %v2575_v29  ;;  %v2573_v30 = vmul.f32 %v5321_v56, %v2572_v53  ;;  %v4392_v56 = vunpack.i.l.bf16 %v5342_v16 }
 0xfee   : > { %v2577_v58 = vmul.f32 %v4527_v48, %v2576_v54  ;;  %4257 = vmatmul.msk.f32.vlgmr.msrb.gmra.mxu1 %vm646_vm7, %v2573_v30 }
 0xff0   : > { %v2578_v21 = vadd.f32 %v4527_v48, %v2577_v58 }
 0xff2   : > { %v2582_v0 = vsel %vm2581_vm10, %v4527_v48, %v2578_v21  ;;  %v4396_v1 = vpop.permute.xlu2 %4395 }
 0xff3   : > { %v2587_v2 = vsel %vm2584_vm11, %v2586_v60, %v2582_v0  ;;  %v4398_v26 = vunpack.i.h.bf16 %v4396_v1  ;;  %v4397_v40 = vunpack.i.l.bf16 %v4396_v1 }
 0xff4   : > { %v2588_v38 = vmul.f32 %v5325_v59, %v2587_v2 }
 0xff5   : > { %2967 = vmatpush.msrb.mxu1 %v4398_v26  ;;  %3019 = vmatpush.msra.mxu3 %v4397_v40 }
 0xff6   : > { %4258 = vmatmul.msk.f32.vlgmr.msra.gmra.mxu2 %vm646_vm7, %v2588_v38  ;;  %4263 = vmatmul.msk.f32.vlgmr.msra.gmra.mxu1 %vm646_vm7, %v5339_v13 }
 0xff7   : > { %2993 = vmatpush.msra.mxu2 %v4392_v56 }
 0xffe   : > { %4265 = vmatmul.msk.f32.vlgmr.msrb.gmra.mxu2 %vm646_vm7, %v5299_v19 }
 0xfff   : > { %4276 = vmatpush.xpose.msk.msrb.mxu2 %vm646_vm7, %v3083_v61 }
0x1016   : > { %v5361_v42 = vpop.f32.mrf.mxu0 }
0x101e   : > { %v2733_v6 = vpop.f32.mrf.mxu0 }
0x101f   : > { %v2820_v59 = vmul.f32 0.35355338, %v2733_v6 }
0x1021   : > { %v2824_v8 = vsel %vm646_vm7, %v2820_v59, -inf }
0x1022   : > { %2825 = vmax.xlane.f32.xlu2 %v2824_v8 }
0x103a   : > { %3080 = vrot.lane.b32.xlu2 %v5262_v25, %s5763_s21 }
0x105e   : > { %v5366_v9 = vpop.f32.mrf.mxu3 }
0x1066   : > { %v2817_v10 = vpop.f32.mrf.mxu3 }
0x1067   : > { %v2823_v11 = vmul.f32 0.35355338, %v2817_v10 }
0x1069   : > { %v2833_v13 = vsel %vm646_vm7, %v2823_v11, -inf }
0x106a   : > { %2834 = vmax.xlane.f32.xlu0 %v2833_v13 }
0x106b   : > { %v5369_v19 = vpop.f32.mrf.mxu1 }
0x1073   : > { %v2761_v16 = vpop.f32.mrf.mxu1 }
0x1074   : > { %v2821_v17 = vmul.f32 0.35355338, %v2761_v16 }
0x1076   : > { %v2827_v62 = vsel %vm646_vm7, %v2821_v17, -inf }
0x1077   : > { %2828 = vmax.xlane.f32.xlu1 %v2827_v62 }
0x1079   : > { %v5372_v12 = vpop.f32.mrf.mxu2 }
0x107e   : > { %3110 = vrot.lane.b32.xlu0 %v5271_v7, %s5762_s22 }
0x1081   : > { %v2789_v47 = vpop.f32.mrf.mxu2 }
0x1082   : > { %v2822_v32 = vmul.f32 0.35355338, %v2789_v47 }
0x1084   : > { %v2830_v5 = vsel %vm646_vm7, %v2822_v32, -inf }
0x1085   : > { %2831 = vmax.xlane.f32.xlu1 %v2830_v5 }
0x1095   : > { %v2826_v22 = vpop.xlane.xlu2 %2825 }
0x1096   : > { %v2836_v23 = vsub.f32 %v2820_v59, %v2826_v22 }
0x1098   : > { %v2840_v49 = vmul.f32 1.442695, %v2836_v23 }
0x109a   : > { %4528 = vpow2.f32 %v2840_v49 }
0x109d   : > { %v5416_v59 = vpop.permute.xlu2 %3080 }
0x109e   : > { %3024 = vrot.lane.b32.xlu1 %v5258_v3, %s5763_s21 }
0x10a0   : > { %v4529_v44 = vpop.eup %4528 }
0x10a1   : > { %v2848_v18 = vsel %vm646_vm7, %v4529_v44, 0.0 }
0x10a8   : > { %2849 = vadd.xlane.f32.xlu0 %v2848_v18 }
0x10bc   : > { %3052 = vrot.lane.b32.xlu0 %v5273_v4, %s5763_s21 }
0x10c4   : > { %4400 = vrot.lane.b32.xlu0 %v4399_v51, %s5764_s23 }
0x10cc   : > { %3340 = vrot.lane.b32.xlu0 %v5258_v3, %s5765_s27 }
0x10dd   : > { %v2835_v24 = vpop.xlane.xlu0 %2834 }
0x10de   : > { %v2839_v28 = vsub.f32 %v2823_v11, %v2835_v24 }
0x10e0   : > { %v2846_v15 = vmul.f32 1.442695, %v2839_v28 }
0x10e2   : > { %4530 = vpow2.f32 %v2846_v15 }
0x10e8   : > { %v5387_v31 = vpop.eup %4530 }
0x10e9   : > { %v2857_v33 = vsel %vm646_vm7, %v5387_v31, 0.0 }
0x10ea   : > { %v2829_v35 = vpop.xlane.xlu1 %2828  ;;  %2858 = vadd.xlane.f32.xlu1 %v2857_v33 }
0x10eb   : > { %v2837_v14 = vsub.f32 %v2821_v17, %v2829_v35 }
0x10ed   : > { %v2842_v36 = vmul.f32 1.442695, %v2837_v14 }
0x10ef   : > { %4532 = vpow2.f32 %v2842_v36 }
0x10f0   : > { %v3111_v37 = vpop.permute.xlu0 %3110 }
0x10f1   : > { %4278 = vmatpush.xpose.msk.msrb.mxu3 %vm646_vm7, %v3111_v37 }
0x10f5   : > { %v5392_v41 = vpop.eup %4532 }
0x10f6   : > { %v2851_v27 = vsel %vm646_vm7, %v5392_v41, 0.0 }
0x10f7   : > { %2852 = vadd.xlane.f32.xlu2 %v2851_v27 }
0x10f8   : > { %v2832_v43 = vpop.xlane.xlu1 %2831 }
0x10f9   : > { %v2838_v48 = vsub.f32 %v2822_v32, %v2832_v43 }
0x10fb   : > { %v2844_v46 = vmul.f32 1.442695, %v2838_v48 }
0x10fd   : > { %4534 = vpow2.f32 %v2844_v46 }
0x1103   : > { %v5396_v50 = vpop.eup %4534  ;;  %3108 = vrot.lane.b32.xlu1 %v5271_v7, %s5763_s21 }
0x1104   : > { %v2854_v29 = vsel %vm646_vm7, %v5396_v50, 0.0 }
0x1105   : > { %2855 = vadd.xlane.f32.xlu2 %v2854_v29 }
0x110b   : > { %4405 = vrot.lane.b32.xlu1 %v4404_v52, %s5764_s23 }
0x1110   : > { %v3025_v38 = vpop.permute.xlu1 %3024 }
0x111b   : > { %v2850_v53 = vpop.xlane.xlu0 %2849 }
0x111c   : > { %4536 = vrcp.f32 %v2850_v53  ;;  %v2871_v58 = vand.u32 2147483648, %v2850_v53  ;;  %v2869_v21 = vand.u32 2147483647, %v2850_v53  ;;  %vm2865_vm13 = vweird.f32 %v2850_v53 }
0x111d   : > { %3054 = vrot.lane.b32.xlu2 %v5273_v4, %s5762_s22 }
0x111e   : > { %v2872_v0 = vor.u32 1.1754944e-38, %v2871_v58  ;;  %vm2870_vm15 = vcmp.eq.f32.partialorder %v2869_v21, 8.507059e+37 }
0x1122   : > { %v4537_v54 = vpop.eup %4536 }
0x1123   : > { %v2861_v30 = vmul.f32 %v4537_v54, %v2850_v53  ;;  %vm2866_vm12 = vweird.f32 %v4537_v54 }
0x1124   : > { %vm2867_vm14 = vmor %vm2865_vm13, %vm2866_vm12 }
0x1125   : > { %v2862_v57 = vsub.f32 1.0, %v2861_v30  ;;  %3342 = vrot.lane.b32.xlu2 %v5258_v3, %s5766_s24 }
0x1127   : > { %v2863_v45 = vmul.f32 %v4537_v54, %v2862_v57 }
0x1129   : > { %v2864_v60 = vadd.f32 %v4537_v54, %v2863_v45 }
0x112b   : > { %v2868_v1 = vsel %vm2867_vm14, %v4537_v54, %v2864_v60 }
0x112c   : > { %v2873_v2 = vsel %vm2870_vm15, %v2872_v0, %v2868_v1 }
0x112d   : > { %v2874_v26 = vmul.f32 %v4529_v44, %v2873_v2 }
0x112e   : > { %v5409_v40 = vpop.permute.xlu0 %3052 }
0x112f   : > { %4268 = vmatmul.msk.f32.vlgmr.msra.gmra.mxu0 %vm646_vm7, %v2874_v26 }
0x1136   : > { %v5412_v56 = vpop.permute.xlu0 %4400 }
0x1137   : > { %v4402_v61 = vunpack.i.l.bf16 %v5412_v56  ;;  %4273 = vmatmul.msk.f32.vlgmr.msrb.gmra.mxu0 %vm646_vm7, %v3025_v38  ;;  %v4403_v1 = vunpack.i.h.bf16 %v5412_v56 }
0x1139   : > { %3257 = vmatpush.msra.mxu0 %v4402_v61 }
0x115d   : > { %v2859_v6 = vpop.xlane.xlu1 %2858 }
0x115e   : > { %4538 = vrcp.f32 %v2859_v6  ;;  %v2916_v13 = vand.u32 2147483648, %v2859_v6  ;;  %v2914_v17 = vand.u32 2147483647, %v2859_v6  ;;  %vm2910_vm4 = vweird.f32 %v2859_v6 }
0x1160   : > { %v2917_v32 = vor.u32 1.1754944e-38, %v2916_v13  ;;  %vm2915_vm8 = vcmp.eq.f32.partialorder %v2914_v17, 8.507059e+37 }
0x1164   : > { %v4539_v8 = vpop.eup %4538 }
0x1165   : > { %v2906_v10 = vmul.f32 %v4539_v8, %v2859_v6  ;;  %vm2911_vm2 = vweird.f32 %v4539_v8 }
0x1166   : > { %vm2912_vm5 = vmor %vm2910_vm4, %vm2911_vm2 }
0x1167   : > { %v2907_v11 = vsub.f32 1.0, %v2906_v10 }
0x1169   : > { %v2908_v16 = vmul.f32 %v4539_v8, %v2907_v11 }
0x116a   : > { %v2853_v62 = vpop.xlane.xlu2 %2852 }
0x116b   : > { %v2909_v47 = vadd.f32 %v4539_v8, %v2908_v16  ;;  %4540 = vrcp.f32 %v2853_v62  ;;  %v2886_v51 = vand.u32 2147483648, %v2853_v62  ;;  %v2884_v15 = vand.u32 2147483647, %v2853_v62 }
0x116c   : > { %vm2880_vm10 = vweird.f32 %v2853_v62 }
0x116d   : > { %v2913_v5 = vsel %vm2912_vm5, %v4539_v8, %v2909_v47  ;;  %v2887_v14 = vor.u32 1.1754944e-38, %v2886_v51  ;;  %vm2885_vm12 = vcmp.eq.f32.partialorder %v2884_v15, 8.507059e+37 }
0x116e   : > { %v2918_v22 = vsel %vm2915_vm8, %v2917_v32, %v2913_v5 }
0x116f   : > { %v2919_v23 = vmul.f32 %v5387_v31, %v2918_v22 }
0x1171   : > { %v4541_v49 = vpop.eup %4540  ;;  %4271 = vmatmul.msk.f32.vlgmr.msra.gmra.mxu3 %vm646_vm7, %v2919_v23 }
0x1172   : > { %v2876_v44 = vmul.f32 %v4541_v49, %v2853_v62  ;;  %vm2881_vm9 = vweird.f32 %v4541_v49 }
0x1173   : > { %vm2882_vm11 = vmor %vm2880_vm10, %vm2881_vm9 }
0x1174   : > { %v2877_v18 = vsub.f32 1.0, %v2876_v44 }
0x1175   : > { %v3109_v24 = vpop.permute.xlu1 %3108 }
0x1176   : > { %v2878_v28 = vmul.f32 %v4541_v49, %v2877_v18 }
0x1178   : > { %v2879_v33 = vadd.f32 %v4541_v49, %v2878_v28  ;;  %v2856_v35 = vpop.xlane.xlu2 %2855 }
0x1179   : > { %4542 = vrcp.f32 %v2856_v35  ;;  %4279 = vmatmul.msk.f32.vlgmr.msrb.gmra.mxu3 %vm646_vm7, %v3109_v24  ;;  %v2901_v54 = vand.u32 2147483648, %v2856_v35  ;;  %v2899_v57 = vand.u32 2147483647, %v2856_v35  ;;  %vm2895_vm14 = vweird.f32 %v2856_v35 }
0x117a   : > { %v2883_v36 = vsel %vm2882_vm11, %v4541_v49, %v2879_v33  ;;  %v3341_v49 = vpop.permute.xlu0 %3340 }
0x117b   : > { %v2888_v31 = vsel %vm2885_vm12, %v2887_v14, %v2883_v36  ;;  %vm2900_vm2 = vcmp.eq.f32.partialorder %v2899_v57, 8.507059e+37 }
0x117c   : > { %v2889_v37 = vmul.f32 %v5392_v41, %v2888_v31  ;;  %v2902_v41 = vor.u32 1.1754944e-38, %v2901_v54 }
0x117d   : > { %v4406_v27 = vpop.permute.xlu1 %4405 }
0x117e   : > { %v4408_v43 = vunpack.i.h.bf16 %v4406_v27  ;;  %v4407_v48 = vunpack.i.l.bf16 %v4406_v27  ;;  %4269 = vmatmul.msk.f32.vlgmr.msrb.gmra.mxu1 %vm646_vm7, %v2889_v37 }
0x117f   : > { %v4543_v46 = vpop.eup %4542 }
0x1180   : > { %v2891_v29 = vmul.f32 %v4543_v46, %v2856_v35  ;;  %v3055_v52 = vpop.permute.xlu2 %3054  ;;  %3335 = vmatpush.msra.mxu3 %v4408_v43  ;;  %vm2896_vm13 = vweird.f32 %v4543_v46 }
0x1181   : > { %4274 = vmatpush.xpose.msk.msra.mxu1 %vm646_vm7, %v3055_v52  ;;  %vm2897_vm15 = vmor %vm2895_vm14, %vm2896_vm13 }
0x1182   : > { %v2892_v53 = vsub.f32 1.0, %v2891_v29 }
0x1184   : > { %v2893_v30 = vmul.f32 %v4543_v46, %v2892_v53 }
0x1185   : > { %3283 = vmatpush.msrb.mxu1 %v4407_v48 }
0x1186   : > { %v2894_v58 = vadd.f32 %v4543_v46, %v2893_v30  ;;  %4275 = vmatmul.msk.f32.vlgmr.msra.gmra.mxu1 %vm646_vm7, %v5409_v40 }
0x1188   : > { %v2898_v45 = vsel %vm2897_vm15, %v4543_v46, %v2894_v58  ;;  %v3343_v21 = vpop.permute.xlu2 %3342 }
0x1189   : > { %v2903_v60 = vsel %vm2900_vm2, %v2902_v41, %v2898_v45  ;;  %4284 = vmatpush.xpose.msk.msrb.mxu0 %vm646_vm7, %v3343_v21 }
0x118a   : > { %v2904_v0 = vmul.f32 %v5396_v50, %v2903_v60 }
0x118c   : > { %4270 = vmatmul.msk.f32.vlgmr.msra.gmra.mxu2 %vm646_vm7, %v2904_v0 }
0x118d   : > { %3309 = vmatpush.msra.mxu2 %v4403_v1 }
0x1194   : > { %4277 = vmatmul.msk.f32.vlgmr.msrb.gmra.mxu2 %vm646_vm7, %v5416_v59 }
0x11ac   : > { %v5432_v2 = vpop.f32.mrf.mxu0 }
0x11b4   : > { %v3049_v26 = vpop.f32.mrf.mxu0 }
0x11b5   : > { %v3136_v40 = vmul.f32 0.35355338, %v3049_v26 }
0x11b7   : > { %v3140_v38 = vsel %vm646_vm7, %v3136_v40, -inf }
0x11b8   : > { %3141 = vmax.xlane.f32.xlu2 %v3140_v38 }
0x11f4   : > { %v5435_v61 = vpop.f32.mrf.mxu3 }
0x11fb   : > { %v5437_v6 = vpop.f32.mrf.mxu1 }
0x11fc   : > { %v3133_v50 = vpop.f32.mrf.mxu3 }
0x11fd   : > { %v3139_v8 = vmul.f32 0.35355338, %v3133_v50 }
0x11ff   : > { %v3149_v56 = vsel %vm646_vm7, %v3139_v8, -inf }
0x1200   : > { %3150 = vmax.xlane.f32.xlu2 %v3149_v56 }
0x1203   : > { %v3077_v10 = vpop.f32.mrf.mxu1 }
0x1204   : > { %v3137_v11 = vmul.f32 0.35355338, %v3077_v10 }
0x1206   : > { %v3143_v59 = vsel %vm646_vm7, %v3137_v11, -inf }
0x1207   : > { %3144 = vmax.xlane.f32.xlu0 %v3143_v59 }
0x120f   : > { %v5441_v13 = vpop.f32.mrf.mxu2 }
0x1217   : > { %v3105_v16 = vpop.f32.mrf.mxu2 }
0x1218   : > { %v3138_v17 = vmul.f32 0.35355338, %v3105_v16  ;;  %3396 = vrot.lane.b32.xlu2 %v5262_v25, %s5765_s27 }
0x121a   : > { %v3146_v62 = vsel %vm646_vm7, %v3138_v17, -inf }
0x121b   : > { %3147 = vmax.xlane.f32.xlu1 %v3146_v62  ;;  %3398 = vrot.lane.b32.xlu0 %v5262_v25, %s5766_s24 }
0x122b   : > { %v3142_v47 = vpop.xlane.xlu2 %3141 }
0x122c   : > { %v3152_v32 = vsub.f32 %v3136_v40, %v3142_v47 }
0x122e   : > { %v3156_v5 = vmul.f32 1.442695, %v3152_v32 }
0x1230   : > { %4544 = vpow2.f32 %v3156_v5 }
0x1234   : > { %3370 = vrot.lane.b32.xlu1 %v5273_v4, %s5766_s24 }
0x1236   : > { %v4545_v22 = vpop.eup %4544 }
0x1237   : > { %v3164_v23 = vsel %vm646_vm7, %v4545_v22, 0.0 }
0x125e   : > { %3165 = vadd.xlane.f32.xlu1 %v3164_v23 }
0x1273   : > { %v3151_v44 = vpop.xlane.xlu2 %3150 }
0x1274   : > { %v3155_v18 = vsub.f32 %v3139_v8, %v3151_v44 }
0x1276   : > { %v3162_v51 = vmul.f32 1.442695, %v3155_v18 }
0x1278   : > { %4546 = vpow2.f32 %v3162_v51 }
0x127a   : > { %v3145_v24 = vpop.xlane.xlu0 %3144 }
0x127b   : > { %v3153_v28 = vsub.f32 %v3137_v11, %v3145_v24  ;;  %v3397_v26 = vpop.permute.xlu2 %3396 }
0x127d   : > { %v3158_v15 = vmul.f32 1.442695, %v3153_v28 }
0x127e   : > { %v5451_v33 = vpop.eup %4546 }
0x127f   : > { %4548 = vpow2.f32 %v3158_v15  ;;  %v3173_v35 = vsel %vm646_vm7, %v5451_v33, 0.0 }
0x1280   : > { %3174 = vadd.xlane.f32.xlu1 %v3173_v35 }
0x1285   : > { %v5455_v14 = vpop.eup %4548 }
0x1286   : > { %v3167_v36 = vsel %vm646_vm7, %v5455_v14, 0.0 }
0x1287   : > { %3168 = vadd.xlane.f32.xlu2 %v3167_v36 }
0x128d   : > { %v3399_v31 = vpop.permute.xlu0 %3398 }
0x128e   : > { %v3148_v37 = vpop.xlane.xlu1 %3147  ;;  %4288 = vmatpush.xpose.msk.msrb.mxu2 %vm646_vm7, %v3399_v31 }
0x128f   : > { %v3154_v27 = vsub.f32 %v3138_v17, %v3148_v37 }
0x1291   : > { %v3160_v43 = vmul.f32 1.442695, %v3154_v27 }
0x1293   : > { %4550 = vpow2.f32 %v3160_v43 }
0x1299   : > { %v5460_v48 = vpop.eup %4550  ;;  %3424 = vrot.lane.b32.xlu1 %v5271_v7, %s5765_s27 }
0x129a   : > { %v3170_v46 = vsel %vm646_vm7, %v5460_v48, 0.0 }
0x129b   : > { %3171 = vadd.xlane.f32.xlu0 %v3170_v46 }
0x129f   : > { %3426 = vrot.lane.b32.xlu2 %v5271_v7, %s5766_s24 }
0x12a6   : > { %v3371_v29 = vpop.permute.xlu1 %3370 }
0x12a7   : > { %4286 = vmatpush.xpose.msk.msra.mxu1 %vm646_vm7, %v3371_v29 }
0x12af   : > { %3368 = vrot.lane.b32.xlu0 %v5273_v4, %s5765_s27  ;;  %s5772_s27 = sshll.u32 %s5774_s20, 3 }
0x12d1   : > { %v3166_v52 = vpop.xlane.xlu1 %3165 }
0x12d2   : > { %4552 = vrcp.f32 %v3166_v52  ;;  %v3187_v57 = vand.u32 2147483648, %v3166_v52  ;;  %v3185_v41 = vand.u32 2147483647, %v3166_v52  ;;  %vm3181_vm5 = vweird.f32 %v3166_v52 }
0x12d4   : > { %v3188_v21 = vor.u32 1.1754944e-38, %v3187_v57  ;;  %vm3186_vm9 = vcmp.eq.f32.partialorder %v3185_v41, 8.507059e+37 }
0x12d8   : > { %v4553_v53 = vpop.eup %4552 }
0x12d9   : > { %v3177_v54 = vmul.f32 %v4553_v53, %v3166_v52  ;;  %vm3182_vm4 = vweird.f32 %v4553_v53 }
0x12da   : > { %vm3183_vm8 = vmor %vm3181_vm5, %vm3182_vm4 }
0x12db   : > { %v3178_v30 = vsub.f32 1.0, %v3177_v54 }
0x12dd   : > { %v3179_v58 = vmul.f32 %v4553_v53, %v3178_v30 }
0x12df   : > { %v3180_v45 = vadd.f32 %v4553_v53, %v3179_v58 }
0x12e1   : > { %v3184_v60 = vsel %vm3183_vm8, %v4553_v53, %v3180_v45 }
0x12e2   : > { %v3189_v0 = vsel %vm3186_vm9, %v3188_v21, %v3184_v60 }
0x12e3   : > { %v3190_v1 = vmul.f32 %v4545_v22, %v3189_v0 }
0x12e5   : > { %4280 = vmatmul.msk.f32.vlgmr.msra.gmra.mxu0 %vm646_vm7, %v3190_v1 }
0x12ed   : > { %4285 = vmatmul.msk.f32.vlgmr.msrb.gmra.mxu0 %vm646_vm7, %v3341_v49 }
0x12f3   : > { %v3175_v40 = vpop.xlane.xlu1 %3174 }
0x12f4   : > { %4554 = vrcp.f32 %v3175_v40  ;;  %v3232_v10 = vand.u32 2147483648, %v3175_v40  ;;  %v3230_v59 = vand.u32 2147483647, %v3175_v40  ;;  %vm3226_vm11 = vweird.f32 %v3175_v40 }
0x12f6   : > { %v3233_v62 = vor.u32 1.1754944e-38, %v3232_v10  ;;  %vm3231_vm13 = vcmp.eq.f32.partialorder %v3230_v59, 8.507059e+37 }
0x12fa   : > { %v4555_v38 = vpop.eup %4554  ;;  %v3169_v50 = vpop.xlane.xlu2 %3168 }
0x12fb   : > { %v3222_v8 = vmul.f32 %v4555_v38, %v3175_v40  ;;  %4556 = vrcp.f32 %v3169_v50  ;;  %vm3227_vm10 = vweird.f32 %v4555_v38  ;;  %v3202_v49 = vand.u32 2147483648, %v3169_v50 }
0x12fc   : > { %vm3228_vm12 = vmor %vm3226_vm11, %vm3227_vm10  ;;  %v3200_v51 = vand.u32 2147483647, %v3169_v50  ;;  %vm3196_vm15 = vweird.f32 %v3169_v50 }
0x12fd   : > { %v3223_v56 = vsub.f32 1.0, %v3222_v8  ;;  %v3203_v28 = vor.u32 1.1754944e-38, %v3202_v49 }
0x12fe   : > { %vm3201_vm4 = vcmp.eq.f32.partialorder %v3200_v51, 8.507059e+37 }
0x12ff   : > { %v3224_v11 = vmul.f32 %v4555_v38, %v3223_v56 }
0x1301   : > { %v4557_v16 = vpop.eup %4556  ;;  %v3225_v17 = vadd.f32 %v4555_v38, %v3224_v11 }
0x1302   : > { %v3192_v47 = vmul.f32 %v4557_v16, %v3169_v50  ;;  %v3427_v32 = vpop.permute.xlu2 %3426  ;;  %vm3197_vm14 = vweird.f32 %v4557_v16 }
0x1303   : > { %v3229_v5 = vsel %vm3228_vm12, %v4555_v38, %v3225_v17  ;;  %4290 = vmatpush.xpose.msk.msrb.mxu3 %vm646_vm7, %v3427_v32  ;;  %vm3198_vm2 = vmor %vm3196_vm15, %vm3197_vm14 }
0x1304   : > { %v3234_v22 = vsel %vm3231_vm13, %v3233_v62, %v3229_v5  ;;  %v3193_v23 = vsub.f32 1.0, %v3192_v47 }
0x1305   : > { %v3235_v44 = vmul.f32 %v5451_v33, %v3234_v22 }
0x1306   : > { %v3194_v18 = vmul.f32 %v4557_v16, %v3193_v23 }
0x1307   : > { %4283 = vmatmul.msk.f32.vlgmr.msra.gmra.mxu3 %vm646_vm7, %v3235_v44 }
0x1308   : > { %v3195_v24 = vadd.f32 %v4557_v16, %v3194_v18 }
0x130a   : > { %v3199_v15 = vsel %vm3198_vm2, %v4557_v16, %v3195_v24 }
0x130b   : > { %v3204_v35 = vsel %vm3201_vm4, %v3203_v28, %v3199_v15  ;;  %v3425_v31 = vpop.permute.xlu1 %3424 }
0x130c   : > { %v3205_v36 = vmul.f32 %v5455_v14, %v3204_v35 }
0x130e   : > { %v3172_v37 = vpop.xlane.xlu0 %3171  ;;  %4281 = vmatmul.msk.f32.vlgmr.msrb.gmra.mxu1 %vm646_vm7, %v3205_v36 }
0x130f   : > { %4558 = vrcp.f32 %v3172_v37  ;;  %4291 = vmatmul.msk.f32.vlgmr.msrb.gmra.mxu3 %vm646_vm7, %v3425_v31  ;;  %v3217_v46 = vand.u32 2147483648, %v3172_v37  ;;  %v3215_v52 = vand.u32 2147483647, %v3172_v37  ;;  %vm3211_vm8 = vweird.f32 %v3172_v37 }
0x1311   : > { %v3218_v54 = vor.u32 1.1754944e-38, %v3217_v46  ;;  %vm3216_vm10 = vcmp.eq.f32.partialorder %v3215_v52, 8.507059e+37 }
0x1315   : > { %v4559_v33 = vpop.eup %4558 }
0x1316   : > { %v3207_v27 = vmul.f32 %v4559_v33, %v3172_v37  ;;  %vm3212_vm5 = vweird.f32 %v4559_v33 }
0x1317   : > { %vm3213_vm9 = vmor %vm3211_vm8, %vm3212_vm5 }
0x1318   : > { %v3208_v43 = vsub.f32 1.0, %v3207_v27  ;;  %v4409_v27 = vpack.i.bf16 %v5262_v25, %v5273_v4 }
0x131a   : > { %v3209_v29 = vmul.f32 %v4559_v33, %v3208_v43 }
0x131c   : > { %v3210_v53 = vadd.f32 %v4559_v33, %v3209_v29 }
0x131e   : > { %v3214_v30 = vsel %vm3213_vm9, %v4559_v33, %v3210_v53 }
0x131f   : > { %v3219_v14 = vsel %vm3216_vm10, %v3218_v54, %v3214_v30 }
0x1320   : > { %v3220_v57 = vmul.f32 %v5460_v48, %v3219_v14 }
0x1321   : > { %v3369_v58 = vpop.permute.xlu0 %3368 }
0x1322   : > { %4282 = vmatmul.msk.f32.vlgmr.msra.gmra.mxu2 %vm646_vm7, %v3220_v57  ;;  %4287 = vmatmul.msk.f32.vlgmr.msra.gmra.mxu1 %vm646_vm7, %v3369_v58 }
0x132a   : > { %4289 = vmatmul.msk.f32.vlgmr.msrb.gmra.mxu2 %vm646_vm7, %v3397_v26 }
0x1362   : > { %v3259_v41 = vpop.f32.mrf.mxu0 }
0x136a   : > { %v3365_v45 = vpop.f32.mrf.mxu0 }
0x136b   : > { %v3452_v21 = vmul.f32 0.35355338, %v3365_v45 }
0x136d   : > { %v3456_v60 = vsel %vm646_vm7, %v3452_v21, -inf }
0x136e   : > { %3457 = vmax.xlane.f32.xlu0 %v3456_v60 }
0x138a   : > { %v3337_v1 = vpop.f32.mrf.mxu3 }
0x138b   : > { %v3285_v0 = vpop.f32.mrf.mxu1 }
0x1392   : > { %v3449_v48 = vpop.f32.mrf.mxu3 }
0x1393   : > { %v3455_v56 = vmul.f32 0.35355338, %v3449_v48 }
0x1395   : > { %v3465_v10 = vsel %vm646_vm7, %v3455_v56, -inf }
0x139f   : > { %v3393_v40 = vpop.f32.mrf.mxu1 }
0x13a0   : > { %v3453_v38 = vmul.f32 0.35355338, %v3393_v40 }
0x13a2   : > { %v3459_v50 = vsel %vm646_vm7, %v3453_v38, -inf }
0x13a3   : > { %3460 = vmax.xlane.f32.xlu2 %v3459_v50 }
0x13a5   : > { %v3311_v8 = vpop.f32.mrf.mxu2 }
0x13ab   : > { %3466 = vmax.xlane.f32.xlu2 %v3465_v10 }
0x13ad   : > { %v3421_v26 = vpop.f32.mrf.mxu2 }
0x13ae   : > { %v3454_v11 = vmul.f32 0.35355338, %v3421_v26 }
0x13b0   : > { %v3462_v59 = vsel %vm646_vm7, %v3454_v11, -inf }
0x13b1   : > { %3463 = vmax.xlane.f32.xlu1 %v3462_v59 }
0x13e1   : > { %v3458_v16 = vpop.xlane.xlu0 %3457 }
0x13e2   : > { %v3468_v17 = vsub.f32 %v3452_v21, %v3458_v16 }
0x13e4   : > { %v3472_v62 = vmul.f32 1.442695, %v3468_v17 }
0x13e6   : > { %4560 = vpow2.f32 %v3472_v62 }
0x13ec   : > { %v5487_v47 = vpop.eup %4560 }
0x13ed   : > { %v3480_v32 = vsel %vm646_vm7, %v5487_v47, 0.0 }
0x13ee   : > { %3481 = vadd.xlane.f32.xlu0 %v3480_v32 }
0x1416   : > { %v3461_v5 = vpop.xlane.xlu2 %3460 }
0x1417   : > { %v3469_v22 = vsub.f32 %v3453_v38, %v3461_v5 }
0x1419   : > { %v3474_v23 = vmul.f32 1.442695, %v3469_v22 }
0x141b   : > { %4562 = vpow2.f32 %v3474_v23 }
0x141e   : > { %v3467_v49 = vpop.xlane.xlu2 %3466 }
0x141f   : > { %v3471_v44 = vsub.f32 %v3455_v56, %v3467_v49 }
0x1421   : > { %v5491_v18 = vpop.eup %4562  ;;  %v3478_v51 = vmul.f32 1.442695, %v3471_v44 }
0x1422   : > { %v3483_v24 = vsel %vm646_vm7, %v5491_v18, 0.0 }
0x1423   : > { %4564 = vpow2.f32 %v3478_v51  ;;  %3484 = vadd.xlane.f32.xlu1 %v3483_v24 }
0x1424   : > { %v3464_v28 = vpop.xlane.xlu1 %3463 }
0x1425   : > { %v3470_v15 = vsub.f32 %v3454_v11, %v3464_v28 }
0x1427   : > { %v3476_v35 = vmul.f32 1.442695, %v3470_v15 }
0x1429   : > { %v5495_v36 = vpop.eup %4564  ;;  %4566 = vpow2.f32 %v3476_v35 }
0x142a   : > { %v3489_v31 = vsel %vm646_vm7, %v5495_v36, 0.0 }
0x142b   : > { %3490 = vadd.xlane.f32.xlu0 %v3489_v31 }
0x142f   : > { %v5499_v37 = vpop.eup %4566 }
0x1430   : > { %v3486_v33 = vsel %vm646_vm7, %v5499_v37, 0.0 }
0x1431   : > { %3487 = vadd.xlane.f32.xlu2 %v3486_v33 }
0x143c   : > { %3552 = vrot.lane.b32.xlu1 %v5258_v3, %s5767_s25 }
0x143f   : > { %3630 = vrot.lane.b32.xlu0 %v5271_v7, %s5767_s25 }
0x1444   : > { %3676 = vrot.lane.b32.xlu1 %v3259_v41, %s5768_s26 }
0x1447   : > { %3660 = vrot.lane.b32.xlu0 %v5432_v2, %s5769_s28 }
0x1449   : > { %4410 = vrot.lane.b32.xlu2 %v4409_v27, %s5767_s25  ;;  %s5711_s25 = scalar_lea.vmem %s5741_s15, %s5772_s27 }
0x144c   : > { %3678 = vrot.lane.b32.xlu1 %v3285_v0, %s5768_s26 }
0x144f   : > { %3662 = vrot.lane.b32.xlu0 %v5437_v6, %s5769_s28 }
0x1454   : > { %3680 = vrot.lane.b32.xlu1 %v3311_v8, %s5768_s26 }
0x1457   : > { %3664 = vrot.lane.b32.xlu0 %v5441_v13, %s5769_s28 }
0x145c   : > { %3682 = vrot.lane.b32.xlu1 %v3337_v1, %s5768_s26 }
0x145f   : > { %3666 = vrot.lane.b32.xlu0 %v5435_v61, %s5769_s28 }
0x1461   : > { %v3482_v3 = vpop.xlane.xlu0 %3481 }
0x1462   : > { %4568 = vrcp.f32 %v3482_v3  ;;  %v3501_v54 = vand.u32 2147483647, %v3482_v3  ;;  %v3503_v61 = vand.u32 2147483648, %v3482_v3  ;;  %vm3497_vm13 = vweird.f32 %v3482_v3 }
0x1464   : > { %vm3502_vm4 = vcmp.eq.f32.partialorder %v3501_v54, 8.507059e+37  ;;  %v3504_v1 = vor.u32 1.1754944e-38, %v3503_v61 }
0x1468   : > { %v4569_v25 = vpop.eup %4568 }
0x1469   : > { %v3493_v4 = vmul.f32 %v4569_v25, %v3482_v3  ;;  %vm3498_vm11 = vweird.f32 %v4569_v25  ;;  %v4299_v3 = vld [vmem:[%s5731_s5 + $0x38] sm:$0xff] }
0x146a   : > { %vm5522_vm14 = vmor %vm3497_vm13, %vm3498_vm11 }
0x146b   : > { %v3494_v2 = vsub.f32 1.0, %v3493_v4 }
0x146d   : > { %v3495_v29 = vmul.f32 %v4569_v25, %v3494_v2 }
0x146f   : > { %v3496_v13 = vadd.f32 %v4569_v25, %v3495_v29 }
0x1471   : > { %v3500_v60 = vsel %vm5522_vm14, %v4569_v25, %v3496_v13  ;;  %v4298_v25 = vld [vmem:[%s5731_s5 + $0x30] sm:$0xff] }
0x1472   : > { %v3505_v10 = vsel %vm3502_vm4, %v3504_v1, %v3500_v60 }
0x1473   : > { %v3506_v49 = vmul.f32 %v5487_v47, %v3505_v10 }
0x1496   : > { %v3485_v7 = vpop.xlane.xlu1 %3484 }
0x1497   : > { %4570 = vrcp.f32 %v3485_v7  ;;  %v3518_v58 = vand.u32 2147483648, %v3485_v7  ;;  %vm3512_vm15 = vweird.f32 %v3485_v7  ;;  %v3516_v21 = vand.u32 2147483647, %v3485_v7 }
0x1499   : > { %v3519_v50 = vor.u32 1.1754944e-38, %v3518_v58  ;;  %vm3517_vm8 = vcmp.eq.f32.partialorder %v3516_v21, 8.507059e+37 }
0x149d   : > { %v4571_v43 = vpop.eup %4570 }
0x149e   : > { %v3508_v46 = vmul.f32 %v4571_v43, %v3485_v7  ;;  %v3491_v6 = vpop.xlane.xlu0 %3490  ;;  %vm3513_vm12 = vweird.f32 %v4571_v43  ;;  %v4297_v7 = vld [vmem:[%s5731_s5 + $0x28] sm:$0xff] }
0x149f   : > { %4572 = vrcp.f32 %v3491_v6  ;;  %vm3514_vm2 = vmor %vm3512_vm15, %vm3513_vm12  ;;  %v3548_v38 = vand.u32 2147483648, %v3491_v6  ;;  %v3546_v8 = vand.u32 2147483647, %v3491_v6  ;;  %vm3542_vm9 = vweird.f32 %v3491_v6 }
0x14a0   : > { %v3509_v52 = vsub.f32 1.0, %v3508_v46  ;;  %v4296_v46 = vld [vmem:[%s5731_s5 + $0x20] sm:$0xff] }
0x14a1   : > { %v3549_v17 = vor.u32 1.1754944e-38, %v3548_v38  ;;  %vm3547_vm11 = vcmp.eq.f32.partialorder %v3546_v8, 8.507059e+37 }
0x14a2   : > { %v3510_v53 = vmul.f32 %v4571_v43, %v3509_v52 }
0x14a4   : > { %v3488_v30 = vpop.xlane.xlu2 %3487  ;;  %v3511_v57 = vadd.f32 %v4571_v43, %v3510_v53 }
0x14a5   : > { %v4573_v14 = vpop.eup %4572  ;;  %4574 = vrcp.f32 %v3488_v30  ;;  %v3533_v51 = vand.u32 2147483648, %v3488_v30  ;;  %v3531_v35 = vand.u32 2147483647, %v3488_v30  ;;  %vm3527_vm13 = vweird.f32 %v3488_v30 }
0x14a6   : > { %v3538_v41 = vmul.f32 %v4573_v14, %v3491_v6  ;;  %v3515_v40 = vsel %vm3514_vm2, %v4571_v43, %v3511_v57  ;;  %vm3543_vm5 = vweird.f32 %v4573_v14 }
0x14a7   : > { %v3520_v26 = vsel %vm3517_vm8, %v3519_v50, %v3515_v40  ;;  %vm3544_vm10 = vmor %vm3542_vm9, %vm3543_vm5  ;;  %v3534_v47 = vor.u32 1.1754944e-38, %v3533_v51  ;;  %vm3532_vm15 = vcmp.eq.f32.partialorder %v3531_v35, 8.507059e+37 }
0x14a8   : > { %v3539_v0 = vsub.f32 1.0, %v3538_v41  ;;  %v3521_v24 = vmul.f32 %v5491_v18, %v3520_v26 }
0x14aa   : > { %v3540_v48 = vmul.f32 %v4573_v14, %v3539_v0 }
0x14ab   : > { %v4575_v56 = vpop.eup %4574 }
0x14ac   : > { %v3541_v11 = vadd.f32 %v4573_v14, %v3540_v48  ;;  %v3523_v59 = vmul.f32 %v4575_v56, %v3488_v30  ;;  %v4411_v16 = vpop.permute.xlu2 %4410  ;;  %vm3528_vm12 = vweird.f32 %v4575_v56 }
0x14ad   : > { %v4413_v62 = vunpack.i.h.bf16 %v4411_v16  ;;  %v4412_v32 = vunpack.i.l.bf16 %v4411_v16  ;;  %vm3529_vm14 = vmor %vm3527_vm13, %vm3528_vm12 }
0x14ae   : > { %v3545_v5 = vsel %vm3544_vm10, %v4573_v14, %v3541_v11  ;;  %v3524_v22 = vsub.f32 1.0, %v3523_v59  ;;  %v3553_v23 = vpop.permute.xlu1 %3552 }
0x14af   : > { %v3550_v44 = vsel %vm3547_vm11, %v3549_v17, %v3545_v5  ;;  %3573 = vmatpush.msra.mxu0 %v3553_v23  ;;  %3599 = vmatpush.msrb.mxu1 %v4412_v32 }
0x14b0   : > { %v3551_v28 = vmul.f32 %v5495_v36, %v3550_v44  ;;  %v3525_v15 = vmul.f32 %v4575_v56, %v3524_v22  ;;  %3625 = vmatpush.msra.mxu2 %v4413_v62  ;;  %4292 = vmatmul.msk.f32.vlgmr.msra.gmra.mxu0 %vm646_vm7, %v3506_v49 }
0x14b1   : > { %4293 = vmatmul.msk.f32.vlgmr.msrb.gmra.mxu1 %vm646_vm7, %v3521_v24  ;;  %v3631_v31 = vpop.permute.xlu0 %3630  ;;  %3750 = vmatpush.msrb.mxu0 %v4299_v3 }
0x14b2   : > { %v3526_v33 = vadd.f32 %v4575_v56, %v3525_v15  ;;  %3651 = vmatpush.msra.mxu3 %v3631_v31 }
0x14b3   : > { %4295 = vmatmul.msk.f32.vlgmr.msra.gmra.mxu3 %vm646_vm7, %v3551_v28  ;;  %3751 = vmatpush.msrb.mxu0 %v4298_v25 }
0x14b4   : > { %v3530_v27 = vsel %vm3529_vm14, %v4575_v56, %v3526_v33 }
0x14b5   : > { %v3535_v18 = vsel %vm3532_vm15, %v3534_v47, %v3530_v27  ;;  %3752 = vmatpush.msrb.mxu0 %v4297_v7 }
0x14b6   : > { %v3536_v36 = vmul.f32 %v5499_v37, %v3535_v18  ;;  %v3677_v29 = vpop.permute.xlu1 %3676 }
0x14b7   : > { %3753 = vmatpush.msrb.mxu0 %v4296_v46  ;;  %v4309_v46 = vld [vmem:[%s5735_s9 + $0x30] sm:$0xff] }
0x14b8   : > { %4294 = vmatmul.msk.f32.vlgmr.msra.gmra.mxu2 %vm646_vm7, %v3536_v36 }
0x14b9   : > { %v3661_v6 = vpop.permute.xlu0 %3660 }
0x14ba   : > { %v3704_v52 = vsel %vm646_vm7, %v5361_v42, %v3661_v6  ;;  %v4308_v6 = vld [vmem:[%s5735_s9 + $0x28] sm:$0xff] }
0x14bb   : > { %v3708_v13 = vsel %vm1956_vm0, %v3704_v52, %v3677_v29  ;;  %v4307_v29 = vld [vmem:[%s5735_s9 + $0x20] sm:$0xff] }
0x14be   : > { %v3679_v14 = vpop.permute.xlu1 %3678 }
0x14c1   : > { %v3663_v53 = vpop.permute.xlu0 %3662 }
0x14c2   : > { %v3705_v61 = vsel %vm646_vm7, %v5369_v19, %v3663_v53 }
0x14c3   : > { %v3709_v41 = vsel %vm1956_vm0, %v3705_v61, %v3679_v14 }
0x14c6   : > { %v3681_v42 = vpop.permute.xlu1 %3680 }
0x14c9   : > { %v3665_v57 = vpop.permute.xlu0 %3664 }
0x14ca   : > { %v3706_v21 = vsel %vm646_vm7, %v5372_v12, %v3665_v57  ;;  %v4423_v12 = vld [vmem:[%s5732_s6 + $0x1] ss:$0 sm:$0xff] }
0x14cb   : > { %v3710_v0 = vsel %vm1956_vm0, %v3706_v21, %v3681_v42 }
0x14ce   : > { %v3683_v38 = vpop.permute.xlu1 %3682 }
0x14d1   : > { %v3667_v40 = vpop.permute.xlu0 %3666 }
0x14d2   : > { %v3707_v19 = vsel %vm646_vm7, %v5366_v9, %v3667_v40 }
0x14d3   : > { %v3711_v50 = vsel %vm1956_vm0, %v3707_v19, %v3683_v38  ;;  %v4323_v38 = vld [vmem:[%s5737_s11 + $0x78] sm:$0xff] }
0x14d4   : > { %3966 = vmatpush.msrb.mxu2 %v4323_v38 }
0x152d   : > { %v3575_v4 = vpop.f32.mrf.mxu0 }
0x152e   : > { %3692 = vrot.lane.b32.xlu2 %v3575_v4, %s4615_s17  ;;  %v3601_v37 = vpop.f32.mrf.mxu1 }
0x1536   : > { %3694 = vrot.lane.b32.xlu2 %v3601_v37, %s4615_s17  ;;  %v3653_v43 = vpop.f32.mrf.mxu3 }
0x153b   : > { %v3627_v2 = vpop.f32.mrf.mxu2 }
0x153e   : > { %3696 = vrot.lane.b32.xlu2 %v3627_v2, %s4615_s17 }
0x1546   : > { %3698 = vrot.lane.b32.xlu2 %v3653_v43, %s4615_s17  ;;  %v4310_v43 = vld [vmem:[%s5735_s9 + $0x38] sm:$0xff] }
0x1547   : > { %3911 = vmatpush.msra.mxu1 %v4310_v43 }
0x1549   : > { %3912 = vmatpush.msra.mxu1 %v4309_v46 }
0x154b   : > { %3913 = vmatpush.msra.mxu1 %v4308_v6  ;;  %v4317_v6 = vld [vmem:[%s5737_s11 + $0x48] sm:$0xff] }
0x154d   : > { %3914 = vmatpush.msra.mxu1 %v4307_v29  ;;  %v4316_v29 = vld [vmem:[%s5737_s11 + $0x40] sm:$0xff] }
0x1588   : > { %v3693_v54 = vpop.permute.xlu2 %3692 }
0x1589   : > { %v3712_v30 = vsel %vm1961_vm1, %v3708_v13, %v3693_v54 }
0x158a   : > { %4301 = vmatmul.msk.f32.vlgmr.msrb.gmra.mxu0 %vm601_vm6, %v3712_v30 }
0x1590   : > { %v3695_v58 = vpop.permute.xlu2 %3694 }
0x1591   : > { %v3713_v45 = vsel %vm1961_vm1, %v3709_v41, %v3695_v58 }
0x1592   : > { %4302 = vmatmul.msk.f32.gmra.mxu0 %vm601_vm6, %v3713_v45 }
0x1598   : > { %v3697_v60 = vpop.permute.xlu2 %3696 }
0x1599   : > { %v3714_v1 = vsel %vm1961_vm1, %v3710_v0, %v3697_v60 }
0x159a   : > { %4303 = vmatmul.msk.f32.gmra.mxu0 %vm601_vm6, %v3714_v1  ;;  %v5621_v1 = vld [vmem:[%s5733_s7 + $0x1] ss:$0 sm:$0xff] }
0x15a0   : > { %v3699_v48 = vpop.permute.xlu2 %3698 }
0x15a1   : > { %v3715_v8 = vsel %vm1961_vm1, %v3711_v50, %v3699_v48  ;;  %v4322_v50 = vld [vmem:[%s5737_s11 + $0x70] sm:$0xff] }
0x15a2   : > { %4304 = vmatmul.msk.f32.gmra.mxu0 %vm601_vm6, %v3715_v8  ;;  %3967 = vmatpush.msrb.mxu2 %v4322_v50 }
0x1607   : > { %v3755_v56 = vpop.f32.mrf.mxu0 }
0x1608   : > { %v3756_v10 = vadd.f32 %v4423_v12, %v3755_v56  ;;  %v4425_v56 = vld [vmem:[%s5734_s8 + $0x1] ss:$0 sm:$0xff] }
0x160a   : > { %v3767_v26 = vadd.f32 %v3756_v10, %v5233_v20  ;;  %v4321_v10 = vld [vmem:[%s5737_s11 + $0x68] sm:$0xff] }
0x160b   : > { %3968 = vmatpush.msrb.mxu2 %v4321_v10 }
0x160c   : > { %v3775_v11 = vsel %vm601_vm6, %v3767_v26, 0.0 }
0x160d   : > { %3776 = vadd.xlane.f32.xlu0 %v3775_v11 }
0x160f   : > { %v3758_v9 = vpop.f32.mrf.mxu0 }
0x1610   : > { %v3759_v59 = vadd.f32 %v4423_v12, %v3758_v9 }
0x1612   : > { %v3768_v16 = vadd.f32 %v3759_v59, %v5240_v39 }
0x1614   : > { %v3778_v17 = vsel %vm601_vm6, %v3768_v16, 0.0 }
0x1615   : > { %3779 = vadd.xlane.f32.xlu1 %v3778_v17 }
0x1617   : > { %v3761_v62 = vpop.f32.mrf.mxu0 }
0x1618   : > { %v3762_v32 = vadd.f32 %v4423_v12, %v3761_v62 }
0x161a   : > { %v3769_v5 = vadd.f32 %v3762_v32, %v5246_v34 }
0x161c   : > { %v3781_v22 = vsel %vm601_vm6, %v3769_v5, 0.0 }
0x161d   : > { %3782 = vadd.xlane.f32.xlu2 %v3781_v22  ;;  %v4319_v22 = vld [vmem:[%s5737_s11 + $0x58] sm:$0xff] }
0x161f   : > { %v3764_v23 = vpop.f32.mrf.mxu0 }
0x1620   : > { %v3765_v49 = vadd.f32 %v4423_v12, %v3764_v23 }
0x1622   : > { %v3770_v20 = vadd.f32 %v3765_v49, %v5251_v63 }
0x1624   : > { %v3784_v44 = vsel %vm601_vm6, %v3770_v20, 0.0 }
0x1625   : > { %3785 = vadd.xlane.f32.xlu0 %v3784_v44 }
0x1680   : > { %v3777_v51 = vpop.xlane.xlu0 %3776 }
0x1681   : > { %v3787_v39 = vmul.f32 %v3777_v51, %v5085_v55 }
0x1683   : > { %v3791_v24 = vsub.f32 %v3767_v26, %v3787_v39 }
0x1685   : > { %v3795_v28 = vmul.f32 %v3791_v24, %v3791_v24 }
0x1687   : > { %v3799_v15 = vsel %vm601_vm6, %v3795_v28, 0.0 }
0x1688   : > { %3800 = vadd.xlane.f32.xlu1 %v3799_v15  ;;  %v3780_v35 = vpop.xlane.xlu1 %3779 }
0x1689   : > { %v3788_v34 = vmul.f32 %v3780_v35, %v5085_v55 }
0x168b   : > { %v5586_v31 = vsub.f32 %v3768_v16, %v3788_v34  ;;  %v4320_v16 = vld [vmem:[%s5737_s11 + $0x60] sm:$0xff] }
0x168c   : > { %3969 = vmatpush.msrb.mxu2 %v4320_v16 }
0x168d   : > { %v3796_v33 = vmul.f32 %v5586_v31, %v5586_v31 }
0x168e   : > { %3970 = vmatpush.msrb.mxu2 %v4319_v22 }
0x168f   : > { %v3802_v63 = vsel %vm601_vm6, %v3796_v33, 0.0 }
0x1690   : > { %3803 = vadd.xlane.f32.xlu2 %v3802_v63  ;;  %v3783_v47 = vpop.xlane.xlu2 %3782 }
0x1691   : > { %v3789_v27 = vmul.f32 %v3783_v47, %v5085_v55 }
0x1693   : > { %v5592_v18 = vsub.f32 %v3769_v5, %v3789_v27 }
0x1695   : > { %v3797_v36 = vmul.f32 %v5592_v18, %v5592_v18 }
0x1697   : > { %v3805_v3 = vsel %vm601_vm6, %v3797_v36, 0.0 }
0x1698   : > { %v3786_v25 = vpop.xlane.xlu0 %3785  ;;  %3806 = vadd.xlane.f32.xlu0 %v3805_v3 }
0x1699   : > { %v3790_v7 = vmul.f32 %v3786_v25, %v5085_v55 }
0x169b   : > { %v5598_v4 = vsub.f32 %v3770_v20, %v3790_v7 }
0x169d   : > { %v3798_v37 = vmul.f32 %v5598_v4, %v5598_v4 }
0x169f   : > { %v3808_v2 = vsel %vm601_vm6, %v3798_v37, 0.0 }
0x16a0   : > { %3809 = vadd.xlane.f32.xlu1 %v3808_v2 }
0x16fb   : > { %v3801_v52 = vpop.xlane.xlu1 %3800 }
0x16fc   : > { %v3811_v53 = vmul.f32 %v3801_v52, %v5085_v55 }
0x16fe   : > { %v3815_v13 = vadd.f32 1e-05, %v3811_v53 }
0x1700   : > { %4576 = vrsqrt.f32 %v3815_v13  ;;  %vm3825_vm0 = vweird.f32 %v3815_v13 }
0x1703   : > { %v3804_v54 = vpop.xlane.xlu2 %3803 }
0x1704   : > { %v3812_v30 = vmul.f32 %v3804_v54, %v5085_v55 }
0x1706   : > { %v4577_v14 = vpop.eup %4576  ;;  %v3816_v61 = vadd.f32 1e-05, %v3812_v30 }
0x1707   : > { %v3820_v57 = vmul.f32 %v4577_v14, %v3815_v13  ;;  %vm3826_vm7 = vweird.f32 %v4577_v14 }
0x1708   : > { %4578 = vrsqrt.f32 %v3816_v61  ;;  %vm3827_vm1 = vmor %vm3825_vm0, %vm3826_vm7  ;;  %vm3835_vm4 = vweird.f32 %v3816_v61 }
0x1709   : > { %v3821_v58 = vmul.f32 %v4577_v14, %v3820_v57 }
0x170b   : > { %v3822_v41 = vmul.f32 0.5, %v3821_v58  ;;  %v3807_v45 = vpop.xlane.xlu0 %3806 }
0x170c   : > { %v3813_v42 = vmul.f32 %v3807_v45, %v5085_v55 }
0x170d   : > { %v3823_v21 = vsub.f32 1.5, %v3822_v41 }
0x170e   : > { %v4579_v60 = vpop.eup %4578  ;;  %v3817_v0 = vadd.f32 1e-05, %v3813_v42 }
0x170f   : > { %v3824_v40 = vmul.f32 %v4577_v14, %v3823_v21  ;;  %v3830_v19 = vmul.f32 %v4579_v60, %v3816_v61  ;;  %vm3836_vm2 = vweird.f32 %v4579_v60  ;;  %v4427_v21 = vld [vmem:[%s5738_s12 + $0x1] ss:$0 sm:$0xff] }
0x1710   : > { %4580 = vrsqrt.f32 %v3817_v0  ;;  %vm3837_vm5 = vmor %vm3835_vm4, %vm3836_vm2  ;;  %vm3845_vm9 = vweird.f32 %v3817_v0 }
0x1711   : > { %v3828_v48 = vsel %vm3827_vm1, %v4577_v14, %v3824_v40  ;;  %v3831_v8 = vmul.f32 %v4579_v60, %v3830_v19 }
0x1712   : > { %v3859_v12 = vmul.f32 %v3828_v48, %v3791_v24 }
0x1713   : > { %v3832_v26 = vmul.f32 0.5, %v3831_v8  ;;  %v3810_v11 = vpop.xlane.xlu1 %3809 }
0x1714   : > { %v3866_v9 = vmul.f32 %v5621_v1, %v3859_v12  ;;  %v3814_v59 = vmul.f32 %v3810_v11, %v5085_v55 }
0x1715   : > { %v3833_v17 = vsub.f32 1.5, %v3832_v26 }
0x1716   : > { %v4581_v62 = vpop.eup %4580  ;;  %v3818_v32 = vadd.f32 1e-05, %v3814_v59  ;;  %v5640_v5 = vadd.f32 %v4425_v56, %v3866_v9 }
0x1717   : > { %v3834_v23 = vmul.f32 %v4579_v60, %v3833_v17  ;;  %v3840_v49 = vmul.f32 %v4581_v62, %v3817_v0  ;;  %vm3846_vm8 = vweird.f32 %v4581_v62 }
0x1718   : > { %4582 = vrsqrt.f32 %v3818_v32  ;;  %4312 = vmatmul.msk.f32.vlgmr.msra.gmra.mxu1 %vm601_vm6, %v5640_v5  ;;  %vm3847_vm10 = vmor %vm3845_vm9, %vm3846_vm8  ;;  %vm3855_vm12 = vweird.f32 %v3818_v32 }
0x1719   : > { %v3838_v20 = vsel %vm3837_vm5, %v4579_v60, %v3834_v23  ;;  %v3841_v44 = vmul.f32 %v4581_v62, %v3840_v49 }
0x171a   : > { %v3860_v51 = vmul.f32 %v3838_v20, %v5586_v31 }
0x171b   : > { %v3842_v39 = vmul.f32 0.5, %v3841_v44 }
0x171c   : > { %v3867_v24 = vmul.f32 %v5621_v1, %v3860_v51 }
0x171d   : > { %v3843_v28 = vsub.f32 1.5, %v3842_v39 }
0x171e   : > { %v4583_v15 = vpop.eup %4582  ;;  %v3874_v35 = vadd.f32 %v4425_v56, %v3867_v24 }
0x171f   : > { %v3844_v34 = vmul.f32 %v4581_v62, %v3843_v28  ;;  %v3850_v33 = vmul.f32 %v4583_v15, %v3818_v32  ;;  %vm3856_vm11 = vweird.f32 %v4583_v15 }
0x1720   : > { %4313 = vmatmul.msk.f32.gmra.mxu1 %vm601_vm6, %v3874_v35  ;;  %vm3857_vm13 = vmor %vm3855_vm12, %vm3856_vm11 }
0x1721   : > { %v3848_v63 = vsel %vm3847_vm10, %v4581_v62, %v3844_v34  ;;  %v3851_v47 = vmul.f32 %v4583_v15, %v3850_v33 }
0x1722   : > { %v3861_v27 = vmul.f32 %v3848_v63, %v5592_v18  ;;  %v4318_v18 = vld [vmem:[%s5737_s11 + $0x50] sm:$0xff] }
0x1723   : > { %v3852_v36 = vmul.f32 0.5, %v3851_v47  ;;  %3971 = vmatpush.msrb.mxu2 %v4318_v18 }
0x1724   : > { %v3868_v31 = vmul.f32 %v5621_v1, %v3861_v27 }
0x1725   : > { %v3853_v3 = vsub.f32 1.5, %v3852_v36  ;;  %3972 = vmatpush.msrb.mxu2 %v4317_v6 }
0x1726   : > { %v3875_v25 = vadd.f32 %v4425_v56, %v3868_v31 }
0x1727   : > { %v3854_v7 = vmul.f32 %v4583_v15, %v3853_v3  ;;  %3973 = vmatpush.msrb.mxu2 %v4316_v29 }
0x1728   : > { %4314 = vmatmul.msk.f32.gmra.mxu1 %vm601_vm6, %v3875_v25 }
0x1729   : > { %v3858_v37 = vsel %vm3857_vm13, %v4583_v15, %v3854_v7 }
0x172a   : > { %v3862_v2 = vmul.f32 %v3858_v37, %v5598_v4  ;;  %v4426_v4 = vld [vmem:[%s5736_s10 + $0x1] ss:$0 sm:$0xff] }
0x172c   : > { %v3869_v43 = vmul.f32 %v5621_v1, %v3862_v2 }
0x172e   : > { %v3876_v46 = vadd.f32 %v4425_v56, %v3869_v43 }
0x1730   : > { %4315 = vmatmul.msk.f32.gmra.mxu1 %vm601_vm6, %v3876_v46 }
0x1795   : > { %v3916_v52 = vpop.f32.mrf.mxu1 }
0x1796   : > { %v3917_v53 = vadd.f32 %v4426_v4, %v3916_v52 }
0x1798   : > { %v3928_v13 = vmax.f32 %v3917_v53, 0.0 }
0x179a   : > { %4325 = vmatmul.msk.f32.vlgmr.msrb.gmra.mxu2 %vm2195_vm3, %v3928_v13 }
0x179d   : > { %v3919_v54 = vpop.f32.mrf.mxu1 }
0x179e   : > { %v3920_v30 = vadd.f32 %v4426_v4, %v3919_v54  ;;  %v4428_v54 = vld [vmem:[%s5739_s13 + $0x1] ss:$0 sm:$0xff] }
0x17a0   : > { %v3929_v14 = vmax.f32 %v3920_v30, 0.0 }
0x17a2   : > { %4326 = vmatmul.msk.f32.gmra.mxu2 %vm2195_vm3, %v3929_v14 }
0x17a5   : > { %v3922_v61 = vpop.f32.mrf.mxu1 }
0x17a6   : > { %v3923_v57 = vadd.f32 %v4426_v4, %v3922_v61  ;;  %v4429_v61 = vld [vmem:[%s5740_s14 + $0x1] ss:$0 sm:$0xff] }
0x17a8   : > { %v3930_v58 = vmax.f32 %v3923_v57, 0.0 }
0x17aa   : > { %4327 = vmatmul.msk.f32.gmra.mxu2 %vm2195_vm3, %v3930_v58 }
0x17ad   : > { %v3925_v41 = vpop.f32.mrf.mxu1 }
0x17ae   : > { %v3926_v45 = vadd.f32 %v4426_v4, %v3925_v41 }
0x17b0   : > { %v3931_v42 = vmax.f32 %v3926_v45, 0.0 }
0x17b2   : > { %4328 = vmatmul.msk.f32.gmra.mxu2 %vm2195_vm3, %v3931_v42 }
0x181d   : > { %v3975_v60 = vpop.f32.mrf.mxu2 }
0x181e   : > { %v3976_v0 = vadd.f32 %v4427_v21, %v3975_v60 }
0x1820   : > { %v3987_v1 = vadd.f32 %v3976_v0, %v5640_v5 }
0x1822   : > { %v3995_v40 = vsel %vm601_vm6, %v3987_v1, 0.0 }
0x1823   : > { %3996 = vadd.xlane.f32.xlu2 %v3995_v40 }
0x1825   : > { %v3978_v19 = vpop.f32.mrf.mxu2 }
0x1826   : > { %v3979_v38 = vadd.f32 %v4427_v21, %v3978_v19 }
0x1828   : > { %v3988_v50 = vadd.f32 %v3979_v38, %v3874_v35 }
0x182a   : > { %v3998_v48 = vsel %vm601_vm6, %v3988_v50, 0.0 }
0x182b   : > { %3999 = vadd.xlane.f32.xlu0 %v3998_v48 }
0x182d   : > { %v3981_v8 = vpop.f32.mrf.mxu2 }
0x182e   : > { %v3982_v12 = vadd.f32 %v4427_v21, %v3981_v8 }
0x1830   : > { %v3989_v56 = vadd.f32 %v3982_v12, %v3875_v25 }
0x1832   : > { %v4001_v10 = vsel %vm601_vm6, %v3989_v56, 0.0 }
0x1833   : > { %4002 = vadd.xlane.f32.xlu1 %v4001_v10 }
0x1835   : > { %v3984_v26 = vpop.f32.mrf.mxu2 }
0x1836   : > { %v3985_v11 = vadd.f32 %v4427_v21, %v3984_v26 }
0x1838   : > { %v3990_v9 = vadd.f32 %v3985_v11, %v3876_v46 }
0x183a   : > { %v4004_v59 = vsel %vm601_vm6, %v3990_v9, 0.0 }
0x183b   : > { %4005 = vadd.xlane.f32.xlu2 %v4004_v59 }
0x1896   : > { %v3997_v16 = vpop.xlane.xlu2 %3996 }
0x1897   : > { %v4007_v17 = vmul.f32 %v3997_v16, %v5085_v55 }
0x1899   : > { %v4011_v62 = vsub.f32 %v3987_v1, %v4007_v17 }
0x189b   : > { %v4015_v32 = vmul.f32 %v4011_v62, %v4011_v62 }
0x189d   : > { %v4019_v5 = vsel %vm601_vm6, %v4015_v32, 0.0 }
0x189e   : > { %v4000_v22 = vpop.xlane.xlu0 %3999  ;;  %4020 = vadd.xlane.f32.xlu0 %v4019_v5 }
0x189f   : > { %v4008_v23 = vmul.f32 %v4000_v22, %v5085_v55 }
0x18a1   : > { %v4012_v49 = vsub.f32 %v3988_v50, %v4008_v23 }
0x18a3   : > { %v4016_v20 = vmul.f32 %v4012_v49, %v4012_v49 }
0x18a5   : > { %v4022_v44 = vsel %vm601_vm6, %v4016_v20, 0.0 }
0x18a6   : > { %v4003_v51 = vpop.xlane.xlu1 %4002  ;;  %4023 = vadd.xlane.f32.xlu1 %v4022_v44 }
0x18a7   : > { %v4009_v39 = vmul.f32 %v4003_v51, %v5085_v55 }
0x18a9   : > { %v5685_v24 = vsub.f32 %v3989_v56, %v4009_v39 }
0x18ab   : > { %v4017_v28 = vmul.f32 %v5685_v24, %v5685_v24 }
0x18ad   : > { %v4025_v15 = vsel %vm601_vm6, %v4017_v28, 0.0 }
0x18ae   : > { %4026 = vadd.xlane.f32.xlu2 %v4025_v15  ;;  %v4006_v35 = vpop.xlane.xlu2 %4005 }
0x18af   : > { %v4010_v34 = vmul.f32 %v4006_v35, %v5085_v55 }
0x18b1   : > { %v5691_v33 = vsub.f32 %v3990_v9, %v4010_v34 }
0x18b3   : > { %v4018_v63 = vmul.f32 %v5691_v33, %v5691_v33 }
0x18b5   : > { %v4028_v47 = vsel %vm601_vm6, %v4018_v63, 0.0 }
0x18b6   : > { %4029 = vadd.xlane.f32.xlu0 %v4028_v47 }
0x1911   : > { %v4021_v27 = vpop.xlane.xlu0 %4020 }
0x1912   : > { %v4031_v36 = vmul.f32 %v4021_v27, %v5085_v55 }
0x1914   : > { %v4035_v31 = vadd.f32 1e-05, %v4031_v36 }
0x1916   : > { %4584 = vrsqrt.f32 %v4035_v31  ;;  %vm4045_vm14 = vweird.f32 %v4035_v31 }
0x1919   : > { %v4024_v3 = vpop.xlane.xlu1 %4023 }
0x191a   : > { %v4032_v25 = vmul.f32 %v4024_v3, %v5085_v55 }
0x191c   : > { %v4585_v7 = vpop.eup %4584  ;;  %v4036_v37 = vadd.f32 1e-05, %v4032_v25 }
0x191d   : > { %v4040_v2 = vmul.f32 %v4585_v7, %v4035_v31  ;;  %vm4046_vm3 = vweird.f32 %v4585_v7 }
0x191e   : > { %4586 = vrsqrt.f32 %v4036_v37  ;;  %vm4047_vm15 = vmor %vm4045_vm14, %vm4046_vm3  ;;  %vm4055_vm0 = vweird.f32 %v4036_v37 }
0x191f   : > { %v4041_v43 = vmul.f32 %v4585_v7, %v4040_v2 }
0x1921   : > { %v4042_v46 = vmul.f32 0.5, %v4041_v43  ;;  %v4027_v18 = vpop.xlane.xlu2 %4026 }
0x1922   : > { %v4033_v6 = vmul.f32 %v4027_v18, %v5085_v55 }
0x1923   : > { %v4043_v29 = vsub.f32 1.5, %v4042_v46 }
0x1924   : > { %v4587_v4 = vpop.eup %4586  ;;  %v4037_v52 = vadd.f32 1e-05, %v4033_v6 }
0x1925   : > { %v4044_v53 = vmul.f32 %v4585_v7, %v4043_v29  ;;  %v4050_v13 = vmul.f32 %v4587_v4, %v4036_v37  ;;  %vm4056_vm7 = vweird.f32 %v4587_v4 }
0x1926   : > { %4588 = vrsqrt.f32 %v4037_v52  ;;  %vm4057_vm1 = vmor %vm4055_vm0, %vm4056_vm7  ;;  %vm4065_vm4 = vweird.f32 %v4037_v52 }
0x1927   : > { %v4048_v30 = vsel %vm4047_vm15, %v4585_v7, %v4044_v53  ;;  %v4051_v14 = vmul.f32 %v4587_v4, %v4050_v13 }
0x1928   : > { %v4079_v57 = vmul.f32 %v4048_v30, %v4011_v62 }
0x1929   : > { %v4052_v58 = vmul.f32 0.5, %v4051_v14  ;;  %v4030_v41 = vpop.xlane.xlu0 %4029 }
0x192a   : > { %v4086_v45 = vmul.f32 %v4428_v54, %v4079_v57  ;;  %v4034_v42 = vmul.f32 %v4030_v41, %v5085_v55 }
0x192b   : > { %v4053_v21 = vsub.f32 1.5, %v4052_v58 }
0x192c   : > { %v4589_v60 = vpop.eup %4588  ;;  %v4093_v0 = vadd.f32 %v4429_v61, %v4086_v45  ;;  %v4038_v1 = vadd.f32 1e-05, %v4034_v42 }
0x192d   : > { %v4054_v40 = vmul.f32 %v4587_v4, %v4053_v21  ;;  %v4060_v19 = vmul.f32 %v4589_v60, %v4037_v52  ;;  %vm4066_vm2 = vweird.f32 %v4589_v60 }
0x192e   : > { %4097 = vst.msk [vmem:[%s5711_s25] sm:$0xff] %vm601_vm6, %v4093_v0  ;;  %4590 = vrsqrt.f32 %v4038_v1  ;;  %vm4067_vm5 = vmor %vm4065_vm4, %vm4066_vm2  ;;  %vm4075_vm9 = vweird.f32 %v4038_v1 }
0x192f   : > { %v4058_v55 = vsel %vm4057_vm1, %v4587_v4, %v4054_v40  ;;  %v4061_v38 = vmul.f32 %v4589_v60, %v4060_v19 }
0x1930   : > { %v4080_v50 = vmul.f32 %v4058_v55, %v4012_v49 }
0x1931   : > { %v4062_v48 = vmul.f32 0.5, %v4061_v38 }
0x1932   : > { %v4087_v8 = vmul.f32 %v4428_v54, %v4080_v50 }
0x1933   : > { %v4063_v12 = vsub.f32 1.5, %v4062_v48 }
0x1934   : > { %v4591_v56 = vpop.eup %4590  ;;  %v4094_v10 = vadd.f32 %v4429_v61, %v4087_v8 }
0x1935   : > { %v4064_v26 = vmul.f32 %v4589_v60, %v4063_v12  ;;  %v4070_v11 = vmul.f32 %v4591_v56, %v4038_v1  ;;  %vm4076_vm8 = vweird.f32 %v4591_v56 }
0x1936   : > { %4098 = vst.msk [vmem:[%s5711_s25 + $0x8] sm:$0xff] %vm601_vm6, %v4094_v10  ;;  %vm4077_vm10 = vmor %vm4075_vm9, %vm4076_vm8 }
0x1937   : > { %v4068_v9 = vsel %vm4067_vm5, %v4589_v60, %v4064_v26  ;;  %v4071_v59 = vmul.f32 %v4591_v56, %v4070_v11 }
0x1938   : > { %v4081_v16 = vmul.f32 %v4068_v9, %v5685_v24 }
0x1939   : > { %v4072_v17 = vmul.f32 0.5, %v4071_v59 }
0x193a   : > { %v4088_v62 = vmul.f32 %v4428_v54, %v4081_v16 }
0x193b   : > { %v4073_v32 = vsub.f32 1.5, %v4072_v17 }
0x193c   : > { %v4095_v5 = vadd.f32 %v4429_v61, %v4088_v62 }
0x193d   : > { %v4074_v22 = vmul.f32 %v4591_v56, %v4073_v32 }
0x193e   : > { %4099 = vst.msk [vmem:[%s5711_s25 + $0x10] sm:$0xff] %vm601_vm6, %v4095_v5 }
0x193f   : > { %v4078_v23 = vsel %vm4077_vm10, %v4591_v56, %v4074_v22 }
0x1940   : > { %v4082_v49 = vmul.f32 %v4078_v23, %v5691_v33 }
0x1942   : > { %v4089_v20 = vmul.f32 %v4428_v54, %v4082_v49 }
0x1944   : > { %v4096_v44 = vadd.f32 %v4429_v61, %v4089_v20 }
0x1946   : > { %4100 = vst.msk [vmem:[%s5711_s25 + $0x18] sm:$0xff] %vm601_vm6, %v4096_v44 }
0x1947 PF: > { %s25_s18 = sadd.s32 1, %s4598_s18  }
0x1948   : > { %p22_p4 = scmp.ge.s32.totalorder %s25_s18, 4  }
0x194a   :  { %24 = sbr.rel (!%p22_p4) target bundleno = 1 (0x1), region = 122 }

</bundles_post_ra>
